<compile_context>
chip_gen: v5e
topology: v5e:2x2
jax: 0.10.0
libtpu: 0.0.40
codegen_flags: <defaults>
</compile_context>

<pallas_src>
import functools

import jax
import jax.numpy as jnp
from jax import lax
from jax.experimental import pallas as pl
from jax.experimental.pallas import tpu as pltpu


def _make_kernel(Bc, H, W, Cin, Cout):
    HW = H * W
    inv_hw = 1.0 / float(HW)

    def kernel(x_ref, w_ref, b_ref, o_ref, pad_ref, col_ref):
        # x_ref:   (Bc, H, W, Cin)        unpadded NHWC batch chunk
        # w_ref:   (9*Cin, Cout)          conv weights, (kh, kw, cin) flattened
        # b_ref:   (1, Cout)              conv bias
        # o_ref:   (Bc, Cout)             pooled features (lane-dense)
        # pad_ref: (Bc, H+2, W+2, Cin)    VMEM halo scratch
        # col_ref: (Bc*H*W, 9*Cin)        VMEM im2col scratch

        # In-kernel zero padding: zero the halo buffer, then write the
        # interior.  Zeroed every step so each core's scratch stays correct
        # under "parallel" megacore partitioning of the batch-chunk axis.
        pad_ref[...] = jnp.zeros_like(pad_ref)
        pad_ref[:, 1:H + 1, 1:W + 1, :] = x_ref[...]

        # Build the im2col slab: tap (kh, kw) lands in lanes
        # [(kh*3+kw)*Cin : (kh*3+kw+1)*Cin], matching the weight flattening.
        # Static 3x3 Python loop -> fully unrolled, visible to the scheduler.
        for kh in range(3):
            for kw in range(3):
                t = kh * 3 + kw
                tap = pad_ref[:, kh:kh + H, kw:kw + W, :]        # (Bc, H, W, Cin)
                col_ref[:, t * Cin:(t + 1) * Cin] = tap.reshape(Bc * HW, Cin)

        # Single fused matmul: K = 9*Cin instead of nine K = Cin matmuls.
        acc = jnp.dot(col_ref[...], w_ref[...],
                      preferred_element_type=jnp.float32)        # (Bc*HW, Cout)
        acc = jnp.maximum(acc + b_ref[...], 0.0)                 # bias + ReLU
        # Global average pool: sublane-sum (XLU), then one scalar multiply.
        pooled = jnp.sum(acc.reshape(Bc, HW, Cout), axis=1) * inv_hw
        o_ref[...] = pooled.astype(o_ref.dtype)                  # (Bc, Cout)

    return kernel


@functools.partial(jax.jit, static_argnames=("batch_block",))
def feature_extractor(x_nchw, w_oihw, bias, *, batch_block=8):
    """Conv3x3(pad=1) -> ReLU -> global avg pool -> flatten.

    x_nchw: (B, Cin, H, W) f32   (PyTorch NCHW layout)
    w_oihw: (Cout, Cin, 3, 3) f32 (PyTorch Conv2d weight layout)
    bias:   (Cout,) f32
    returns (B, Cout) f32 features.
    """
    B, Cin, H, W = x_nchw.shape
    Cout = w_oihw.shape[0]

    # NCHW -> NHWC (channels on the lane axis).  No padded copy in HBM.
    x_nhwc = jnp.transpose(x_nchw, (0, 2, 3, 1))

    # Batch chunking: whole batch in one grid step when small, else chunks of
    # `batch_block` images (batch padded to a multiple, sliced off afterwards).
    if B <= batch_block:
        Bc, Bp = B, B
    else:
        Bc = batch_block
        Bp = ((B + Bc - 1) // Bc) * Bc
        if Bp != B:
            x_nhwc = jnp.concatenate(
                [x_nhwc, jnp.zeros((Bp - B, H, W, Cin), x_nhwc.dtype)], axis=0)

    # OIHW -> (kh, kw, cin, cout) -> (9*Cin, Cout): rows ordered (kh, kw, cin)
    # to match the im2col lane layout built in the kernel.
    w_flat = jnp.transpose(w_oihw, (2, 3, 1, 0)).reshape(9 * Cin, Cout)
    bias2d = bias.reshape(1, Cout)

    out = pl.pallas_call(
        _make_kernel(Bc, H, W, Cin, Cout),
        out_shape=jax.ShapeDtypeStruct((Bp, Cout), jnp.float32),
        grid_spec=pltpu.PrefetchScalarGridSpec(
            num_scalar_prefetch=0,
            grid=(Bp // Bc,),
            in_specs=[
                pl.BlockSpec((Bc, H, W, Cin), lambda b: (b, 0, 0, 0)),
                pl.BlockSpec((9 * Cin, Cout), lambda b: (0, 0)),
                pl.BlockSpec((1, Cout), lambda b: (0, 0)),
            ],
            out_specs=pl.BlockSpec((Bc, Cout), lambda b: (b, 0)),
            scratch_shapes=[
                pltpu.VMEM((Bc, H + 2, W + 2, Cin), jnp.float32),   # halo buffer
                pltpu.VMEM((Bc * H * W, 9 * Cin), jnp.float32),     # im2col slab
            ],
        ),
        compiler_params=pltpu.CompilerParams(
            # Batch-chunk axis is independent -> shard across v7x's 2 TCs.
            dimension_semantics=("parallel",),
        ),
    )(x_nhwc, w_flat, bias2d)

    return out[:B]


def _reference(x_nchw, w_oihw, bias):
    """Pure-JAX reference: conv3x3 pad=1 -> ReLU -> global avg pool -> flatten."""
    x_nhwc = jnp.transpose(x_nchw, (0, 2, 3, 1))
    w_hwio = jnp.transpose(w_oihw, (2, 3, 1, 0))
    y = lax.conv_general_dilated(
        x_nhwc, w_hwio, window_strides=(1, 1), padding="SAME",
        dimension_numbers=("NHWC", "HWIO", "NHWC"),
    )
    y = jnp.maximum(y + bias, 0.0)
    return jnp.mean(y, axis=(1, 2))


if __name__ == "__main__":
    # Small deterministic shapes consistent with the assumed CNN backbone.
    B, Cin, H, W, Cout = 2, 4, 16, 16, 32

    key = jax.random.PRNGKey(0)
    kx, kw, kb = jax.random.split(key, 3)
    x = jax.random.normal(kx, (B, Cin, H, W), dtype=jnp.float32)
    w = jax.random.normal(kw, (Cout, Cin, 3, 3), dtype=jnp.float32) * 0.1
    b = jax.random.normal(kb, (Cout,), dtype=jnp.float32) * 0.1

    feats = jax.block_until_ready(feature_extractor(x, w, b))

    ref = _reference(x, w, b)
    assert feats.shape == (B, Cout), feats.shape
    assert jnp.allclose(feats, ref, atol=1e-4, rtol=1e-4), "mismatch vs reference"

    print("KERNEL_OK")
</pallas_src>

<mosaic_0001>
module attributes {stable_mosaic.version = 11 : i64} {
  func.func @kernel(%arg0: i32, %arg1: memref<2x16x16x4xf32, #tpu.memory_space<vmem>>, %arg2: memref<36x32xf32, #tpu.memory_space<vmem>>, %arg3: memref<1x32xf32, #tpu.memory_space<vmem>>, %arg4: memref<2x32xf32, #tpu.memory_space<vmem>>, %arg5: memref<2x18x18x4xf32, #tpu.memory_space<vmem>>, %arg6: memref<512x36xf32, #tpu.memory_space<vmem>>) attributes {dimension_semantics = [#tpu.dimension_semantics<parallel>], iteration_bounds = array<i64: 1>, scalar_prefetch = 0 : i64, scratch_operands = 2 : i64, tpu.core_type = #tpu.core_type<tc>, window_params = [{transform_indices = @transform_0, window_bounds = array<i64: 2, 16, 16, 4>}, {pipeline_mode = #tpu.pipeline_mode<synchronous>, transform_indices = @transform_1, window_bounds = array<i64: 36, 32>}, {pipeline_mode = #tpu.pipeline_mode<synchronous>, transform_indices = @transform_2, window_bounds = array<i64: 1, 32>}, {transform_indices = @transform_3, window_bounds = array<i64: 2, 32>}]} {
    %cst = arith.constant 0.000000e+00 : f32
    %0 = vector.broadcast %cst : f32 to vector<2x18x18x4xf32>
    %c0 = arith.constant 0 : index
    %c0_0 = arith.constant 0 : index
    %c0_1 = arith.constant 0 : index
    %c0_2 = arith.constant 0 : index
    %1 = vector.load %arg5[%c0, %c0_0, %c0_1, %c0_2] : memref<2x18x18x4xf32, #tpu.memory_space<vmem>>, vector<2x18x18x4xf32>
    tpu.vector_store %arg5[%c0, %c0_0, %c0_1, %c0_2], %0 {strides = array<i32>} : memref<2x18x18x4xf32, #tpu.memory_space<vmem>>, vector<2x18x18x4xf32>,
    %c0_3 = arith.constant 0 : index
    %c0_4 = arith.constant 0 : index
    %c0_5 = arith.constant 0 : index
    %c0_6 = arith.constant 0 : index
    %2 = vector.load %arg1[%c0_3, %c0_4, %c0_5, %c0_6] : memref<2x16x16x4xf32, #tpu.memory_space<vmem>>, vector<2x16x16x4xf32>
    %c0_7 = arith.constant 0 : index
    %c1 = arith.constant 1 : index
    %c1_8 = arith.constant 1 : index
    %c0_9 = arith.constant 0 : index
    %3 = vector.load %arg5[%c0_7, %c1, %c1_8, %c0_9] : memref<2x18x18x4xf32, #tpu.memory_space<vmem>>, vector<2x16x16x4xf32>
    tpu.vector_store %arg5[%c0_7, %c1, %c1_8, %c0_9], %2 {strides = array<i32>} : memref<2x18x18x4xf32, #tpu.memory_space<vmem>>, vector<2x16x16x4xf32>,
    %c0_10 = arith.constant 0 : index
    %c0_11 = arith.constant 0 : index
    %c0_12 = arith.constant 0 : index
    %c0_13 = arith.constant 0 : index
    %4 = vector.load %arg5[%c0_10, %c0_11, %c0_12, %c0_13] : memref<2x18x18x4xf32, #tpu.memory_space<vmem>>, vector<2x16x16x4xf32>
    %5 = vector.shape_cast %4 : vector<2x16x16x4xf32> to vector<512x4xf32>
    %c0_14 = arith.constant 0 : index
    %c0_15 = arith.constant 0 : index
    %6 = vector.load %arg6[%c0_14, %c0_15] : memref<512x36xf32, #tpu.memory_space<vmem>>, vector<512x4xf32>
    tpu.vector_store %arg6[%c0_14, %c0_15], %5 {strides = array<i32>} : memref<512x36xf32, #tpu.memory_space<vmem>>, vector<512x4xf32>,
    %c0_16 = arith.constant 0 : index
    %c0_17 = arith.constant 0 : index
    %c1_18 = arith.constant 1 : index
    %c0_19 = arith.constant 0 : index
    %7 = vector.load %arg5[%c0_16, %c0_17, %c1_18, %c0_19] : memref<2x18x18x4xf32, #tpu.memory_space<vmem>>, vector<2x16x16x4xf32>
    %8 = vector.shape_cast %7 : vector<2x16x16x4xf32> to vector<512x4xf32>
    %c0_20 = arith.constant 0 : index
    %c4 = arith.constant 4 : index
    %9 = vector.load %arg6[%c0_20, %c4] : memref<512x36xf32, #tpu.memory_space<vmem>>, vector<512x4xf32>
    tpu.vector_store %arg6[%c0_20, %c4], %8 {strides = array<i32>} : memref<512x36xf32, #tpu.memory_space<vmem>>, vector<512x4xf32>,
    %c0_21 = arith.constant 0 : index
    %c0_22 = arith.constant 0 : index
    %c2 = arith.constant 2 : index
    %c0_23 = arith.constant 0 : index
    %10 = vector.load %arg5[%c0_21, %c0_22, %c2, %c0_23] : memref<2x18x18x4xf32, #tpu.memory_space<vmem>>, vector<2x16x16x4xf32>
    %11 = vector.shape_cast %10 : vector<2x16x16x4xf32> to vector<512x4xf32>
    %c0_24 = arith.constant 0 : index
    %c8 = arith.constant 8 : index
    %12 = vector.load %arg6[%c0_24, %c8] : memref<512x36xf32, #tpu.memory_space<vmem>>, vector<512x4xf32>
    tpu.vector_store %arg6[%c0_24, %c8], %11 {strides = array<i32>} : memref<512x36xf32, #tpu.memory_space<vmem>>, vector<512x4xf32>,
    %c0_25 = arith.constant 0 : index
    %c1_26 = arith.constant 1 : index
    %c0_27 = arith.constant 0 : index
    %c0_28 = arith.constant 0 : index
    %13 = vector.load %arg5[%c0_25, %c1_26, %c0_27, %c0_28] : memref<2x18x18x4xf32, #tpu.memory_space<vmem>>, vector<2x16x16x4xf32>
    %14 = vector.shape_cast %13 : vector<2x16x16x4xf32> to vector<512x4xf32>
    %c0_29 = arith.constant 0 : index
    %c12 = arith.constant 12 : index
    %15 = vector.load %arg6[%c0_29, %c12] : memref<512x36xf32, #tpu.memory_space<vmem>>, vector<512x4xf32>
    tpu.vector_store %arg6[%c0_29, %c12], %14 {strides = array<i32>} : memref<512x36xf32, #tpu.memory_space<vmem>>, vector<512x4xf32>,
    %c0_30 = arith.constant 0 : index
    %c1_31 = arith.constant 1 : index
    %c1_32 = arith.constant 1 : index
    %c0_33 = arith.constant 0 : index
    %16 = vector.load %arg5[%c0_30, %c1_31, %c1_32, %c0_33] : memref<2x18x18x4xf32, #tpu.memory_space<vmem>>, vector<2x16x16x4xf32>
    %17 = vector.shape_cast %16 : vector<2x16x16x4xf32> to vector<512x4xf32>
    %c0_34 = arith.constant 0 : index
    %c16 = arith.constant 16 : index
    %18 = vector.load %arg6[%c0_34, %c16] : memref<512x36xf32, #tpu.memory_space<vmem>>, vector<512x4xf32>
    tpu.vector_store %arg6[%c0_34, %c16], %17 {strides = array<i32>} : memref<512x36xf32, #tpu.memory_space<vmem>>, vector<512x4xf32>,
    %c0_35 = arith.constant 0 : index
    %c1_36 = arith.constant 1 : index
    %c2_37 = arith.constant 2 : index
    %c0_38 = arith.constant 0 : index
    %19 = vector.load %arg5[%c0_35, %c1_36, %c2_37, %c0_38] : memref<2x18x18x4xf32, #tpu.memory_space<vmem>>, vector<2x16x16x4xf32>
    %20 = vector.shape_cast %19 : vector<2x16x16x4xf32> to vector<512x4xf32>
    %c0_39 = arith.constant 0 : index
    %c20 = arith.constant 20 : index
    %21 = vector.load %arg6[%c0_39, %c20] : memref<512x36xf32, #tpu.memory_space<vmem>>, vector<512x4xf32>
    tpu.vector_store %arg6[%c0_39, %c20], %20 {strides = array<i32>} : memref<512x36xf32, #tpu.memory_space<vmem>>, vector<512x4xf32>,
    %c0_40 = arith.constant 0 : index
    %c2_41 = arith.constant 2 : index
    %c0_42 = arith.constant 0 : index
    %c0_43 = arith.constant 0 : index
    %22 = vector.load %arg5[%c0_40, %c2_41, %c0_42, %c0_43] : memref<2x18x18x4xf32, #tpu.memory_space<vmem>>, vector<2x16x16x4xf32>
    %23 = vector.shape_cast %22 : vector<2x16x16x4xf32> to vector<512x4xf32>
    %c0_44 = arith.constant 0 : index
    %c24 = arith.constant 24 : index
    %24 = vector.load %arg6[%c0_44, %c24] : memref<512x36xf32, #tpu.memory_space<vmem>>, vector<512x4xf32>
    tpu.vector_store %arg6[%c0_44, %c24], %23 {strides = array<i32>} : memref<512x36xf32, #tpu.memory_space<vmem>>, vector<512x4xf32>,
    %c0_45 = arith.constant 0 : index
    %c2_46 = arith.constant 2 : index
    %c1_47 = arith.constant 1 : index
    %c0_48 = arith.constant 0 : index
    %25 = vector.load %arg5[%c0_45, %c2_46, %c1_47, %c0_48] : memref<2x18x18x4xf32, #tpu.memory_space<vmem>>, vector<2x16x16x4xf32>
    %26 = vector.shape_cast %25 : vector<2x16x16x4xf32> to vector<512x4xf32>
    %c0_49 = arith.constant 0 : index
    %c28 = arith.constant 28 : index
    %27 = vector.load %arg6[%c0_49, %c28] : memref<512x36xf32, #tpu.memory_space<vmem>>, vector<512x4xf32>
    tpu.vector_store %arg6[%c0_49, %c28], %26 {strides = array<i32>} : memref<512x36xf32, #tpu.memory_space<vmem>>, vector<512x4xf32>,
    %c0_50 = arith.constant 0 : index
    %c2_51 = arith.constant 2 : index
    %c2_52 = arith.constant 2 : index
    %c0_53 = arith.constant 0 : index
    %28 = vector.load %arg5[%c0_50, %c2_51, %c2_52, %c0_53] : memref<2x18x18x4xf32, #tpu.memory_space<vmem>>, vector<2x16x16x4xf32>
    %29 = vector.shape_cast %28 : vector<2x16x16x4xf32> to vector<512x4xf32>
    %c0_54 = arith.constant 0 : index
    %c32 = arith.constant 32 : index
    %30 = vector.load %arg6[%c0_54, %c32] : memref<512x36xf32, #tpu.memory_space<vmem>>, vector<512x4xf32>
    tpu.vector_store %arg6[%c0_54, %c32], %29 {strides = array<i32>} : memref<512x36xf32, #tpu.memory_space<vmem>>, vector<512x4xf32>,
    %c0_55 = arith.constant 0 : index
    %c0_56 = arith.constant 0 : index
    %31 = vector.load %arg6[%c0_55, %c0_56] : memref<512x36xf32, #tpu.memory_space<vmem>>, vector<512x36xf32>
    %c0_57 = arith.constant 0 : index
    %c0_58 = arith.constant 0 : index
    %32 = vector.load %arg2[%c0_57, %c0_58] : memref<36x32xf32, #tpu.memory_space<vmem>>, vector<36x32xf32>
    %cst_59 = arith.constant dense<0.000000e+00> : vector<512x32xf32>
    %33 = tpu.matmul %31, %32, %cst_59 {dimension_numbers = #tpu.dot_dimension_numbers<[1], [0], [0], [1], [0, 0, 1, 1], [], []>} : vector<512x36xf32>, vector<36x32xf32>, vector<512x32xf32> -> vector<512x32xf32>
    %c0_60 = arith.constant 0 : index
    %c0_61 = arith.constant 0 : index
    %34 = vector.load %arg3[%c0_60, %c0_61] : memref<1x32xf32, #tpu.memory_space<vmem>>, vector<1x32xf32>
    %35 = vector.broadcast %34 : vector<1x32xf32> to vector<512x32xf32>
    %36 = arith.addf %33, %35 : vector<512x32xf32>
    %cst_62 = arith.constant 0.000000e+00 : f32
    %37 = vector.broadcast %cst_62 : f32 to vector<512x32xf32>
    %38 = arith.maximumf %36, %37 : vector<512x32xf32>
    %39 = vector.shape_cast %38 : vector<512x32xf32> to vector<2x256x32xf32>
    %cst_63 = arith.constant dense<0.000000e+00> : vector<2x32xf32>
    %40 = vector.multi_reduction <add>, %39, %cst_63 [1] : vector<2x256x32xf32> to vector<2x32xf32>
    %cst_64 = arith.constant 3.906250e-03 : f32
    %41 = vector.broadcast %cst_64 : f32 to vector<2x32xf32>
    %42 = arith.mulf %40, %41 : vector<2x32xf32>
    %c0_65 = arith.constant 0 : index
    %c0_66 = arith.constant 0 : index
    %43 = vector.load %arg4[%c0_65, %c0_66] : memref<2x32xf32, #tpu.memory_space<vmem>>, vector<2x32xf32>
    tpu.vector_store %arg4[%c0_65, %c0_66], %42 {strides = array<i32>} : memref<2x32xf32, #tpu.memory_space<vmem>>, vector<2x32xf32>,
    return
  }
  func.func @transform_0(%arg0: i32) -> (i32, i32, i32, i32) {
    %c0_i32 = arith.constant 0 : i32
    %c0_i32_0 = arith.constant 0 : i32
    %c0_i32_1 = arith.constant 0 : i32
    %c0_i32_2 = arith.constant 0 : i32
    return %arg0, %c0_i32, %c0_i32_0, %c0_i32_1 : i32, i32, i32, i32
  }
  func.func @transform_1(%arg0: i32) -> (i32, i32) {
    %c0_i32 = arith.constant 0 : i32
    %c0_i32_0 = arith.constant 0 : i32
    %c0_i32_1 = arith.constant 0 : i32
    return %c0_i32, %c0_i32_0 : i32, i32
  }
  func.func @transform_2(%arg0: i32) -> (i32, i32) {
    %c0_i32 = arith.constant 0 : i32
    %c0_i32_0 = arith.constant 0 : i32
    %c0_i32_1 = arith.constant 0 : i32
    return %c0_i32, %c0_i32_0 : i32, i32
  }
  func.func @transform_3(%arg0: i32) -> (i32, i32) {
    %c0_i32 = arith.constant 0 : i32
    %c0_i32_0 = arith.constant 0 : i32
    return %arg0, %c0_i32 : i32, i32
  }
}

</mosaic_0001>

<bundles_post_ra>
// kernel: feature_extractor.1
= control target key start
LH: loop header
LB: loop body
LE: loop exit
PB: predicated region body
PF: predicated region fallthrough
CT: control target
= control target key end

     0   :  { %vm15_vm0 = vcmask 31744   ;;  %v4289_v0 = vmov 0.0   ;;  %s6418_s0 = inlined_call_operand.vmem [shape: f32[2,16,16,4], index: 0, kind: input, shape index: {}]   ;;  %s6419_s1 = inlined_call_operand.vmem [shape: f32[36,32], index: 1, kind: input, shape index: {}]   ;;  %s6420_s2 = inlined_call_operand.vmem [shape: f32[1,32], index: 2, kind: input, shape index: {}]   ;;  %s6421_s3 = inlined_call_operand.hbm [shape: f32[2,32], index: 3, kind: output, shape index: {}]  }
   0x1   :  { %16 = vst.msk [vmem:[#allocation2] sm:$0xff] %vm15_vm0, %v4289_v0 }
   0x2   :  { %8 = vsyncpa [#allocation5], 0  ;;  %17 = vst.msk [vmem:[#allocation2 + $0x8] sm:$0xff] %vm15_vm0, %v4289_v0  ;;  %s4290_s12 = smov 4   ;;  %v125_v2 = vld [vmem:[%s6418_s0] sm:$0xff]  ;;  %vm18_vm1 = vcmask 25600  }
   0x3   :  { %20 = vst.msk [vmem:[#allocation2 + $0x18] sm:$0xff] %vm15_vm0, %v4289_v0  ;;  %v126_v5 = vld [vmem:[%s6418_s0 + $0x8] sm:$0xff]  ;;  %v129_v6 = vld [vmem:[%s6418_s0 + $0x20] sm:$0xff]  ;;  %v127_v7 = vld [vmem:[%s6418_s0 + $0x10] sm:$0xff]  ;;  %vm702_vm2 = vcmask 64544   ;;  %s4291_s29 = smov 8  }
   0x4   :  { %21 = vst.msk [vmem:[#allocation2 + $0x20] sm:$0xff] %vm15_vm0, %v4289_v0  ;;  %v130_v8 = vld [vmem:[%s6418_s0 + $0x28] sm:$0xff]  ;;  %v132_v9 = vld [vmem:[%s6418_s0 + $0x38] sm:$0xff]  ;;  %v133_v11 = vld [vmem:[%s6418_s0 + $0x40] sm:$0xff]  ;;  %vm1087_vm3 = vcmask 97344   ;;  %vm1472_vm4 = vcmask 130144  }
   0x5   :  { %23 = vst.msk [vmem:[#allocation2 + $0x30] sm:$0xff] %vm15_vm0, %v4289_v0  ;;  %v128_v10 = vld [vmem:[%s6418_s0 + $0x18] sm:$0xff]  ;;  %v135_v12 = vld [vmem:[%s6418_s0 + $0x50] sm:$0xff]  ;;  %v138_v16 = vld [vmem:[%s6418_s0 + $0x68] sm:$0xff]  ;;  %vm1857_vm5 = vcmask 162944   ;;  %s4294_s11 = smov 20  }
   0x6   :  { %24 = vst.msk [vmem:[#allocation2 + $0x38] sm:$0xff] %vm15_vm0, %v4289_v0  ;;  %v131_v13 = vld [vmem:[%s6418_s0 + $0x30] sm:$0xff]  ;;  %v136_v14 = vld [vmem:[%s6418_s0 + $0x58] sm:$0xff]  ;;  %v134_v18 = vld [vmem:[%s6418_s0 + $0x48] sm:$0xff]  ;;  %vm2242_vm6 = vcmask 195744   ;;  %s4295_s13 = smov 24  }
   0x7   :  { %26 = vst.msk [vmem:[#allocation2 + $0x48] sm:$0xff] %vm15_vm0, %v4289_v0  ;;  %v139_v20 = vld [vmem:[%s6418_s0 + $0x70] sm:$0xff]  ;;  %v141_v21 = vld [vmem:[%s6418_s0 + $0x80] sm:$0xff]  ;;  %v142_v23 = vld [vmem:[%s6418_s0 + $0x88] sm:$0xff]  ;;  %vm2628_vm7 = vcmask 228544   ;;  %s4296_s14 = smov 28  }
   0x8   :  { %27 = vst.msk [vmem:[#allocation2 + $0x50] sm:$0xff] %vm15_vm0, %v4289_v0  ;;  %v137_v22 = vld [vmem:[%s6418_s0 + $0x60] sm:$0xff]  ;;  %v144_v26 = vld [vmem:[%s6418_s0 + $0x98] sm:$0xff]  ;;  %v147_v32 = vld [vmem:[%s6418_s0 + $0xb0] sm:$0xff]  ;;  %s4297_s15 = smov 32   ;;  %vm3013_vm8 = vcmask 261344  }
   0x9   :  { %v382_v1 = vld [vmem:[#allocation2 + $0x1] sm:$0xff]  ;;  %29 = vst.msk [vmem:[#allocation2 + $0x60] sm:$0xff] %vm15_vm0, %v4289_v0  ;;  %v140_v28 = vld [vmem:[%s6418_s0 + $0x78] sm:$0xff]  ;;  %v143_v34 = vld [vmem:[%s6418_s0 + $0x90] sm:$0xff]  ;;  %vm3729_vm9 = vcmask 1043456   ;;  %vm3398_vm10 = vcmask 294144  }
   0xa   :  { %510 = vrot.lane.b32.xlu0 %v382_v1, %s4290_s12  ;;  %30 = vst.msk [vmem:[#allocation2 + $0x68] sm:$0xff] %vm15_vm0, %v4289_v0  ;;  %v145_v29 = vld [vmem:[%s6418_s0 + $0xa0] sm:$0xff]  ;;  %v148_v35 = vld [vmem:[%s6418_s0 + $0xb8] sm:$0xff]  ;;  %v150_v38 = vld [vmem:[%s6418_s0 + $0xc8] sm:$0xff]  ;;  %vm3536_vm11 = vcmask 293888   ;;  %vm4006_vm12 = vcmask 261120  }
   0xb   :  { %32 = vst.msk [vmem:[#allocation2 + $0x78] sm:$0xff] %vm15_vm0, %v4289_v0  ;;  %v146_v40 = vld [vmem:[%s6418_s0 + $0xa8] sm:$0xff]  ;;  %v151_v41 = vld [vmem:[%s6418_s0 + $0xd0] sm:$0xff]  ;;  %v153_v44 = vld [vmem:[%s6418_s0 + $0xe0] sm:$0xff]  ;;  %s4161_s4 = sshll.u32 %s6421_s3, 4  ;;  %vm4149_vm13 = vcmask 1041409   ;;  %s4162_s4 = int_to_ptr.hbm [resolvable:$true] %s4161_s4 }
   0xc   :  { %33 = vst.msk [vmem:[#allocation2 + $0x80] sm:$0xff] %vm15_vm0, %v4289_v0  ;;  %v149_v46 = vld [vmem:[%s6418_s0 + $0xc0] sm:$0xff]  ;;  %v154_v47 = vld [vmem:[%s6418_s0 + $0xe8] sm:$0xff]  ;;  %v152_v51 = vld [vmem:[%s6418_s0 + $0xd8] sm:$0xff]  ;;  %vm4152_vm14 = vcmask 254976  }
   0xd   :  { %35 = vst.msk [vmem:[#allocation2 + $0x90] sm:$0xff] %vm15_vm0, %v4289_v0  ;;  %v157_v52 = vld [vmem:[%s6418_s0 + $0x100] sm:$0xff]  ;;  %v159_v55 = vld [vmem:[%s6418_s0 + $0x110] sm:$0xff]  ;;  %v160_v57 = vld [vmem:[%s6418_s0 + $0x118] sm:$0xff] }
   0xe   :  { %36 = vst.msk [vmem:[#allocation2 + $0x98] sm:$0xff] %vm15_vm0, %v4289_v0  ;;  %v162_v60 = vld [vmem:[%s6418_s0 + $0x128] sm:$0xff]  ;;  %v163_v63 = vld [vmem:[%s6418_s0 + $0x130] sm:$0xff] }
   0xf   :  { %38 = vst.msk [vmem:[#allocation2 + $0xa8] sm:$0xff] %vm15_vm0, %v4289_v0  ;;  %v158_v62 = vld [vmem:[%s6418_s0 + $0x108] sm:$0xff] }
  0x10   :  { %39 = vst.msk [vmem:[#allocation2 + $0xb0] sm:$0xff] %vm15_vm0, %v4289_v0 }
  0x11   :  { %41 = vst.msk [vmem:[#allocation2 + $0xc0] sm:$0xff] %vm15_vm0, %v4289_v0 }
  0x12   :  { %42 = vst.msk [vmem:[#allocation2 + $0xc8] sm:$0xff] %vm15_vm0, %v4289_v0 }
  0x13   :  { %44 = vst.msk [vmem:[#allocation2 + $0xd8] sm:$0xff] %vm15_vm0, %v4289_v0 }
  0x14   :  { %45 = vst.msk [vmem:[#allocation2 + $0xe0] sm:$0xff] %vm15_vm0, %v4289_v0 }
  0x15   :  { %47 = vst.msk [vmem:[#allocation2 + $0xf0] sm:$0xff] %vm15_vm0, %v4289_v0 }
  0x16   :  { %48 = vst.msk [vmem:[#allocation2 + $0xf8] sm:$0xff] %vm15_vm0, %v4289_v0 }
  0x17   :  { %50 = vst.msk [vmem:[#allocation2 + $0x108] sm:$0xff] %vm15_vm0, %v4289_v0 }
  0x18   :  { %51 = vst.msk [vmem:[#allocation2 + $0x110] sm:$0xff] %vm15_vm0, %v4289_v0 }
  0x19   :  { %53 = vst.msk [vmem:[#allocation2 + $0x120] sm:$0xff] %vm15_vm0, %v4289_v0 }
  0x1a   :  { %54 = vst.msk [vmem:[#allocation2 + $0x128] sm:$0xff] %vm15_vm0, %v4289_v0 }
  0x1b   :  { %56 = vst.msk [vmem:[#allocation2 + $0x138] sm:$0xff] %vm15_vm0, %v4289_v0 }
  0x1c   :  { %57 = vst.msk [vmem:[#allocation2 + $0x140] sm:$0xff] %vm15_vm0, %v4289_v0 }
  0x1d   :  { %59 = vst.msk [vmem:[#allocation2 + $0x150] sm:$0xff] %vm15_vm0, %v4289_v0 }
  0x1e   :  { %60 = vst.msk [vmem:[#allocation2 + $0x158] sm:$0xff] %vm15_vm0, %v4289_v0 }
  0x1f   :  { %62 = vst.msk [vmem:[#allocation2 + $0x168] sm:$0xff] %vm15_vm0, %v4289_v0 }
  0x20   :  { %63 = vst.msk [vmem:[#allocation2 + $0x170] sm:$0xff] %vm15_vm0, %v4289_v0 }
  0x21   :  { %65 = vst.msk [vmem:[#allocation2 + $0x180] sm:$0xff] %vm15_vm0, %v4289_v0 }
  0x22   :  { %66 = vst.msk [vmem:[#allocation2 + $0x188] sm:$0xff] %vm15_vm0, %v4289_v0 }
  0x23   :  { %68 = vst.msk [vmem:[#allocation2 + $0x198] sm:$0xff] %vm15_vm0, %v4289_v0 }
  0x24   :  { %69 = vst.msk [vmem:[#allocation2 + $0x1a0] sm:$0xff] %vm15_vm0, %v4289_v0 }
  0x25   :  { %71 = vst.msk [vmem:[#allocation2 + $0x1b0] sm:$0xff] %vm15_vm0, %v4289_v0 }
  0x26   :  { %72 = vst.msk [vmem:[#allocation2 + $0x1b8] sm:$0xff] %vm15_vm0, %v4289_v0 }
  0x27   :  { %74 = vst.msk [vmem:[#allocation2 + $0x1c8] sm:$0xff] %vm15_vm0, %v4289_v0 }
  0x28   :  { %75 = vst.msk [vmem:[#allocation2 + $0x1d0] sm:$0xff] %vm15_vm0, %v4289_v0 }
  0x29   :  { %77 = vst.msk [vmem:[#allocation2 + $0x1e0] sm:$0xff] %vm15_vm0, %v4289_v0 }
  0x2a   :  { %78 = vst.msk [vmem:[#allocation2 + $0x1e8] sm:$0xff] %vm15_vm0, %v4289_v0 }
  0x2b   :  { %80 = vst.msk [vmem:[#allocation2 + $0x1f8] sm:$0xff] %vm15_vm0, %v4289_v0 }
  0x2c   :  { %81 = vst.msk [vmem:[#allocation2 + $0x200] sm:$0xff] %vm15_vm0, %v4289_v0 }
  0x2d   :  { %83 = vst.msk [vmem:[#allocation2 + $0x210] sm:$0xff] %vm15_vm0, %v4289_v0 }
  0x2e   :  { %84 = vst.msk [vmem:[#allocation2 + $0x218] sm:$0xff] %vm15_vm0, %v4289_v0 }
  0x2f   :  { %86 = vst.msk [vmem:[#allocation2 + $0x228] sm:$0xff] %vm15_vm0, %v4289_v0 }
  0x30   :  { %87 = vst.msk [vmem:[#allocation2 + $0x230] sm:$0xff] %vm15_vm0, %v4289_v0 }
  0x31   :  { %89 = vst.msk [vmem:[#allocation2 + $0x240] sm:$0xff] %vm15_vm0, %v4289_v0 }
  0x32   :  { %90 = vst.msk [vmem:[#allocation2 + $0x248] sm:$0xff] %vm15_vm0, %v4289_v0 }
  0x33   :  { %92 = vst.msk [vmem:[#allocation2 + $0x258] sm:$0xff] %vm15_vm0, %v4289_v0 }
  0x34   :  { %93 = vst.msk [vmem:[#allocation2 + $0x260] sm:$0xff] %vm15_vm0, %v4289_v0 }
  0x35   :  { %95 = vst.msk [vmem:[#allocation2 + $0x270] sm:$0xff] %vm15_vm0, %v4289_v0 }
  0x36   :  { %96 = vst.msk [vmem:[#allocation2 + $0x278] sm:$0xff] %vm15_vm0, %v4289_v0 }
  0x37   :  { %98 = vst.msk [vmem:[#allocation2 + $0x288] sm:$0xff] %vm15_vm0, %v4289_v0 }
  0x38   :  { %99 = vst.msk [vmem:[#allocation2 + $0x290] sm:$0xff] %vm15_vm0, %v4289_v0 }
  0x39   :  { %101 = vst.msk [vmem:[#allocation2 + $0x2a0] sm:$0xff] %vm15_vm0, %v4289_v0 }
  0x3a   :  { %102 = vst.msk [vmem:[#allocation2 + $0x2a8] sm:$0xff] %vm15_vm0, %v4289_v0 }
  0x3b   :  { %104 = vst.msk [vmem:[#allocation2 + $0x2b8] sm:$0xff] %vm15_vm0, %v4289_v0 }
  0x3c   :  { %105 = vst.msk [vmem:[#allocation2 + $0x2c0] sm:$0xff] %vm15_vm0, %v4289_v0 }
  0x3d   :  { %107 = vst.msk [vmem:[#allocation2 + $0x2d0] sm:$0xff] %vm15_vm0, %v4289_v0 }
  0x3e   :  { %108 = vst.msk [vmem:[#allocation2 + $0x2d8] sm:$0xff] %vm15_vm0, %v4289_v0 }
  0x3f   :  { %110 = vst.msk [vmem:[#allocation2 + $0x2e8] sm:$0xff] %vm15_vm0, %v4289_v0 }
  0x40   :  { %111 = vst.msk [vmem:[#allocation2 + $0x2f0] sm:$0xff] %vm15_vm0, %v4289_v0 }
  0x41   :  { %113 = vst.msk [vmem:[#allocation2 + $0x300] sm:$0xff] %vm15_vm0, %v4289_v0 }
  0x42   :  { %114 = vst.msk [vmem:[#allocation2 + $0x308] sm:$0xff] %vm15_vm0, %v4289_v0 }
  0x43   :  { %116 = vst.msk [vmem:[#allocation2 + $0x318] sm:$0xff] %vm15_vm0, %v4289_v0 }
  0x44   :  { %117 = vst.msk [vmem:[#allocation2 + $0x320] sm:$0xff] %vm15_vm0, %v4289_v0 }
  0x45   :  { %119 = vst.msk [vmem:[#allocation2 + $0x330] sm:$0xff] %vm15_vm0, %v4289_v0 }
  0x46   :  { %120 = vst.msk [vmem:[#allocation2 + $0x338] sm:$0xff] %vm15_vm0, %v4289_v0 }
  0x47   :  { %122 = vst.msk [vmem:[#allocation2 + $0x348] sm:$0xff] %vm15_vm0, %v4289_v0 }
  0x48   :  { %123 = vst.msk [vmem:[#allocation2 + $0x350] sm:$0xff] %vm15_vm0, %v4289_v0 }
  0x49   :  { %190 = vst.msk [vmem:[#allocation2 + $0x19] sm:$0xff] %vm15_vm0, %v125_v2  ;;  %v165_v2 = vld [vmem:[%s6418_s0 + $0x140] sm:$0xff] }
  0x4a   :  { %19 = vst.msk [vmem:[#allocation2 + $0x10] sm:$0x3] %vm18_vm1, %v4289_v0 }
  0x4b   :  { %22 = vst.msk [vmem:[#allocation2 + $0x28] sm:$0x3] %vm18_vm1, %v4289_v0 }
  0x4c   :  { %25 = vst.msk [vmem:[#allocation2 + $0x40] sm:$0x3] %vm18_vm1, %v4289_v0 }
  0x4d   :  { %28 = vst.msk [vmem:[#allocation2 + $0x58] sm:$0x3] %vm18_vm1, %v4289_v0 }
  0x4e   :  { %31 = vst.msk [vmem:[#allocation2 + $0x70] sm:$0x3] %vm18_vm1, %v4289_v0 }
  0x4f   :  { %34 = vst.msk [vmem:[#allocation2 + $0x88] sm:$0x3] %vm18_vm1, %v4289_v0 }
  0x50   :  { %v384_v3 = vld [vmem:[#allocation2 + $0x19] sm:$0xff]  ;;  %37 = vst.msk [vmem:[#allocation2 + $0xa0] sm:$0x3] %vm18_vm1, %v4289_v0 }
  0x51   :  { %514 = vrot.lane.b32.xlu1 %v384_v3, %s4290_s12  ;;  %v383_v4 = vld [vmem:[#allocation2 + $0x9] sm:$0xff]  ;;  %40 = vst.msk [vmem:[#allocation2 + $0xb8] sm:$0x3] %vm18_vm1, %v4289_v0 }
  0x52   :  { %512 = vrot.lane.b32.xlu0 %v383_v4, %s4290_s12  ;;  %43 = vst.msk [vmem:[#allocation2 + $0xd0] sm:$0x3] %vm18_vm1, %v4289_v0  ;;  %v161_v4 = vld [vmem:[%s6418_s0 + $0x120] sm:$0xff] }
  0x53   :  { %46 = vst.msk [vmem:[#allocation2 + $0xe8] sm:$0x3] %vm18_vm1, %v4289_v0 }
  0x54   :  { %49 = vst.msk [vmem:[#allocation2 + $0x100] sm:$0x3] %vm18_vm1, %v4289_v0 }
  0x55   :  { %52 = vst.msk [vmem:[#allocation2 + $0x118] sm:$0x3] %vm18_vm1, %v4289_v0 }
  0x56   :  { %55 = vst.msk [vmem:[#allocation2 + $0x130] sm:$0x3] %vm18_vm1, %v4289_v0 }
  0x57   :  { %58 = vst.msk [vmem:[#allocation2 + $0x148] sm:$0x3] %vm18_vm1, %v4289_v0 }
  0x58   :  { %61 = vst.msk [vmem:[#allocation2 + $0x160] sm:$0x3] %vm18_vm1, %v4289_v0 }
  0x59   :  { %64 = vst.msk [vmem:[#allocation2 + $0x178] sm:$0x3] %vm18_vm1, %v4289_v0 }
  0x5a   :  { %67 = vst.msk [vmem:[#allocation2 + $0x190] sm:$0x3] %vm18_vm1, %v4289_v0 }
  0x5b   :  { %70 = vst.msk [vmem:[#allocation2 + $0x1a8] sm:$0x3] %vm18_vm1, %v4289_v0 }
  0x5c   :  { %73 = vst.msk [vmem:[#allocation2 + $0x1c0] sm:$0x3] %vm18_vm1, %v4289_v0 }
  0x5d   :  { %76 = vst.msk [vmem:[#allocation2 + $0x1d8] sm:$0x3] %vm18_vm1, %v4289_v0 }
  0x5e   :  { %79 = vst.msk [vmem:[#allocation2 + $0x1f0] sm:$0x3] %vm18_vm1, %v4289_v0 }
  0x5f   :  { %82 = vst.msk [vmem:[#allocation2 + $0x208] sm:$0x3] %vm18_vm1, %v4289_v0 }
  0x60   :  { %85 = vst.msk [vmem:[#allocation2 + $0x220] sm:$0x3] %vm18_vm1, %v4289_v0 }
  0x61   :  { %88 = vst.msk [vmem:[#allocation2 + $0x238] sm:$0x3] %vm18_vm1, %v4289_v0 }
  0x62   :  { %91 = vst.msk [vmem:[#allocation2 + $0x250] sm:$0x3] %vm18_vm1, %v4289_v0 }
  0x63   :  { %94 = vst.msk [vmem:[#allocation2 + $0x268] sm:$0x3] %vm18_vm1, %v4289_v0 }
  0x64   :  { %97 = vst.msk [vmem:[#allocation2 + $0x280] sm:$0x3] %vm18_vm1, %v4289_v0 }
  0x65   :  { %100 = vst.msk [vmem:[#allocation2 + $0x298] sm:$0x3] %vm18_vm1, %v4289_v0 }
  0x66   :  { %103 = vst.msk [vmem:[#allocation2 + $0x2b0] sm:$0x3] %vm18_vm1, %v4289_v0 }
  0x67   :  { %106 = vst.msk [vmem:[#allocation2 + $0x2c8] sm:$0x3] %vm18_vm1, %v4289_v0 }
  0x68   :  { %109 = vst.msk [vmem:[#allocation2 + $0x2e0] sm:$0x3] %vm18_vm1, %v4289_v0 }
  0x69   :  { %112 = vst.msk [vmem:[#allocation2 + $0x2f8] sm:$0x3] %vm18_vm1, %v4289_v0 }
  0x6a   :  { %115 = vst.msk [vmem:[#allocation2 + $0x310] sm:$0x3] %vm18_vm1, %v4289_v0 }
  0x6b   :  { %118 = vst.msk [vmem:[#allocation2 + $0x328] sm:$0x3] %vm18_vm1, %v4289_v0 }
  0x6c   :  { %121 = vst.msk [vmem:[#allocation2 + $0x340] sm:$0x3] %vm18_vm1, %v4289_v0 }
  0x6d   :  { %124 = vst.msk [vmem:[#allocation2 + $0x358] sm:$0x3] %vm18_vm1, %v4289_v0 }
  0x6e   :  { %191 = vst.msk [vmem:[#allocation2 + $0x21] sm:$0xff] %vm15_vm0, %v126_v5  ;;  %v166_v5 = vld [vmem:[%s6418_s0 + $0x148] sm:$0xff] }
  0x6f   :  { %194 = vst.msk [vmem:[#allocation2 + $0x49] sm:$0xff] %vm15_vm0, %v129_v6 }
  0x70   :  { %192 = vst.msk [vmem:[#allocation2 + $0x31] sm:$0xff] %vm15_vm0, %v127_v7 }
  0x71   :  { %195 = vst.msk [vmem:[#allocation2 + $0x51] sm:$0xff] %vm15_vm0, %v130_v8  ;;  %v415_v8 = vld [vmem:[#allocation2 + $0x1b9] sm:$0xff] }
  0x72   :  { %197 = vst.msk [vmem:[#allocation2 + $0x69] sm:$0xff] %vm15_vm0, %v132_v9  ;;  %v168_v9 = vld [vmem:[%s6418_s0 + $0x158] sm:$0xff] }
  0x73   :  { %193 = vst.msk [vmem:[#allocation2 + $0x39] sm:$0xff] %vm15_vm0, %v128_v10 }
  0x74   :  { %198 = vst.msk [vmem:[#allocation2 + $0x79] sm:$0xff] %vm15_vm0, %v133_v11  ;;  %v164_v11 = vld [vmem:[%s6418_s0 + $0x138] sm:$0xff] }
  0x75   :  { %v385_v15 = vld [vmem:[#allocation2 + $0x21] sm:$0xff]  ;;  %200 = vst.msk [vmem:[#allocation2 + $0x91] sm:$0xff] %vm15_vm0, %v135_v12 }
  0x76   :  { %516 = vrot.lane.b32.xlu1 %v385_v15, %s4290_s12  ;;  %v388_v17 = vld [vmem:[#allocation2 + $0x49] sm:$0xff]  ;;  %196 = vst.msk [vmem:[#allocation2 + $0x61] sm:$0xff] %vm15_vm0, %v131_v13  ;;  %v254_v13 = vld [vmem:[#allocation2] sm:$0xff]  ;;  %v256_v15 = vld [vmem:[#allocation2 + $0x18] sm:$0xff] }
  0x77   :  { %522 = vrot.lane.b32.xlu0 %v388_v17, %s4290_s12  ;;  %v386_v19 = vld [vmem:[#allocation2 + $0x31] sm:$0xff]  ;;  %201 = vst.msk [vmem:[#allocation2 + $0x99] sm:$0xff] %vm15_vm0, %v136_v14 }
  0x78   :  { %518 = vrot.lane.b32.xlu2 %v386_v19, %s4290_s12  ;;  %203 = vst.msk [vmem:[#allocation2 + $0xb1] sm:$0xff] %vm15_vm0, %v138_v16  ;;  %v389_v24 = vld [vmem:[#allocation2 + $0x51] sm:$0xff]  ;;  %v169_v16 = vld [vmem:[%s6418_s0 + $0x160] sm:$0xff] }
  0x79   :  { %199 = vst.msk [vmem:[#allocation2 + $0x81] sm:$0xff] %vm15_vm0, %v134_v18  ;;  %v391_v25 = vld [vmem:[#allocation2 + $0x69] sm:$0xff] }
  0x7a   :  { %204 = vst.msk [vmem:[#allocation2 + $0xc1] sm:$0xff] %vm15_vm0, %v139_v20  ;;  %v387_v27 = vld [vmem:[#allocation2 + $0x39] sm:$0xff]  ;;  %v258_v6 = vld [vmem:[#allocation2 + $0x30] sm:$0xff] }
  0x7b   :  { %206 = vst.msk [vmem:[#allocation2 + $0xd9] sm:$0xff] %vm15_vm0, %v141_v21  ;;  %v392_v30 = vld [vmem:[#allocation2 + $0x79] sm:$0xff]  ;;  %v171_v20 = vld [vmem:[%s6418_s0 + $0x170] sm:$0xff] }
  0x7c   :  { %202 = vst.msk [vmem:[#allocation2 + $0xa9] sm:$0xff] %vm15_vm0, %v137_v22  ;;  %v394_v31 = vld [vmem:[#allocation2 + $0x91] sm:$0xff]  ;;  %v511_v12 = vpop.permute.xlu0 %510 }
  0x7d   :  { %207 = vst.msk [vmem:[#allocation2 + $0xe1] sm:$0xff] %vm15_vm0, %v142_v23  ;;  %v390_v33 = vld [vmem:[#allocation2 + $0x61] sm:$0xff]  ;;  %v259_v14 = vld [vmem:[#allocation2 + $0x38] sm:$0xff]  ;;  %v167_v22 = vld [vmem:[%s6418_s0 + $0x150] sm:$0xff] }
  0x7e   :  { %524 = vrot.lane.b32.xlu1 %v389_v24, %s4290_s12  ;;  %209 = vst.msk [vmem:[#allocation2 + $0xf9] sm:$0xff] %vm15_vm0, %v144_v26  ;;  %v395_v36 = vld [vmem:[#allocation2 + $0x99] sm:$0xff]  ;;  %v414_v21 = vld [vmem:[#allocation2 + $0x1b1] sm:$0xff]  ;;  %v255_v23 = vld [vmem:[#allocation2 + $0x8] sm:$0xff] }
  0x7f   :  { %528 = vrot.lane.b32.xlu0 %v391_v25, %s4290_s12  ;;  %205 = vst.msk [vmem:[#allocation2 + $0xc9] sm:$0xff] %vm15_vm0, %v140_v28  ;;  %v397_v37 = vld [vmem:[#allocation2 + $0xb1] sm:$0xff]  ;;  %v262_v25 = vld [vmem:[#allocation2 + $0x60] sm:$0xff] }
  0x80   :  { %520 = vrot.lane.b32.xlu2 %v387_v27, %s4290_s12  ;;  %210 = vst.msk [vmem:[#allocation2 + $0x109] sm:$0xff] %vm15_vm0, %v145_v29  ;;  %v393_v39 = vld [vmem:[#allocation2 + $0x81] sm:$0xff]  ;;  %v172_v27 = vld [vmem:[%s6418_s0 + $0x178] sm:$0xff] }
  0x81   :  { %212 = vst.msk [vmem:[#allocation2 + $0x121] sm:$0xff] %vm15_vm0, %v147_v32  ;;  %v398_v42 = vld [vmem:[#allocation2 + $0xc1] sm:$0xff] }
  0x82   :  { %208 = vst.msk [vmem:[#allocation2 + $0xf1] sm:$0xff] %vm15_vm0, %v143_v34  ;;  %v400_v43 = vld [vmem:[#allocation2 + $0xd9] sm:$0xff]  ;;  %v170_v32 = vld [vmem:[%s6418_s0 + $0x168] sm:$0xff] }
  0x83   :  { %213 = vst.msk [vmem:[#allocation2 + $0x129] sm:$0xff] %vm15_vm0, %v148_v35  ;;  %v396_v45 = vld [vmem:[#allocation2 + $0xa9] sm:$0xff]  ;;  %v4753_v26 = vld [vmem:[#allocation2 + $0x20] sm:$0xff] }
  0x84   :  { %215 = vst.msk [vmem:[#allocation2 + $0x141] sm:$0xff] %vm15_vm0, %v150_v38  ;;  %v401_v48 = vld [vmem:[#allocation2 + $0xe1] sm:$0xff]  ;;  %v4776_v35 = vld [vmem:[#allocation2 + $0x50] sm:$0xff] }
  0x85   :  { %211 = vst.msk [vmem:[#allocation2 + $0x111] sm:$0xff] %vm15_vm0, %v146_v40  ;;  %v403_v49 = vld [vmem:[#allocation2 + $0xf9] sm:$0xff] }
  0x86   :  { %530 = vrot.lane.b32.xlu1 %v392_v30, %s4290_s12  ;;  %216 = vst.msk [vmem:[#allocation2 + $0x151] sm:$0xff] %vm15_vm0, %v151_v41  ;;  %v399_v50 = vld [vmem:[#allocation2 + $0xc9] sm:$0xff]  ;;  %v4774_v34 = vld [vmem:[#allocation2 + $0x80] sm:$0xff] }
  0x87   :  { %534 = vrot.lane.b32.xlu0 %v394_v31, %s4290_s12  ;;  %218 = vst.msk [vmem:[#allocation2 + $0x169] sm:$0xff] %vm15_vm0, %v153_v44  ;;  %v404_v53 = vld [vmem:[#allocation2 + $0x109] sm:$0xff]  ;;  %v177_v40 = vld [vmem:[%s6418_s0 + $0x1a0] sm:$0xff] }
  0x88   :  { %526 = vrot.lane.b32.xlu2 %v390_v33, %s4290_s12  ;;  %214 = vst.msk [vmem:[#allocation2 + $0x139] sm:$0xff] %vm15_vm0, %v149_v46  ;;  %v406_v54 = vld [vmem:[#allocation2 + $0x121] sm:$0xff] }
  0x89   :  { %219 = vst.msk [vmem:[#allocation2 + $0x171] sm:$0xff] %vm15_vm0, %v154_v47  ;;  %v402_v56 = vld [vmem:[#allocation2 + $0xf1] sm:$0xff]  ;;  %v174_v30 = vld [vmem:[%s6418_s0 + $0x188] sm:$0xff] }
  0x8a   :  { %217 = vst.msk [vmem:[#allocation2 + $0x159] sm:$0xff] %vm15_vm0, %v152_v51  ;;  %v407_v58 = vld [vmem:[#allocation2 + $0x129] sm:$0xff] }
  0x8b   :  { %222 = vst.msk [vmem:[#allocation2 + $0x1c9] sm:$0xff] %vm15_vm0, %v157_v52  ;;  %v409_v59 = vld [vmem:[#allocation2 + $0x141] sm:$0xff]  ;;  %v176_v52 = vld [vmem:[%s6418_s0 + $0x198] sm:$0xff] }
  0x8c   :  { %224 = vst.msk [vmem:[#allocation2 + $0x1e1] sm:$0xff] %vm15_vm0, %v159_v55  ;;  %v405_v61 = vld [vmem:[#allocation2 + $0x111] sm:$0xff]  ;;  %v4772_v33 = vld [vmem:[#allocation2 + $0x48] sm:$0xff] }
  0x8d   :  { %225 = vst.msk [vmem:[#allocation2 + $0x1e9] sm:$0xff] %vm15_vm0, %v160_v57  ;;  %v410_v0 = vld [vmem:[#allocation2 + $0x151] sm:$0xff]  ;;  %v4802_v44 = vld [vmem:[#allocation2 + $0xa8] sm:$0xff] }
  0x8e   :  { %536 = vrot.lane.b32.xlu1 %v395_v36, %s4290_s12  ;;  %227 = vst.msk [vmem:[#allocation2 + $0x201] sm:$0xff] %vm15_vm0, %v162_v60  ;;  %v412_v1 = vld [vmem:[#allocation2 + $0x169] sm:$0xff]  ;;  %v4832_v55 = vld [vmem:[#allocation2 + $0x98] sm:$0xff] }
  0x8f   :  { %540 = vrot.lane.b32.xlu0 %v397_v37, %s4290_s12  ;;  %223 = vst.msk [vmem:[#allocation2 + $0x1d1] sm:$0xff] %vm15_vm0, %v158_v62  ;;  %v408_v3 = vld [vmem:[#allocation2 + $0x139] sm:$0xff]  ;;  %v175_v36 = vld [vmem:[%s6418_s0 + $0x190] sm:$0xff]  ;;  %v178_v46 = vld [vmem:[%s6418_s0 + $0x1a8] sm:$0xff] }
  0x90   :  { %532 = vrot.lane.b32.xlu2 %v393_v39, %s4290_s12  ;;  %228 = vst.msk [vmem:[#allocation2 + $0x211] sm:$0xff] %vm15_vm0, %v163_v63  ;;  %v413_v7 = vld [vmem:[#allocation2 + $0x171] sm:$0xff] }
  0x91   :  { %230 = vst.msk [vmem:[#allocation2 + $0x229] sm:$0xff] %vm15_vm0, %v165_v2  ;;  %v411_v10 = vld [vmem:[#allocation2 + $0x159] sm:$0xff]  ;;  %v183_v60 = vld [vmem:[%s6418_s0 + $0x1d0] sm:$0xff] }
  0x92   :  { %226 = vst.msk [vmem:[#allocation2 + $0x1f9] sm:$0xff] %vm15_vm0, %v161_v4  ;;  %v416_v17 = vld [vmem:[#allocation2 + $0x1c9] sm:$0xff] }
  0x93   :  { %322 = vst.msk [vmem:[#allocation3 + $0x20] sm:$0xff] %vm15_vm0, %v258_v6  ;;  %v418_v19 = vld [vmem:[#allocation2 + $0x1e1] sm:$0xff]  ;;  %v179_v62 = vld [vmem:[%s6418_s0 + $0x1b0] sm:$0xff] }
  0x94   :  { %231 = vst.msk [vmem:[#allocation2 + $0x231] sm:$0xff] %vm15_vm0, %v166_v5  ;;  %v419_v28 = vld [vmem:[#allocation2 + $0x1e9] sm:$0xff]  ;;  %v184_v5 = vld [vmem:[%s6418_s0 + $0x1d8] sm:$0xff] }
  0x95   :  { %233 = vst.msk [vmem:[#allocation2 + $0x249] sm:$0xff] %vm15_vm0, %v168_v9  ;;  %v421_v29 = vld [vmem:[#allocation2 + $0x201] sm:$0xff]  ;;  %v4856_v63 = vld [vmem:[#allocation2 + $0xb0] sm:$0xff] }
  0x96   :  { %542 = vrot.lane.b32.xlu1 %v398_v42, %s4290_s12  ;;  %229 = vst.msk [vmem:[#allocation2 + $0x219] sm:$0xff] %vm15_vm0, %v164_v11  ;;  %v417_v31 = vld [vmem:[#allocation2 + $0x1d1] sm:$0xff]  ;;  %v173_v42 = vld [vmem:[%s6418_s0 + $0x180] sm:$0xff] }
  0x97   :  { %546 = vrot.lane.b32.xlu0 %v400_v43, %s4290_s12  ;;  %318 = vst.msk [vmem:[#allocation3] sm:$0xff] %vm15_vm0, %v254_v13  ;;  %v422_v38 = vld [vmem:[#allocation2 + $0x211] sm:$0xff]  ;;  %v4800_v43 = vld [vmem:[#allocation2 + $0x68] sm:$0xff] }
  0x98   :  { %538 = vrot.lane.b32.xlu2 %v396_v45, %s4290_s12  ;;  %703 = vst.msk [vmem:[#allocation3] sm:$0xff] %vm702_vm2, %v511_v12  ;;  %v424_v39 = vld [vmem:[#allocation2 + $0x229] sm:$0xff]  ;;  %v4804_v45 = vld [vmem:[#allocation2 + $0x78] sm:$0xff] }
  0x99   :  { %323 = vst.msk [vmem:[#allocation3 + $0x28] sm:$0xff] %vm15_vm0, %v259_v14  ;;  %v420_v41 = vld [vmem:[#allocation2 + $0x1f9] sm:$0xff]  ;;  %v4884_v11 = vld [vmem:[#allocation2 + $0x110] sm:$0xff] }
  0x9a   :  { %320 = vst.msk [vmem:[#allocation3 + $0x10] sm:$0xff] %vm15_vm0, %v256_v15  ;;  %v4894_v14 = vld [vmem:[#allocation2 + $0xe0] sm:$0xff] }
  0x9b   :  { %234 = vst.msk [vmem:[#allocation2 + $0x259] sm:$0xff] %vm15_vm0, %v169_v16  ;;  %v182_v16 = vld [vmem:[%s6418_s0 + $0x1c8] sm:$0xff] }
  0x9c   :  { %236 = vst.msk [vmem:[#allocation2 + $0x271] sm:$0xff] %vm15_vm0, %v171_v20  ;;  %v185_v20 = vld [vmem:[%s6418_s0 + $0x1e0] sm:$0xff] }
  0x9d   :  { %232 = vst.msk [vmem:[#allocation2 + $0x241] sm:$0xff] %vm15_vm0, %v167_v22  ;;  %v423_v51 = vld [vmem:[#allocation2 + $0x219] sm:$0xff] }
  0x9e   :  { %548 = vrot.lane.b32.xlu1 %v401_v48, %s4290_s12  ;;  %319 = vst.msk [vmem:[#allocation3 + $0x8] sm:$0xff] %vm15_vm0, %v255_v23  ;;  %v425_v48 = vld [vmem:[#allocation2 + $0x231] sm:$0xff] }
  0x9f   :  { %552 = vrot.lane.b32.xlu0 %v403_v49, %s4290_s12  ;;  %326 = vst.msk [vmem:[#allocation3 + $0x40] sm:$0xff] %vm15_vm0, %v262_v25  ;;  %v427_v49 = vld [vmem:[#allocation2 + $0x249] sm:$0xff]  ;;  %v4910_v22 = vld [vmem:[#allocation2 + $0x138] sm:$0xff] }
  0xa0   :  { %544 = vrot.lane.b32.xlu2 %v399_v50, %s4290_s12  ;;  %321 = vst.msk [vmem:[#allocation3 + $0x18] sm:$0xff] %vm15_vm0, %v4753_v26  ;;  %v180_v50 = vld [vmem:[%s6418_s0 + $0x1b8] sm:$0xff]  ;;  %v4920_v25 = vld [vmem:[#allocation2 + $0x108] sm:$0xff] }
  0xa1   :  { %237 = vst.msk [vmem:[#allocation2 + $0x279] sm:$0xff] %vm15_vm0, %v172_v27 }
  0xa2   :  { %239 = vst.msk [vmem:[#allocation2 + $0x291] sm:$0xff] %vm15_vm0, %v174_v30 }
  0xa3   :  { %235 = vst.msk [vmem:[#allocation2 + $0x261] sm:$0xff] %vm15_vm0, %v170_v32  ;;  %v4929_v32 = vld [vmem:[#allocation2 + $0x158] sm:$0xff] }
  0xa4   :  { %324 = vst.msk [vmem:[#allocation3 + $0x30] sm:$0xff] %vm15_vm0, %v4772_v33 }
  0xa5   :  { %329 = vst.msk [vmem:[#allocation3 + $0x58] sm:$0xff] %vm15_vm0, %v4774_v34 }
  0xa6   :  { %554 = vrot.lane.b32.xlu1 %v404_v53, %s4290_s12  ;;  %325 = vst.msk [vmem:[#allocation3 + $0x38] sm:$0xff] %vm15_vm0, %v4776_v35  ;;  %v4828_v53 = vld [vmem:[#allocation2 + $0x90] sm:$0xff] }
  0xa7   :  { %558 = vrot.lane.b32.xlu0 %v406_v54, %s4290_s12  ;;  %240 = vst.msk [vmem:[#allocation2 + $0x2a1] sm:$0xff] %vm15_vm0, %v175_v36  ;;  %v4830_v54 = vld [vmem:[#allocation2 + $0xc8] sm:$0xff] }
  0xa8   :  { %550 = vrot.lane.b32.xlu2 %v402_v56, %s4290_s12  ;;  %242 = vst.msk [vmem:[#allocation2 + $0x2b9] sm:$0xff] %vm15_vm0, %v177_v40  ;;  %v181_v56 = vld [vmem:[%s6418_s0 + $0x1c0] sm:$0xff] }
  0xa9   :  { %238 = vst.msk [vmem:[#allocation2 + $0x289] sm:$0xff] %vm15_vm0, %v173_v42  ;;  %v431_v6 = vld [vmem:[#allocation2 + $0x279] sm:$0xff] }
  0xaa   :  { %327 = vst.msk [vmem:[#allocation3 + $0x48] sm:$0xff] %vm15_vm0, %v4800_v43  ;;  %v429_v9 = vld [vmem:[#allocation2 + $0x261] sm:$0xff] }
  0xab   :  { %332 = vst.msk [vmem:[#allocation3 + $0x70] sm:$0xff] %vm15_vm0, %v4802_v44 }
  0xac   :  { %328 = vst.msk [vmem:[#allocation3 + $0x50] sm:$0xff] %vm15_vm0, %v4804_v45 }
  0xad   :  { %243 = vst.msk [vmem:[#allocation2 + $0x2c1] sm:$0xff] %vm15_vm0, %v178_v46  ;;  %v4945_v46 = vld [vmem:[#allocation2 + $0x140] sm:$0xff] }
  0xae   :  { %560 = vrot.lane.b32.xlu1 %v407_v58, %s4290_s12  ;;  %245 = vst.msk [vmem:[#allocation2 + $0x2d9] sm:$0xff] %vm15_vm0, %v180_v50  ;;  %v428_v58 = vld [vmem:[#allocation2 + $0x259] sm:$0xff]  ;;  %v4953_v50 = vld [vmem:[#allocation2 + $0x150] sm:$0xff] }
  0xaf   :  { %564 = vrot.lane.b32.xlu0 %v409_v59, %s4290_s12  ;;  %241 = vst.msk [vmem:[#allocation2 + $0x2a9] sm:$0xff] %vm15_vm0, %v176_v52  ;;  %v430_v59 = vld [vmem:[#allocation2 + $0x271] sm:$0xff] }
  0xb0   :  { %556 = vrot.lane.b32.xlu2 %v405_v61, %s4290_s12  ;;  %330 = vst.msk [vmem:[#allocation3 + $0x60] sm:$0xff] %vm15_vm0, %v4828_v53  ;;  %v426_v61 = vld [vmem:[#allocation2 + $0x241] sm:$0xff] }
  0xb1   :  { %335 = vst.msk [vmem:[#allocation3 + $0x88] sm:$0xff] %vm15_vm0, %v4830_v54 }
  0xb2   :  { %331 = vst.msk [vmem:[#allocation3 + $0x68] sm:$0xff] %vm15_vm0, %v4832_v55 }
  0xb3   :  { %246 = vst.msk [vmem:[#allocation2 + $0x2e9] sm:$0xff] %vm15_vm0, %v181_v56 }
  0xb4   :  { %248 = vst.msk [vmem:[#allocation2 + $0x301] sm:$0xff] %vm15_vm0, %v183_v60 }
  0xb5   :  { %244 = vst.msk [vmem:[#allocation2 + $0x2d1] sm:$0xff] %vm15_vm0, %v179_v62  ;;  %v4971_v62 = vld [vmem:[#allocation2 + $0x170] sm:$0xff] }
  0xb6   :  { %566 = vrot.lane.b32.xlu1 %v410_v0, %s4290_s12  ;;  %v4858_v0 = vld [vmem:[#allocation2 + $0xf0] sm:$0xff]  ;;  %333 = vst.msk [vmem:[#allocation3 + $0x78] sm:$0xff] %vm15_vm0, %v4856_v63 }
  0xb7   :  { %570 = vrot.lane.b32.xlu0 %v412_v1, %s4290_s12  ;;  %338 = vst.msk [vmem:[#allocation3 + $0xa0] sm:$0xff] %vm15_vm0, %v4858_v0  ;;  %v435_v30 = vld [vmem:[#allocation2 + $0x2a9] sm:$0xff] }
  0xb8   :  { %562 = vrot.lane.b32.xlu2 %v408_v3, %s4290_s12  ;;  %v4868_v3 = vld [vmem:[#allocation2 + $0xc0] sm:$0xff]  ;;  %249 = vst.msk [vmem:[#allocation2 + $0x309] sm:$0xff] %vm15_vm0, %v184_v5 }
  0xb9   :  { %334 = vst.msk [vmem:[#allocation3 + $0x80] sm:$0xff] %vm15_vm0, %v4868_v3 }
  0xba   :  { %341 = vst.msk [vmem:[#allocation3 + $0xb8] sm:$0xff] %vm15_vm0, %v4884_v11  ;;  %v440_v40 = vld [vmem:[#allocation2 + $0x2e9] sm:$0xff] }
  0xbb   :  { %337 = vst.msk [vmem:[#allocation3 + $0x98] sm:$0xff] %vm15_vm0, %v4894_v14 }
  0xbc   :  { %247 = vst.msk [vmem:[#allocation2 + $0x2f1] sm:$0xff] %vm15_vm0, %v182_v16  ;;  %v438_v42 = vld [vmem:[#allocation2 + $0x2d1] sm:$0xff]  ;;  %v772_v16 = vld [vmem:[#allocation2 + $0x3a] sm:$0xff] }
  0xbd   :  { %250 = vst.msk [vmem:[#allocation2 + $0x319] sm:$0xff] %vm15_vm0, %v185_v20 }
  0xbe   :  { %572 = vrot.lane.b32.xlu1 %v413_v7, %s4290_s12  ;;  %v433_v7 = vld [vmem:[#allocation2 + $0x291] sm:$0xff]  ;;  %344 = vst.msk [vmem:[#allocation3 + $0xd0] sm:$0xff] %vm15_vm0, %v4910_v22 }
  0xbf   :  { %576 = vrot.lane.b32.xlu0 %v415_v8, %s4290_s12  ;;  %v186_v8 = vld [vmem:[%s6418_s0 + $0x1e8] sm:$0xff]  ;;  %340 = vst.msk [vmem:[#allocation3 + $0xb0] sm:$0xff] %vm15_vm0, %v4920_v25 }
  0xc0   :  { %568 = vrot.lane.b32.xlu2 %v411_v10, %s4290_s12  ;;  %v4882_v10 = vld [vmem:[#allocation2 + $0xd8] sm:$0xff]  ;;  %251 = vst.msk [vmem:[#allocation2 + $0x321] sm:$0xff] %vm15_vm0, %v186_v8  ;;  %v443_v52 = vld [vmem:[#allocation2 + $0x309] sm:$0xff] }
  0xc1   :  { %336 = vst.msk [vmem:[#allocation3 + $0x90] sm:$0xff] %vm15_vm0, %v4882_v10 }
  0xc2   :  { %347 = vst.msk [vmem:[#allocation3 + $0xe8] sm:$0xff] %vm15_vm0, %v4929_v32 }
  0xc3   :  { %v515_v18 = vpop.permute.xlu1 %514  ;;  %345 = vst.msk [vmem:[#allocation3 + $0xd8] sm:$0xff] %vm15_vm0, %v4945_v46 }
  0xc4   :  { %705 = vst.msk [vmem:[#allocation3 + $0x10] sm:$0xff] %vm702_vm2, %v515_v18  ;;  %v513_v24 = vpop.permute.xlu0 %512  ;;  %v436_v18 = vld [vmem:[#allocation2 + $0x2b9] sm:$0xff] }
  0xc5   :  { %704 = vst.msk [vmem:[#allocation3 + $0x8] sm:$0xff] %vm702_vm2, %v513_v24  ;;  %v444_v5 = vld [vmem:[#allocation2 + $0x319] sm:$0xff] }
  0xc6   :  { %578 = vrot.lane.b32.xlu1 %v416_v17, %s4290_s12  ;;  %v434_v17 = vld [vmem:[#allocation2 + $0x2a1] sm:$0xff]  ;;  %346 = vst.msk [vmem:[#allocation3 + $0xe0] sm:$0xff] %vm15_vm0, %v4953_v50 }
  0xc7   :  { %582 = vrot.lane.b32.xlu0 %v418_v19, %s4290_s12  ;;  %v432_v19 = vld [vmem:[#allocation2 + $0x289] sm:$0xff]  ;;  %v445_v56 = vld [vmem:[#allocation2 + $0x321] sm:$0xff]  ;;  %349 = vst.msk [vmem:[#allocation3 + $0xf8] sm:$0xff] %vm15_vm0, %v4971_v62 }
  0xc8   :  { %574 = vrot.lane.b32.xlu2 %v414_v21, %s4290_s12  ;;  %v4908_v21 = vld [vmem:[#allocation2 + $0xf8] sm:$0xff] }
  0xc9   :  { %339 = vst.msk [vmem:[#allocation3 + $0xa8] sm:$0xff] %vm15_vm0, %v4908_v21 }
  0xce   :  { %584 = vrot.lane.b32.xlu1 %v419_v28, %s4290_s12  ;;  %v437_v28 = vld [vmem:[#allocation2 + $0x2c1] sm:$0xff] }
  0xcf   :  { %588 = vrot.lane.b32.xlu0 %v421_v29, %s4290_s12  ;;  %v439_v29 = vld [vmem:[#allocation2 + $0x2d9] sm:$0xff] }
  0xd0   :  { %580 = vrot.lane.b32.xlu2 %v417_v31, %s4290_s12  ;;  %v4927_v31 = vld [vmem:[#allocation2 + $0x120] sm:$0xff] }
  0xd1   :  { %342 = vst.msk [vmem:[#allocation3 + $0xc0] sm:$0xff] %vm15_vm0, %v4927_v31 }
  0xd2   :  { %v519_v37 = vpop.permute.xlu2 %518 }
  0xd3   :  { %707 = vst.msk [vmem:[#allocation3 + $0x20] sm:$0xff] %vm702_vm2, %v519_v37 }
  0xd6   :  { %590 = vrot.lane.b32.xlu1 %v422_v38, %s4290_s12  ;;  %v4938_v38 = vld [vmem:[#allocation2 + $0x128] sm:$0xff] }
  0xd7   :  { %594 = vrot.lane.b32.xlu0 %v424_v39, %s4290_s12  ;;  %343 = vst.msk [vmem:[#allocation3 + $0xc8] sm:$0xff] %vm15_vm0, %v4938_v38 }
  0xd8   :  { %586 = vrot.lane.b32.xlu2 %v420_v41, %s4290_s12  ;;  %v442_v41 = vld [vmem:[#allocation2 + $0x301] sm:$0xff] }
  0xda   :  { %v521_v47 = vpop.permute.xlu2 %520 }
  0xdb   :  { %708 = vst.msk [vmem:[#allocation3 + $0x28] sm:$0xff] %vm702_vm2, %v521_v47  ;;  %v286_v47 = vld [vmem:[#allocation2 + $0x1b0] sm:$0xff] }
  0xdc   :  { %350 = vst.msk [vmem:[#allocation3 + $0x100] sm:$0xff] %vm15_vm0, %v286_v47  ;;  %v776_v47 = vld [vmem:[#allocation2 + $0x6a] sm:$0xff] }
  0xde   :  { %596 = vrot.lane.b32.xlu1 %v425_v48, %s4290_s12 }
  0xdf   :  { %600 = vrot.lane.b32.xlu0 %v427_v49, %s4290_s12 }
  0xe0   :  { %592 = vrot.lane.b32.xlu2 %v423_v51, %s4290_s12 }
  0xe2   :  { %v527_v57 = vpop.permute.xlu2 %526 }
  0xe3   :  { %711 = vst.msk [vmem:[#allocation3 + $0x40] sm:$0xff] %vm702_vm2, %v527_v57  ;;  %v441_v57 = vld [vmem:[#allocation2 + $0x2f1] sm:$0xff] }
  0xe6   :  { %602 = vrot.lane.b32.xlu1 %v428_v58, %s4290_s12  ;;  %v4960_v58 = vld [vmem:[#allocation2 + $0x168] sm:$0xff] }
  0xe7   :  { %606 = vrot.lane.b32.xlu0 %v430_v59, %s4290_s12  ;;  %v4962_v59 = vld [vmem:[#allocation2 + $0x1d0] sm:$0xff]  ;;  %348 = vst.msk [vmem:[#allocation3 + $0xf0] sm:$0xff] %vm15_vm0, %v4960_v58 }
  0xe8   :  { %v517_v1 = vpop.permute.xlu1 %516  ;;  %598 = vrot.lane.b32.xlu2 %v426_v61, %s4290_s12  ;;  %353 = vst.msk [vmem:[#allocation3 + $0x118] sm:$0xff] %vm15_vm0, %v4962_v59 }
  0xe9   :  { %706 = vst.msk [vmem:[#allocation3 + $0x18] sm:$0xff] %vm702_vm2, %v517_v1  ;;  %v523_v2 = vpop.permute.xlu0 %522 }
  0xea   :  { %709 = vst.msk [vmem:[#allocation3 + $0x30] sm:$0xff] %vm702_vm2, %v523_v2  ;;  %v533_v4 = vpop.permute.xlu2 %532  ;;  %v767_v2 = vld [vmem:[#allocation2 + $0x2] sm:$0xff] }
  0xeb   :  { %714 = vst.msk [vmem:[#allocation3 + $0x58] sm:$0xff] %vm702_vm2, %v533_v4  ;;  %v769_v4 = vld [vmem:[#allocation2 + $0x1a] sm:$0xff] }
  0xee   :  { %608 = vrot.lane.b32.xlu1 %v431_v6, %s4290_s12  ;;  %v287_v6 = vld [vmem:[#allocation2 + $0x1b8] sm:$0xff] }
  0xef   :  { %612 = vrot.lane.b32.xlu0 %v433_v7, %s4290_s12  ;;  %v4978_v7 = vld [vmem:[#allocation2 + $0x1f8] sm:$0xff]  ;;  %351 = vst.msk [vmem:[#allocation3 + $0x108] sm:$0xff] %vm15_vm0, %v287_v6  ;;  %v5049_v6 = vld [vmem:[#allocation2 + $0x288] sm:$0xff] }
  0xf0   :  { %v525_v12 = vpop.permute.xlu1 %524  ;;  %604 = vrot.lane.b32.xlu2 %v429_v9, %s4290_s12  ;;  %356 = vst.msk [vmem:[#allocation3 + $0x130] sm:$0xff] %vm15_vm0, %v4978_v7 }
  0xf1   :  { %710 = vst.msk [vmem:[#allocation3 + $0x38] sm:$0xff] %vm702_vm2, %v525_v12  ;;  %v529_v13 = vpop.permute.xlu0 %528  ;;  %v4986_v12 = vld [vmem:[#allocation2 + $0x1c8] sm:$0xff] }
  0xf2   :  { %712 = vst.msk [vmem:[#allocation3 + $0x48] sm:$0xff] %vm702_vm2, %v529_v13  ;;  %v539_v15 = vpop.permute.xlu2 %538 }
  0xf3   :  { %717 = vst.msk [vmem:[#allocation3 + $0x70] sm:$0xff] %vm702_vm2, %v539_v15  ;;  %v770_v15 = vld [vmem:[#allocation2 + $0x22] sm:$0xff] }
  0xf4   :  { %352 = vst.msk [vmem:[#allocation3 + $0x110] sm:$0xff] %vm15_vm0, %v4986_v12 }
  0xf5   :  { %368 = vst.msk [vmem:[#allocation3 + $0x190] sm:$0xff] %vm15_vm0, %v5049_v6 }
  0xf6   :  { %614 = vrot.lane.b32.xlu1 %v434_v17, %s4290_s12  ;;  %v768_v17 = vld [vmem:[#allocation2 + $0xa] sm:$0xff] }
  0xf7   :  { %618 = vrot.lane.b32.xlu0 %v436_v18, %s4290_s12  ;;  %v4993_v18 = vld [vmem:[#allocation2 + $0x1e0] sm:$0xff] }
  0xf8   :  { %v531_v23 = vpop.permute.xlu1 %530  ;;  %610 = vrot.lane.b32.xlu2 %v432_v19, %s4290_s12  ;;  %v4995_v19 = vld [vmem:[#allocation2 + $0x218] sm:$0xff]  ;;  %354 = vst.msk [vmem:[#allocation3 + $0x120] sm:$0xff] %vm15_vm0, %v4993_v18 }
  0xf9   :  { %713 = vst.msk [vmem:[#allocation3 + $0x50] sm:$0xff] %vm702_vm2, %v531_v23  ;;  %v535_v24 = vpop.permute.xlu0 %534 }
  0xfa   :  { %715 = vst.msk [vmem:[#allocation3 + $0x60] sm:$0xff] %vm702_vm2, %v535_v24  ;;  %v545_v27 = vpop.permute.xlu2 %544  ;;  %v5004_v24 = vld [vmem:[#allocation2 + $0x1e8] sm:$0xff] }
  0xfb   :  { %720 = vst.msk [vmem:[#allocation3 + $0x88] sm:$0xff] %vm702_vm2, %v545_v27 }
  0xfc   :  { %359 = vst.msk [vmem:[#allocation3 + $0x148] sm:$0xff] %vm15_vm0, %v4995_v19 }
  0xfd   :  { %355 = vst.msk [vmem:[#allocation3 + $0x128] sm:$0xff] %vm15_vm0, %v5004_v24 }
  0xfe   :  { %620 = vrot.lane.b32.xlu1 %v437_v28, %s4290_s12  ;;  %v773_v28 = vld [vmem:[#allocation2 + $0x4a] sm:$0xff] }
  0xff   :  { %624 = vrot.lane.b32.xlu0 %v439_v29, %s4290_s12  ;;  %v775_v29 = vld [vmem:[#allocation2 + $0x62] sm:$0xff] }
 0x100   :  { %v537_v36 = vpop.permute.xlu1 %536  ;;  %616 = vrot.lane.b32.xlu2 %v435_v30, %s4290_s12  ;;  %v771_v30 = vld [vmem:[#allocation2 + $0x32] sm:$0xff] }
 0x101   :  { %716 = vst.msk [vmem:[#allocation3 + $0x68] sm:$0xff] %vm702_vm2, %v537_v36  ;;  %v541_v37 = vpop.permute.xlu0 %540  ;;  %v5011_v36 = vld [vmem:[#allocation2 + $0x200] sm:$0xff] }
 0x102   :  { %718 = vst.msk [vmem:[#allocation3 + $0x78] sm:$0xff] %vm702_vm2, %v541_v37  ;;  %v551_v39 = vpop.permute.xlu2 %550  ;;  %v5013_v37 = vld [vmem:[#allocation2 + $0x240] sm:$0xff] }
 0x103   :  { %723 = vst.msk [vmem:[#allocation3 + $0xa0] sm:$0xff] %vm702_vm2, %v551_v39 }
 0x104   :  { %357 = vst.msk [vmem:[#allocation3 + $0x138] sm:$0xff] %vm15_vm0, %v5011_v36 }
 0x105   :  { %362 = vst.msk [vmem:[#allocation3 + $0x160] sm:$0xff] %vm15_vm0, %v5013_v37 }
 0x106   :  { %626 = vrot.lane.b32.xlu1 %v440_v40, %s4290_s12 }
 0x107   :  { %630 = vrot.lane.b32.xlu0 %v442_v41, %s4290_s12  ;;  %v5022_v41 = vld [vmem:[#allocation2 + $0x210] sm:$0xff] }
 0x108   :  { %v543_v48 = vpop.permute.xlu1 %542  ;;  %622 = vrot.lane.b32.xlu2 %v438_v42, %s4290_s12  ;;  %358 = vst.msk [vmem:[#allocation3 + $0x140] sm:$0xff] %vm15_vm0, %v5022_v41 }
 0x109   :  { %719 = vst.msk [vmem:[#allocation3 + $0x80] sm:$0xff] %vm702_vm2, %v543_v48  ;;  %v547_v49 = vpop.permute.xlu0 %546  ;;  %v778_v48 = vld [vmem:[#allocation2 + $0x82] sm:$0xff] }
 0x10a   :  { %721 = vst.msk [vmem:[#allocation3 + $0x90] sm:$0xff] %vm702_vm2, %v547_v49  ;;  %v557_v51 = vpop.permute.xlu2 %556  ;;  %v774_v49 = vld [vmem:[#allocation2 + $0x52] sm:$0xff] }
 0x10b   :  { %726 = vst.msk [vmem:[#allocation3 + $0xb8] sm:$0xff] %vm702_vm2, %v557_v51  ;;  %v5029_v51 = vld [vmem:[#allocation2 + $0x228] sm:$0xff] }
 0x10c   :  { %360 = vst.msk [vmem:[#allocation3 + $0x150] sm:$0xff] %vm15_vm0, %v5029_v51 }
 0x10e   :  { %632 = vrot.lane.b32.xlu1 %v443_v52, %s4290_s12  ;;  %v5031_v52 = vld [vmem:[#allocation2 + $0x260] sm:$0xff] }
 0x10f   :  { %636 = vrot.lane.b32.xlu0 %v445_v56, %s4290_s12  ;;  %365 = vst.msk [vmem:[#allocation3 + $0x178] sm:$0xff] %vm15_vm0, %v5031_v52 }
 0x110   :  { %v549_v60 = vpop.permute.xlu1 %548  ;;  %628 = vrot.lane.b32.xlu2 %v441_v57, %s4290_s12 }
 0x111   :  { %722 = vst.msk [vmem:[#allocation3 + $0x98] sm:$0xff] %vm702_vm2, %v549_v60  ;;  %v553_v61 = vpop.permute.xlu0 %552  ;;  %v5040_v60 = vld [vmem:[#allocation2 + $0x230] sm:$0xff] }
 0x112   :  { %724 = vst.msk [vmem:[#allocation3 + $0xa8] sm:$0xff] %vm702_vm2, %v553_v61  ;;  %v563_v1 = vpop.permute.xlu2 %562 }
 0x113   :  { %729 = vst.msk [vmem:[#allocation3 + $0xd0] sm:$0xff] %vm702_vm2, %v563_v1  ;;  %v779_v1 = vld [vmem:[#allocation2 + $0x92] sm:$0xff] }
 0x114   :  { %361 = vst.msk [vmem:[#allocation3 + $0x158] sm:$0xff] %vm15_vm0, %v5040_v60 }
 0x116   :  { %895 = vrot.lane.b32.xlu1 %v767_v2, %s4291_s29  ;;  %v781_v2 = vld [vmem:[#allocation2 + $0xaa] sm:$0xff] }
 0x117   :  { %899 = vrot.lane.b32.xlu0 %v769_v4, %s4291_s29  ;;  %v777_v4 = vld [vmem:[#allocation2 + $0x7a] sm:$0xff] }
 0x118   :  { %v555_v8 = vpop.permute.xlu1 %554  ;;  %634 = vrot.lane.b32.xlu2 %v444_v5, %s4290_s12  ;;  %v5047_v5 = vld [vmem:[#allocation2 + $0x248] sm:$0xff]  ;;  %s4292_s12 = smov 12  }
 0x119   :  { %725 = vst.msk [vmem:[#allocation3 + $0xb0] sm:$0xff] %vm702_vm2, %v555_v8  ;;  %v559_v9 = vpop.permute.xlu0 %558 }
 0x11a   :  { %727 = vst.msk [vmem:[#allocation3 + $0xc0] sm:$0xff] %vm702_vm2, %v559_v9  ;;  %v569_v13 = vpop.permute.xlu2 %568 }
 0x11b   :  { %732 = vst.msk [vmem:[#allocation3 + $0xe8] sm:$0xff] %vm702_vm2, %v569_v13  ;;  %v5058_v13 = vld [vmem:[#allocation2 + $0x258] sm:$0xff] }
 0x11c   :  { %363 = vst.msk [vmem:[#allocation3 + $0x168] sm:$0xff] %vm15_vm0, %v5047_v5 }
 0x11d   :  { %364 = vst.msk [vmem:[#allocation3 + $0x170] sm:$0xff] %vm15_vm0, %v5058_v13 }
 0x11e   :  { %901 = vrot.lane.b32.xlu1 %v770_v15, %s4291_s29 }
 0x11f   :  { %905 = vrot.lane.b32.xlu0 %v772_v16, %s4291_s29  ;;  %v782_v16 = vld [vmem:[#allocation2 + $0xb2] sm:$0xff] }
 0x120   :  { %v561_v20 = vpop.permute.xlu1 %560  ;;  %897 = vrot.lane.b32.xlu2 %v768_v17, %s4291_s29  ;;  %v784_v17 = vld [vmem:[#allocation2 + $0xca] sm:$0xff] }
 0x121   :  { %728 = vst.msk [vmem:[#allocation3 + $0xc8] sm:$0xff] %vm702_vm2, %v561_v20  ;;  %v565_v23 = vpop.permute.xlu0 %564  ;;  %v780_v20 = vld [vmem:[#allocation2 + $0x9a] sm:$0xff] }
 0x122   :  { %730 = vst.msk [vmem:[#allocation3 + $0xd8] sm:$0xff] %vm702_vm2, %v565_v23  ;;  %v575_v27 = vpop.permute.xlu2 %574  ;;  %v5065_v23 = vld [vmem:[#allocation2 + $0x270] sm:$0xff] }
 0x123   :  { %735 = vst.msk [vmem:[#allocation3 + $0x100] sm:$0xff] %vm702_vm2, %v575_v27  ;;  %v5067_v27 = vld [vmem:[#allocation2 + $0x2a8] sm:$0xff] }
 0x124   :  { %366 = vst.msk [vmem:[#allocation3 + $0x180] sm:$0xff] %vm15_vm0, %v5065_v23 }
 0x125   :  { %371 = vst.msk [vmem:[#allocation3 + $0x1a8] sm:$0xff] %vm15_vm0, %v5067_v27 }
 0x126   :  { %907 = vrot.lane.b32.xlu1 %v773_v28, %s4291_s29 }
 0x127   :  { %911 = vrot.lane.b32.xlu0 %v775_v29, %s4291_s29 }
 0x128   :  { %v567_v39 = vpop.permute.xlu1 %566  ;;  %903 = vrot.lane.b32.xlu2 %v771_v30, %s4291_s29  ;;  %v5076_v30 = vld [vmem:[#allocation2 + $0x278] sm:$0xff] }
 0x129   :  { %731 = vst.msk [vmem:[#allocation3 + $0xe0] sm:$0xff] %vm702_vm2, %v567_v39  ;;  %v571_v40 = vpop.permute.xlu0 %570 }
 0x12a   :  { %733 = vst.msk [vmem:[#allocation3 + $0xf0] sm:$0xff] %vm702_vm2, %v571_v40  ;;  %v581_v42 = vpop.permute.xlu2 %580  ;;  %v785_v40 = vld [vmem:[#allocation2 + $0xda] sm:$0xff] }
 0x12b   :  { %738 = vst.msk [vmem:[#allocation3 + $0x118] sm:$0xff] %vm702_vm2, %v581_v42  ;;  %v787_v42 = vld [vmem:[#allocation2 + $0xf2] sm:$0xff] }
 0x12c   :  { %367 = vst.msk [vmem:[#allocation3 + $0x188] sm:$0xff] %vm15_vm0, %v5076_v30 }
 0x12e   :  { %913 = vrot.lane.b32.xlu1 %v776_v47, %s4291_s29  ;;  %v783_v47 = vld [vmem:[#allocation2 + $0xc2] sm:$0xff] }
 0x12f   :  { %917 = vrot.lane.b32.xlu0 %v778_v48, %s4291_s29  ;;  %v5083_v48 = vld [vmem:[#allocation2 + $0x290] sm:$0xff] }
 0x130   :  { %v573_v56 = vpop.permute.xlu1 %572  ;;  %909 = vrot.lane.b32.xlu2 %v774_v49, %s4291_s29  ;;  %v5085_v49 = vld [vmem:[#allocation2 + $0x2d0] sm:$0xff]  ;;  %369 = vst.msk [vmem:[#allocation3 + $0x198] sm:$0xff] %vm15_vm0, %v5083_v48 }
 0x131   :  { %734 = vst.msk [vmem:[#allocation3 + $0xf8] sm:$0xff] %vm702_vm2, %v573_v56  ;;  %v577_v57 = vpop.permute.xlu0 %576 }
 0x132   :  { %736 = vst.msk [vmem:[#allocation3 + $0x108] sm:$0xff] %vm702_vm2, %v577_v57  ;;  %v587_v61 = vpop.permute.xlu2 %586 }
 0x133   :  { %741 = vst.msk [vmem:[#allocation3 + $0x130] sm:$0xff] %vm702_vm2, %v587_v61  ;;  %v5094_v61 = vld [vmem:[#allocation2 + $0x2a0] sm:$0xff] }
 0x134   :  { %374 = vst.msk [vmem:[#allocation3 + $0x1c0] sm:$0xff] %vm15_vm0, %v5085_v49 }
 0x135   :  { %370 = vst.msk [vmem:[#allocation3 + $0x1a0] sm:$0xff] %vm15_vm0, %v5094_v61 }
 0x136   :  { %919 = vrot.lane.b32.xlu1 %v779_v1, %s4291_s29 }
 0x137   :  { %923 = vrot.lane.b32.xlu0 %v781_v2, %s4291_s29  ;;  %v788_v2 = vld [vmem:[#allocation2 + $0xfa] sm:$0xff] }
 0x138   :  { %v579_v8 = vpop.permute.xlu1 %578  ;;  %915 = vrot.lane.b32.xlu2 %v777_v4, %s4291_s29  ;;  %v790_v4 = vld [vmem:[#allocation2 + $0x112] sm:$0xff] }
 0x139   :  { %737 = vst.msk [vmem:[#allocation3 + $0x110] sm:$0xff] %vm702_vm2, %v579_v8  ;;  %v583_v9 = vpop.permute.xlu0 %582  ;;  %v786_v8 = vld [vmem:[#allocation2 + $0xe2] sm:$0xff] }
 0x13a   :  { %739 = vst.msk [vmem:[#allocation3 + $0x120] sm:$0xff] %vm702_vm2, %v583_v9  ;;  %v593_v15 = vpop.permute.xlu2 %592  ;;  %v5101_v9 = vld [vmem:[#allocation2 + $0x2b8] sm:$0xff] }
 0x13b   :  { %744 = vst.msk [vmem:[#allocation3 + $0x148] sm:$0xff] %vm702_vm2, %v593_v15  ;;  %v5103_v15 = vld [vmem:[#allocation2 + $0x2f0] sm:$0xff] }
 0x13c   :  { %372 = vst.msk [vmem:[#allocation3 + $0x1b0] sm:$0xff] %vm15_vm0, %v5101_v9 }
 0x13d   :  { %377 = vst.msk [vmem:[#allocation3 + $0x1d8] sm:$0xff] %vm15_vm0, %v5103_v15 }
 0x13e   :  { %925 = vrot.lane.b32.xlu1 %v782_v16, %s4291_s29 }
 0x13f   :  { %929 = vrot.lane.b32.xlu0 %v784_v17, %s4291_s29 }
 0x140   :  { %v585_v28 = vpop.permute.xlu1 %584  ;;  %921 = vrot.lane.b32.xlu2 %v780_v20, %s4291_s29  ;;  %v5112_v20 = vld [vmem:[#allocation2 + $0x2c0] sm:$0xff] }
 0x141   :  { %740 = vst.msk [vmem:[#allocation3 + $0x128] sm:$0xff] %vm702_vm2, %v585_v28  ;;  %v589_v29 = vpop.permute.xlu0 %588 }
 0x142   :  { %742 = vst.msk [vmem:[#allocation3 + $0x138] sm:$0xff] %vm702_vm2, %v589_v29  ;;  %v599_v39 = vpop.permute.xlu2 %598  ;;  %v791_v29 = vld [vmem:[#allocation2 + $0x122] sm:$0xff] }
 0x143   :  { %747 = vst.msk [vmem:[#allocation3 + $0x160] sm:$0xff] %vm702_vm2, %v599_v39  ;;  %v793_v39 = vld [vmem:[#allocation2 + $0x13a] sm:$0xff] }
 0x144   :  { %373 = vst.msk [vmem:[#allocation3 + $0x1b8] sm:$0xff] %vm15_vm0, %v5112_v20 }
 0x146   :  { %931 = vrot.lane.b32.xlu1 %v785_v40, %s4291_s29  ;;  %v789_v40 = vld [vmem:[#allocation2 + $0x10a] sm:$0xff] }
 0x147   :  { %935 = vrot.lane.b32.xlu0 %v787_v42, %s4291_s29  ;;  %v5119_v42 = vld [vmem:[#allocation2 + $0x2d8] sm:$0xff] }
 0x148   :  { %v591_v56 = vpop.permute.xlu1 %590  ;;  %927 = vrot.lane.b32.xlu2 %v783_v47, %s4291_s29  ;;  %v5121_v47 = vld [vmem:[#allocation2 + $0x318] sm:$0xff]  ;;  %375 = vst.msk [vmem:[#allocation3 + $0x1c8] sm:$0xff] %vm15_vm0, %v5119_v42 }
 0x149   :  { %743 = vst.msk [vmem:[#allocation3 + $0x140] sm:$0xff] %vm702_vm2, %v591_v56  ;;  %v595_v57 = vpop.permute.xlu0 %594 }
 0x14a   :  { %745 = vst.msk [vmem:[#allocation3 + $0x150] sm:$0xff] %vm702_vm2, %v595_v57  ;;  %v605_v1 = vpop.permute.xlu2 %604 }
 0x14b   :  { %750 = vst.msk [vmem:[#allocation3 + $0x178] sm:$0xff] %vm702_vm2, %v605_v1  ;;  %v5130_v1 = vld [vmem:[#allocation2 + $0x2e8] sm:$0xff] }
 0x14c   :  { %6423 = vst [vmem:[#allocation7_spill] sm:$0xff] %v5121_v47 }
 0x14d   :  { %380 = vst.msk [vmem:[#allocation3 + $0x1f0] sm:$0xff] %vm15_vm0, %v5121_v47  ;;  %v805_v47 = vld [vmem:[#allocation2 + $0x1fa] sm:$0xff] }
 0x14e   :  { %937 = vrot.lane.b32.xlu1 %v788_v2, %s4291_s29  ;;  %376 = vst.msk [vmem:[#allocation3 + $0x1d0] sm:$0xff] %vm15_vm0, %v5130_v1 }
 0x14f   :  { %941 = vrot.lane.b32.xlu0 %v790_v4, %s4291_s29  ;;  %v794_v4 = vld [vmem:[#allocation2 + $0x142] sm:$0xff] }
 0x150   :  { %v597_v16 = vpop.permute.xlu1 %596  ;;  %933 = vrot.lane.b32.xlu2 %v786_v8, %s4291_s29  ;;  %v796_v8 = vld [vmem:[#allocation2 + $0x15a] sm:$0xff] }
 0x151   :  { %746 = vst.msk [vmem:[#allocation3 + $0x158] sm:$0xff] %vm702_vm2, %v597_v16  ;;  %v601_v17 = vpop.permute.xlu0 %600  ;;  %v792_v16 = vld [vmem:[#allocation2 + $0x12a] sm:$0xff] }
 0x152   :  { %748 = vst.msk [vmem:[#allocation3 + $0x168] sm:$0xff] %vm702_vm2, %v601_v17  ;;  %v611_v28 = vpop.permute.xlu2 %610  ;;  %v5137_v17 = vld [vmem:[#allocation2 + $0x300] sm:$0xff] }
 0x153   :  { %753 = vst.msk [vmem:[#allocation3 + $0x190] sm:$0xff] %vm702_vm2, %v611_v28  ;;  %v5139_v28 = vld [vmem:[#allocation2 + $0x308] sm:$0xff] }
 0x154   :  { %378 = vst.msk [vmem:[#allocation3 + $0x1e0] sm:$0xff] %vm15_vm0, %v5137_v17 }
 0x155   :  { %379 = vst.msk [vmem:[#allocation3 + $0x1e8] sm:$0xff] %vm15_vm0, %v5139_v28 }
 0x156   :  { %943 = vrot.lane.b32.xlu1 %v791_v29, %s4291_s29 }
 0x157   :  { %947 = vrot.lane.b32.xlu0 %v793_v39, %s4291_s29 }
 0x158   :  { %v603_v56 = vpop.permute.xlu1 %602  ;;  %939 = vrot.lane.b32.xlu2 %v789_v40, %s4291_s29 }
 0x159   :  { %749 = vst.msk [vmem:[#allocation3 + $0x170] sm:$0xff] %vm702_vm2, %v603_v56  ;;  %v607_v57 = vpop.permute.xlu0 %606  ;;  %v797_v56 = vld [vmem:[#allocation2 + $0x16a] sm:$0xff] }
 0x15a   :  { %751 = vst.msk [vmem:[#allocation3 + $0x180] sm:$0xff] %vm702_vm2, %v607_v57  ;;  %v617_v2 = vpop.permute.xlu2 %616  ;;  %v799_v57 = vld [vmem:[#allocation2 + $0x1b2] sm:$0xff] }
 0x15b   :  { %756 = vst.msk [vmem:[#allocation3 + $0x1a8] sm:$0xff] %vm702_vm2, %v617_v2  ;;  %v795_v2 = vld [vmem:[#allocation2 + $0x152] sm:$0xff] }
 0x15e   :  { %949 = vrot.lane.b32.xlu1 %v794_v4, %s4291_s29  ;;  %v5151_v4 = vld [vmem:[#allocation2 + $0x320] sm:$0xff] }
 0x15f   :  { %953 = vrot.lane.b32.xlu0 %v796_v8, %s4291_s29  ;;  %381 = vst.msk [vmem:[#allocation3 + $0x1f8] sm:$0xff] %vm15_vm0, %v5151_v4 }
 0x160   :  { %v609_v29 = vpop.permute.xlu1 %608  ;;  %945 = vrot.lane.b32.xlu2 %v792_v16, %s4291_s29 }
 0x161   :  { %752 = vst.msk [vmem:[#allocation3 + $0x188] sm:$0xff] %vm702_vm2, %v609_v29  ;;  %v613_v39 = vpop.permute.xlu0 %612 }
 0x162   :  { %754 = vst.msk [vmem:[#allocation3 + $0x198] sm:$0xff] %vm702_vm2, %v613_v39  ;;  %v623_v40 = vpop.permute.xlu2 %622  ;;  %v800_v39 = vld [vmem:[#allocation2 + $0x1ba] sm:$0xff] }
 0x163   :  { %759 = vst.msk [vmem:[#allocation3 + $0x1c0] sm:$0xff] %vm702_vm2, %v623_v40  ;;  %v802_v40 = vld [vmem:[#allocation2 + $0x1d2] sm:$0xff] }
 0x166   :  { %955 = vrot.lane.b32.xlu1 %v797_v56, %s4291_s29  ;;  %v798_v56 = vld [vmem:[#allocation2 + $0x172] sm:$0xff] }
 0x167   :  { %959 = vrot.lane.b32.xlu0 %v799_v57, %s4291_s29 }
 0x168   :  { %v615_v8 = vpop.permute.xlu1 %614  ;;  %951 = vrot.lane.b32.xlu2 %v795_v2, %s4291_s29 }
 0x169   :  { %755 = vst.msk [vmem:[#allocation3 + $0x1a0] sm:$0xff] %vm702_vm2, %v615_v8  ;;  %v619_v16 = vpop.permute.xlu0 %618 }
 0x16a   :  { %757 = vst.msk [vmem:[#allocation3 + $0x1b0] sm:$0xff] %vm702_vm2, %v619_v16  ;;  %v629_v29 = vpop.permute.xlu2 %628  ;;  %v803_v16 = vld [vmem:[#allocation2 + $0x1e2] sm:$0xff] }
 0x16b   :  { %762 = vst.msk [vmem:[#allocation3 + $0x1d8] sm:$0xff] %vm702_vm2, %v629_v29  ;;  %v801_v29 = vld [vmem:[#allocation2 + $0x1ca] sm:$0xff] }
 0x16e   :  { %961 = vrot.lane.b32.xlu1 %v800_v39, %s4291_s29 }
 0x16f   :  { %965 = vrot.lane.b32.xlu0 %v802_v40, %s4291_s29 }
 0x170   :  { %v621_v57 = vpop.permute.xlu1 %620  ;;  %957 = vrot.lane.b32.xlu2 %v798_v56, %s4291_s29 }
 0x171   :  { %758 = vst.msk [vmem:[#allocation3 + $0x1b8] sm:$0xff] %vm702_vm2, %v621_v57  ;;  %v625_v2 = vpop.permute.xlu0 %624  ;;  %v806_v57 = vld [vmem:[#allocation2 + $0x202] sm:$0xff] }
 0x172   :  { %760 = vst.msk [vmem:[#allocation3 + $0x1c8] sm:$0xff] %vm702_vm2, %v625_v2  ;;  %v635_v8 = vpop.permute.xlu2 %634  ;;  %v808_v2 = vld [vmem:[#allocation2 + $0x21a] sm:$0xff] }
 0x173   :  { %765 = vst.msk [vmem:[#allocation3 + $0x1f0] sm:$0xff] %vm702_vm2, %v635_v8  ;;  %v804_v8 = vld [vmem:[#allocation2 + $0x1ea] sm:$0xff] }
 0x176   :  { %967 = vrot.lane.b32.xlu1 %v803_v16, %s4291_s29 }
 0x177   :  { %971 = vrot.lane.b32.xlu0 %v805_v47, %s4291_s29 }
 0x178   :  { %v627_v39 = vpop.permute.xlu1 %626  ;;  %963 = vrot.lane.b32.xlu2 %v801_v29, %s4291_s29 }
 0x179   :  { %761 = vst.msk [vmem:[#allocation3 + $0x1d0] sm:$0xff] %vm702_vm2, %v627_v39  ;;  %v631_v40 = vpop.permute.xlu0 %630  ;;  %v809_v39 = vld [vmem:[#allocation2 + $0x22a] sm:$0xff] }
 0x17a   :  { %763 = vst.msk [vmem:[#allocation3 + $0x1e0] sm:$0xff] %vm702_vm2, %v631_v40  ;;  %v898_v56 = vpop.permute.xlu2 %897  ;;  %v811_v40 = vld [vmem:[#allocation2 + $0x242] sm:$0xff] }
 0x17b   :  { %1089 = vst.msk [vmem:[#allocation3 + $0x8] sm:$0xff] %vm1087_vm3, %v898_v56  ;;  %v807_v56 = vld [vmem:[#allocation2 + $0x212] sm:$0xff] }
 0x17e   :  { %973 = vrot.lane.b32.xlu1 %v806_v57, %s4291_s29 }
 0x17f   :  { %977 = vrot.lane.b32.xlu0 %v808_v2, %s4291_s29 }
 0x180   :  { %v633_v47 = vpop.permute.xlu1 %632  ;;  %969 = vrot.lane.b32.xlu2 %v804_v8, %s4291_s29 }
 0x181   :  { %764 = vst.msk [vmem:[#allocation3 + $0x1e8] sm:$0xff] %vm702_vm2, %v633_v47  ;;  %v637_v16 = vpop.permute.xlu0 %636  ;;  %v812_v47 = vld [vmem:[#allocation2 + $0x24a] sm:$0xff] }
 0x182   :  { %766 = vst.msk [vmem:[#allocation3 + $0x1f8] sm:$0xff] %vm702_vm2, %v637_v16  ;;  %v904_v29 = vpop.permute.xlu2 %903  ;;  %v814_v16 = vld [vmem:[#allocation2 + $0x262] sm:$0xff] }
 0x183   :  { %1092 = vst.msk [vmem:[#allocation3 + $0x20] sm:$0xff] %vm1087_vm3, %v904_v29  ;;  %v810_v29 = vld [vmem:[#allocation2 + $0x232] sm:$0xff] }
 0x186   :  { %979 = vrot.lane.b32.xlu1 %v809_v39, %s4291_s29 }
 0x187   :  { %983 = vrot.lane.b32.xlu0 %v811_v40, %s4291_s29 }
 0x188   :  { %v896_v57 = vpop.permute.xlu1 %895  ;;  %975 = vrot.lane.b32.xlu2 %v807_v56, %s4291_s29 }
 0x189   :  { %1088 = vst.msk [vmem:[#allocation3] sm:$0xff] %vm1087_vm3, %v896_v57  ;;  %v900_v2 = vpop.permute.xlu0 %899  ;;  %v815_v57 = vld [vmem:[#allocation2 + $0x272] sm:$0xff] }
 0x18a   :  { %1090 = vst.msk [vmem:[#allocation3 + $0x10] sm:$0xff] %vm1087_vm3, %v900_v2  ;;  %v910_v8 = vpop.permute.xlu2 %909  ;;  %v817_v2 = vld [vmem:[#allocation2 + $0x28a] sm:$0xff] }
 0x18b   :  { %1095 = vst.msk [vmem:[#allocation3 + $0x38] sm:$0xff] %vm1087_vm3, %v910_v8  ;;  %v813_v8 = vld [vmem:[#allocation2 + $0x25a] sm:$0xff] }
 0x18e   :  { %985 = vrot.lane.b32.xlu1 %v812_v47, %s4291_s29 }
 0x18f   :  { %989 = vrot.lane.b32.xlu0 %v814_v16, %s4291_s29 }
 0x190   :  { %v902_v39 = vpop.permute.xlu1 %901  ;;  %981 = vrot.lane.b32.xlu2 %v810_v29, %s4291_s29 }
 0x191   :  { %1091 = vst.msk [vmem:[#allocation3 + $0x18] sm:$0xff] %vm1087_vm3, %v902_v39  ;;  %v906_v40 = vpop.permute.xlu0 %905  ;;  %v818_v39 = vld [vmem:[#allocation2 + $0x292] sm:$0xff] }
 0x192   :  { %1093 = vst.msk [vmem:[#allocation3 + $0x28] sm:$0xff] %vm1087_vm3, %v906_v40  ;;  %v916_v56 = vpop.permute.xlu2 %915  ;;  %v820_v40 = vld [vmem:[#allocation2 + $0x2aa] sm:$0xff] }
 0x193   :  { %1098 = vst.msk [vmem:[#allocation3 + $0x50] sm:$0xff] %vm1087_vm3, %v916_v56  ;;  %v816_v56 = vld [vmem:[#allocation2 + $0x27a] sm:$0xff] }
 0x196   :  { %991 = vrot.lane.b32.xlu1 %v815_v57, %s4291_s29 }
 0x197   :  { %995 = vrot.lane.b32.xlu0 %v817_v2, %s4291_s29 }
 0x198   :  { %v908_v47 = vpop.permute.xlu1 %907  ;;  %987 = vrot.lane.b32.xlu2 %v813_v8, %s4291_s29 }
 0x199   :  { %1094 = vst.msk [vmem:[#allocation3 + $0x30] sm:$0xff] %vm1087_vm3, %v908_v47  ;;  %v912_v16 = vpop.permute.xlu0 %911  ;;  %v821_v47 = vld [vmem:[#allocation2 + $0x2ba] sm:$0xff] }
 0x19a   :  { %1096 = vst.msk [vmem:[#allocation3 + $0x40] sm:$0xff] %vm1087_vm3, %v912_v16  ;;  %v922_v29 = vpop.permute.xlu2 %921  ;;  %v823_v16 = vld [vmem:[#allocation2 + $0x2d2] sm:$0xff] }
 0x19b   :  { %1101 = vst.msk [vmem:[#allocation3 + $0x68] sm:$0xff] %vm1087_vm3, %v922_v29  ;;  %v819_v29 = vld [vmem:[#allocation2 + $0x2a2] sm:$0xff] }
 0x19e   :  { %997 = vrot.lane.b32.xlu1 %v818_v39, %s4291_s29 }
 0x19f   :  { %1001 = vrot.lane.b32.xlu0 %v820_v40, %s4291_s29 }
 0x1a0   :  { %v914_v57 = vpop.permute.xlu1 %913  ;;  %993 = vrot.lane.b32.xlu2 %v816_v56, %s4291_s29 }
 0x1a1   :  { %1097 = vst.msk [vmem:[#allocation3 + $0x48] sm:$0xff] %vm1087_vm3, %v914_v57  ;;  %v918_v2 = vpop.permute.xlu0 %917  ;;  %v824_v57 = vld [vmem:[#allocation2 + $0x2da] sm:$0xff] }
 0x1a2   :  { %1099 = vst.msk [vmem:[#allocation3 + $0x58] sm:$0xff] %vm1087_vm3, %v918_v2  ;;  %v928_v8 = vpop.permute.xlu2 %927  ;;  %v826_v2 = vld [vmem:[#allocation2 + $0x2f2] sm:$0xff] }
 0x1a3   :  { %1104 = vst.msk [vmem:[#allocation3 + $0x80] sm:$0xff] %vm1087_vm3, %v928_v8  ;;  %v822_v8 = vld [vmem:[#allocation2 + $0x2c2] sm:$0xff] }
 0x1a6   :  { %1003 = vrot.lane.b32.xlu1 %v821_v47, %s4291_s29 }
 0x1a7   :  { %1007 = vrot.lane.b32.xlu0 %v823_v16, %s4291_s29 }
 0x1a8   :  { %v920_v39 = vpop.permute.xlu1 %919  ;;  %999 = vrot.lane.b32.xlu2 %v819_v29, %s4291_s29 }
 0x1a9   :  { %1100 = vst.msk [vmem:[#allocation3 + $0x60] sm:$0xff] %vm1087_vm3, %v920_v39  ;;  %v924_v40 = vpop.permute.xlu0 %923  ;;  %v827_v39 = vld [vmem:[#allocation2 + $0x302] sm:$0xff] }
 0x1aa   :  { %1102 = vst.msk [vmem:[#allocation3 + $0x70] sm:$0xff] %vm1087_vm3, %v924_v40  ;;  %v934_v56 = vpop.permute.xlu2 %933  ;;  %v829_v40 = vld [vmem:[#allocation2 + $0x31a] sm:$0xff] }
 0x1ab   :  { %1107 = vst.msk [vmem:[#allocation3 + $0x98] sm:$0xff] %vm1087_vm3, %v934_v56  ;;  %v825_v56 = vld [vmem:[#allocation2 + $0x2ea] sm:$0xff] }
 0x1ae   :  { %1009 = vrot.lane.b32.xlu1 %v824_v57, %s4291_s29 }
 0x1af   :  { %1013 = vrot.lane.b32.xlu0 %v826_v2, %s4291_s29 }
 0x1b0   :  { %v926_v47 = vpop.permute.xlu1 %925  ;;  %1005 = vrot.lane.b32.xlu2 %v822_v8, %s4291_s29 }
 0x1b1   :  { %1103 = vst.msk [vmem:[#allocation3 + $0x78] sm:$0xff] %vm1087_vm3, %v926_v47  ;;  %v930_v16 = vpop.permute.xlu0 %929  ;;  %v830_v47 = vld [vmem:[#allocation2 + $0x322] sm:$0xff] }
 0x1b2   :  { %1105 = vst.msk [vmem:[#allocation3 + $0x88] sm:$0xff] %vm1087_vm3, %v930_v16  ;;  %v940_v29 = vpop.permute.xlu2 %939  ;;  %v828_v16 = vld [vmem:[#allocation2 + $0x30a] sm:$0xff] }
 0x1b3   :  { %1110 = vst.msk [vmem:[#allocation3 + $0xb0] sm:$0xff] %vm1087_vm3, %v940_v29 }
 0x1b6   :  { %1015 = vrot.lane.b32.xlu1 %v827_v39, %s4291_s29 }
 0x1b7   :  { %1019 = vrot.lane.b32.xlu0 %v829_v40, %s4291_s29 }
 0x1b8   :  { %v932_v57 = vpop.permute.xlu1 %931  ;;  %1011 = vrot.lane.b32.xlu2 %v825_v56, %s4291_s29  ;;  %v1154_v56 = vld [vmem:[#allocation2 + $0x30] sm:$0xff] }
 0x1b9   :  { %1106 = vst.msk [vmem:[#allocation3 + $0x90] sm:$0xff] %vm1087_vm3, %v932_v57  ;;  %v936_v2 = vpop.permute.xlu0 %935  ;;  %v1152_v57 = vld [vmem:[#allocation2 + $0x18] sm:$0xff] }
 0x1ba   :  { %1108 = vst.msk [vmem:[#allocation3 + $0xa0] sm:$0xff] %vm1087_vm3, %v936_v2  ;;  %v946_v8 = vpop.permute.xlu2 %945 }
 0x1bb   :  { %1113 = vst.msk [vmem:[#allocation3 + $0xc8] sm:$0xff] %vm1087_vm3, %v946_v8 }
 0x1be   :  { %1021 = vrot.lane.b32.xlu1 %v830_v47, %s4291_s29  ;;  %v1155_v47 = vld [vmem:[#allocation2 + $0x38] sm:$0xff] }
 0x1bf   :  { %1282 = vrot.lane.b32.xlu0 %v4753_v26, %s4292_s12 }
 0x1c0   :  { %v938_v29 = vpop.permute.xlu1 %937  ;;  %1017 = vrot.lane.b32.xlu2 %v828_v16, %s4291_s29 }
 0x1c1   :  { %1109 = vst.msk [vmem:[#allocation3 + $0xa8] sm:$0xff] %vm1087_vm3, %v938_v29  ;;  %v942_v39 = vpop.permute.xlu0 %941 }
 0x1c2   :  { %1111 = vst.msk [vmem:[#allocation3 + $0xb8] sm:$0xff] %vm1087_vm3, %v942_v39  ;;  %v952_v40 = vpop.permute.xlu2 %951  ;;  %v1158_v39 = vld [vmem:[#allocation2 + $0x60] sm:$0xff] }
 0x1c3   :  { %1116 = vst.msk [vmem:[#allocation3 + $0xe0] sm:$0xff] %vm1087_vm3, %v952_v40 }
 0x1c6   :  { %1284 = vrot.lane.b32.xlu1 %v1154_v56, %s4292_s12 }
 0x1c7   :  { %1288 = vrot.lane.b32.xlu0 %v4772_v33, %s4292_s12 }
 0x1c8   :  { %v944_v2 = vpop.permute.xlu1 %943  ;;  %1280 = vrot.lane.b32.xlu2 %v1152_v57, %s4292_s12  ;;  %v155_v57 = vld [vmem:[%s6418_s0 + $0xf0] sm:$0xff] }
 0x1c9   :  { %1112 = vst.msk [vmem:[#allocation3 + $0xc0] sm:$0xff] %vm1087_vm3, %v944_v2  ;;  %v948_v26 = vpop.permute.xlu0 %947 }
 0x1ca   :  { %1114 = vst.msk [vmem:[#allocation3 + $0xd0] sm:$0xff] %vm1087_vm3, %v948_v26  ;;  %v958_v8 = vpop.permute.xlu2 %957 }
 0x1cb   :  { %1119 = vst.msk [vmem:[#allocation3 + $0xf8] sm:$0xff] %vm1087_vm3, %v958_v8 }
 0x1cc   :  { %220 = vst.msk [vmem:[#allocation2 + $0x181] sm:$0xff] %vm15_vm0, %v155_v57  ;;  %v1543_v57 = vld [vmem:[#allocation2 + $0x61] sm:$0xff] }
 0x1ce   :  { %1290 = vrot.lane.b32.xlu1 %v4776_v35, %s4292_s12 }
 0x1cf   :  { %1294 = vrot.lane.b32.xlu0 %v4800_v43, %s4292_s12 }
 0x1d0   :  { %v950_v16 = vpop.permute.xlu1 %949  ;;  %1286 = vrot.lane.b32.xlu2 %v1155_v47, %s4292_s12 }
 0x1d1   :  { %1115 = vst.msk [vmem:[#allocation3 + $0xd8] sm:$0xff] %vm1087_vm3, %v950_v16  ;;  %v954_v33 = vpop.permute.xlu0 %953 }
 0x1d2   :  { %1117 = vst.msk [vmem:[#allocation3 + $0xe8] sm:$0xff] %vm1087_vm3, %v954_v33  ;;  %v964_v29 = vpop.permute.xlu2 %963  ;;  %v187_v33 = vld [vmem:[%s6418_s0 + $0x1f0] sm:$0xff] }
 0x1d3   :  { %1122 = vst.msk [vmem:[#allocation3 + $0x110] sm:$0xff] %vm1087_vm3, %v964_v29  ;;  %v1182_v8 = vld [vmem:[#allocation2 + $0x180] sm:$0xff]  ;;  %v188_v29 = vld [vmem:[%s6418_s0 + $0x1f8] sm:$0xff] }
 0x1d4   :  { %252 = vst.msk [vmem:[#allocation2 + $0x331] sm:$0xff] %vm15_vm0, %v187_v33 }
 0x1d5   :  { %253 = vst.msk [vmem:[#allocation2 + $0x339] sm:$0xff] %vm15_vm0, %v188_v29  ;;  %v1562_v29 = vld [vmem:[#allocation2 + $0x141] sm:$0xff] }
 0x1d6   :  { %1296 = vrot.lane.b32.xlu1 %v4804_v45, %s4292_s12 }
 0x1d7   :  { %1300 = vrot.lane.b32.xlu0 %v4828_v53, %s4292_s12 }
 0x1d8   :  { %v956_v35 = vpop.permute.xlu1 %955  ;;  %1292 = vrot.lane.b32.xlu2 %v1158_v39, %s4292_s12 }
 0x1d9   :  { %1118 = vst.msk [vmem:[#allocation3 + $0xf0] sm:$0xff] %vm1087_vm3, %v956_v35  ;;  %v960_v43 = vpop.permute.xlu0 %959  ;;  %v1537_v35 = vld [vmem:[#allocation2 + $0x19] sm:$0xff] }
 0x1da   :  { %1120 = vst.msk [vmem:[#allocation3 + $0x100] sm:$0xff] %vm1087_vm3, %v960_v43  ;;  %v970_v40 = vpop.permute.xlu2 %969 }
 0x1db   :  { %1125 = vst.msk [vmem:[#allocation3 + $0x128] sm:$0xff] %vm1087_vm3, %v970_v40  ;;  %v1214_v39 = vld [vmem:[#allocation2 + $0x330] sm:$0xff]  ;;  %v1538_v40 = vld [vmem:[#allocation2 + $0x21] sm:$0xff] }
 0x1de   :  { %1302 = vrot.lane.b32.xlu1 %v4832_v55, %s4292_s12 }
 0x1df   :  { %1306 = vrot.lane.b32.xlu0 %v4856_v63, %s4292_s12 }
 0x1e0   :  { %v962_v45 = vpop.permute.xlu1 %961  ;;  %1298 = vrot.lane.b32.xlu2 %v4774_v34, %s4292_s12 }
 0x1e1   :  { %1121 = vst.msk [vmem:[#allocation3 + $0x108] sm:$0xff] %vm1087_vm3, %v962_v45  ;;  %v966_v53 = vpop.permute.xlu0 %965  ;;  %v1540_v45 = vld [vmem:[#allocation2 + $0x39] sm:$0xff] }
 0x1e2   :  { %1123 = vst.msk [vmem:[#allocation3 + $0x118] sm:$0xff] %vm1087_vm3, %v966_v53  ;;  %v976_v56 = vpop.permute.xlu2 %975  ;;  %v1215_v53 = vld [vmem:[#allocation2 + $0x338] sm:$0xff] }
 0x1e3   :  { %1128 = vst.msk [vmem:[#allocation3 + $0x140] sm:$0xff] %vm1087_vm3, %v976_v56 }
 0x1e6   :  { %1308 = vrot.lane.b32.xlu1 %v4868_v3, %s4292_s12  ;;  %v156_v3 = vld [vmem:[%s6418_s0 + $0xf8] sm:$0xff]  ;;  %s4293_s0 = smov 16  }
 0x1e7   :  { %1312 = vrot.lane.b32.xlu0 %v4882_v10, %s4292_s12  ;;  %221 = vst.msk [vmem:[#allocation2 + $0x189] sm:$0xff] %vm15_vm0, %v156_v3  ;;  %v1539_v3 = vld [vmem:[#allocation2 + $0x31] sm:$0xff] }
 0x1e8   :  { %v968_v55 = vpop.permute.xlu1 %967  ;;  %1304 = vrot.lane.b32.xlu2 %v4802_v44, %s4292_s12 }
 0x1e9   :  { %1124 = vst.msk [vmem:[#allocation3 + $0x120] sm:$0xff] %vm1087_vm3, %v968_v55  ;;  %v972_v34 = vpop.permute.xlu0 %971 }
 0x1ea   :  { %1126 = vst.msk [vmem:[#allocation3 + $0x130] sm:$0xff] %vm1087_vm3, %v972_v34  ;;  %v982_v63 = vpop.permute.xlu2 %981 }
 0x1eb   :  { %1131 = vst.msk [vmem:[#allocation3 + $0x158] sm:$0xff] %vm1087_vm3, %v982_v63  ;;  %v1541_v63 = vld [vmem:[#allocation2 + $0x49] sm:$0xff] }
 0x1ee   :  { %1314 = vrot.lane.b32.xlu1 %v4894_v14, %s4292_s12  ;;  %v1183_v26 = vld [vmem:[#allocation2 + $0x188] sm:$0xff] }
 0x1ef   :  { %1318 = vrot.lane.b32.xlu0 %v4908_v21, %s4292_s12 }
 0x1f0   :  { %v974_v44 = vpop.permute.xlu1 %973  ;;  %1310 = vrot.lane.b32.xlu2 %v4830_v54, %s4292_s12 }
 0x1f1   :  { %1127 = vst.msk [vmem:[#allocation3 + $0x138] sm:$0xff] %vm1087_vm3, %v974_v44  ;;  %v978_v10 = vpop.permute.xlu0 %977 }
 0x1f2   :  { %1129 = vst.msk [vmem:[#allocation3 + $0x148] sm:$0xff] %vm1087_vm3, %v978_v10  ;;  %v988_v2 = vpop.permute.xlu2 %987 }
 0x1f3   :  { %1134 = vst.msk [vmem:[#allocation3 + $0x170] sm:$0xff] %vm1087_vm3, %v988_v2 }
 0x1f6   :  { %1320 = vrot.lane.b32.xlu1 %v4920_v25, %s4292_s12 }
 0x1f7   :  { %1324 = vrot.lane.b32.xlu0 %v4927_v31, %s4292_s12 }
 0x1f8   :  { %v980_v14 = vpop.permute.xlu1 %979  ;;  %1316 = vrot.lane.b32.xlu2 %v4858_v0, %s4292_s12 }
 0x1f9   :  { %1130 = vst.msk [vmem:[#allocation3 + $0x150] sm:$0xff] %vm1087_vm3, %v980_v14  ;;  %v984_v54 = vpop.permute.xlu0 %983  ;;  %v1544_v14 = vld [vmem:[#allocation2 + $0x69] sm:$0xff] }
 0x1fa   :  { %1132 = vst.msk [vmem:[#allocation3 + $0x160] sm:$0xff] %vm1087_vm3, %v984_v54  ;;  %v994_v21 = vpop.permute.xlu2 %993  ;;  %v1546_v54 = vld [vmem:[#allocation2 + $0x81] sm:$0xff] }
 0x1fb   :  { %1137 = vst.msk [vmem:[#allocation3 + $0x188] sm:$0xff] %vm1087_vm3, %v994_v21  ;;  %v1542_v21 = vld [vmem:[#allocation2 + $0x51] sm:$0xff] }
 0x1fe   :  { %1326 = vrot.lane.b32.xlu1 %v4938_v38, %s4292_s12 }
 0x1ff   :  { %1330 = vrot.lane.b32.xlu0 %v4945_v46, %s4292_s12 }
 0x200   :  { %v986_v25 = vpop.permute.xlu1 %985  ;;  %1322 = vrot.lane.b32.xlu2 %v4884_v11, %s4292_s12 }
 0x201   :  { %1133 = vst.msk [vmem:[#allocation3 + $0x168] sm:$0xff] %vm1087_vm3, %v986_v25  ;;  %v990_v0 = vpop.permute.xlu0 %989 }
 0x202   :  { %1135 = vst.msk [vmem:[#allocation3 + $0x178] sm:$0xff] %vm1087_vm3, %v990_v0  ;;  %v1000_v31 = vpop.permute.xlu2 %999 }
 0x203   :  { %1140 = vst.msk [vmem:[#allocation3 + $0x1a0] sm:$0xff] %vm1087_vm3, %v1000_v31 }
 0x206   :  { %1332 = vrot.lane.b32.xlu1 %v4953_v50, %s4292_s12 }
 0x207   :  { %1336 = vrot.lane.b32.xlu0 %v4960_v58, %s4292_s12 }
 0x208   :  { %v992_v38 = vpop.permute.xlu1 %991  ;;  %1328 = vrot.lane.b32.xlu2 %v4910_v22, %s4292_s12 }
 0x209   :  { %1136 = vst.msk [vmem:[#allocation3 + $0x180] sm:$0xff] %vm1087_vm3, %v992_v38  ;;  %v996_v11 = vpop.permute.xlu0 %995  ;;  %v1547_v38 = vld [vmem:[#allocation2 + $0x91] sm:$0xff] }
 0x20a   :  { %1138 = vst.msk [vmem:[#allocation3 + $0x190] sm:$0xff] %vm1087_vm3, %v996_v11  ;;  %v1006_v46 = vpop.permute.xlu2 %1005  ;;  %v1549_v11 = vld [vmem:[#allocation2 + $0xa9] sm:$0xff] }
 0x20b   :  { %1143 = vst.msk [vmem:[#allocation3 + $0x1b8] sm:$0xff] %vm1087_vm3, %v1006_v46  ;;  %v1545_v46 = vld [vmem:[#allocation2 + $0x79] sm:$0xff] }
 0x20e   :  { %1338 = vrot.lane.b32.xlu1 %v4971_v62, %s4292_s12 }
 0x20f   :  { %1342 = vrot.lane.b32.xlu0 %v1183_v26, %s4292_s12 }
 0x210   :  { %v998_v50 = vpop.permute.xlu1 %997  ;;  %1334 = vrot.lane.b32.xlu2 %v4929_v32, %s4292_s12 }
 0x211   :  { %1139 = vst.msk [vmem:[#allocation3 + $0x198] sm:$0xff] %vm1087_vm3, %v998_v50  ;;  %v1002_v22 = vpop.permute.xlu0 %1001 }
 0x212   :  { %1141 = vst.msk [vmem:[#allocation3 + $0x1a8] sm:$0xff] %vm1087_vm3, %v1002_v22  ;;  %v1012_v58 = vpop.permute.xlu2 %1011 }
 0x213   :  { %1146 = vst.msk [vmem:[#allocation3 + $0x1d0] sm:$0xff] %vm1087_vm3, %v1012_v58  ;;  %v1550_v58 = vld [vmem:[#allocation2 + $0xb1] sm:$0xff] }
 0x216   :  { %1344 = vrot.lane.b32.xlu1 %v4986_v12, %s4292_s12 }
 0x217   :  { %1348 = vrot.lane.b32.xlu0 %v4993_v18, %s4292_s12 }
 0x218   :  { %v1004_v62 = vpop.permute.xlu1 %1003  ;;  %1340 = vrot.lane.b32.xlu2 %v1182_v8, %s4292_s12  ;;  %v1552_v8 = vld [vmem:[#allocation2 + $0xc9] sm:$0xff] }
 0x219   :  { %1142 = vst.msk [vmem:[#allocation3 + $0x1b0] sm:$0xff] %vm1087_vm3, %v1004_v62  ;;  %v1008_v32 = vpop.permute.xlu0 %1007  ;;  %v1548_v62 = vld [vmem:[#allocation2 + $0x99] sm:$0xff] }
 0x21a   :  { %1144 = vst.msk [vmem:[#allocation3 + $0x1c0] sm:$0xff] %vm1087_vm3, %v1008_v32  ;;  %v1018_v47 = vpop.permute.xlu2 %1017 }
 0x21b   :  { %1149 = vst.msk [vmem:[#allocation3 + $0x1e8] sm:$0xff] %vm1087_vm3, %v1018_v47 }
 0x21e   :  { %1350 = vrot.lane.b32.xlu1 %v5004_v24, %s4292_s12 }
 0x21f   :  { %1354 = vrot.lane.b32.xlu0 %v5011_v36, %s4292_s12 }
 0x220   :  { %v1010_v12 = vpop.permute.xlu1 %1009  ;;  %1346 = vrot.lane.b32.xlu2 %v4962_v59, %s4292_s12 }
 0x221   :  { %1145 = vst.msk [vmem:[#allocation3 + $0x1c8] sm:$0xff] %vm1087_vm3, %v1010_v12  ;;  %v1014_v18 = vpop.permute.xlu0 %1013 }
 0x222   :  { %1147 = vst.msk [vmem:[#allocation3 + $0x1d8] sm:$0xff] %vm1087_vm3, %v1014_v18  ;;  %v1281_v16 = vpop.permute.xlu2 %1280  ;;  %v1553_v18 = vld [vmem:[#allocation2 + $0xd9] sm:$0xff] }
 0x223   :  { %1473 = vst.msk [vmem:[#allocation3] sm:$0xff] %vm1472_vm4, %v1281_v16  ;;  %v1555_v16 = vld [vmem:[#allocation2 + $0xf1] sm:$0xff] }
 0x226   :  { %1356 = vrot.lane.b32.xlu1 %v5022_v41, %s4292_s12 }
 0x227   :  { %1360 = vrot.lane.b32.xlu0 %v5029_v51, %s4292_s12 }
 0x228   :  { %v1016_v24 = vpop.permute.xlu1 %1015  ;;  %1352 = vrot.lane.b32.xlu2 %v4978_v7, %s4292_s12 }
 0x229   :  { %1148 = vst.msk [vmem:[#allocation3 + $0x1e0] sm:$0xff] %vm1087_vm3, %v1016_v24  ;;  %v1020_v59 = vpop.permute.xlu0 %1019  ;;  %v1551_v24 = vld [vmem:[#allocation2 + $0xc1] sm:$0xff] }
 0x22a   :  { %1150 = vst.msk [vmem:[#allocation3 + $0x1f0] sm:$0xff] %vm1087_vm3, %v1020_v59  ;;  %v1287_v36 = vpop.permute.xlu2 %1286 }
 0x22b   :  { %1476 = vst.msk [vmem:[#allocation3 + $0x18] sm:$0xff] %vm1472_vm4, %v1287_v36 }
 0x22e   :  { %1362 = vrot.lane.b32.xlu1 %v5040_v60, %s4292_s12 }
 0x22f   :  { %1366 = vrot.lane.b32.xlu0 %v5047_v5, %s4292_s12 }
 0x230   :  { %v1022_v41 = vpop.permute.xlu1 %1021  ;;  %1358 = vrot.lane.b32.xlu2 %v4995_v19, %s4292_s12 }
 0x231   :  { %1151 = vst.msk [vmem:[#allocation3 + $0x1f8] sm:$0xff] %vm1087_vm3, %v1022_v41  ;;  %v1283_v7 = vpop.permute.xlu0 %1282 }
 0x232   :  { %1474 = vst.msk [vmem:[#allocation3 + $0x8] sm:$0xff] %vm1472_vm4, %v1283_v7  ;;  %v1293_v51 = vpop.permute.xlu2 %1292  ;;  %v1556_v7 = vld [vmem:[#allocation2 + $0xf9] sm:$0xff] }
 0x233   :  { %1479 = vst.msk [vmem:[#allocation3 + $0x30] sm:$0xff] %vm1472_vm4, %v1293_v51  ;;  %v1558_v51 = vld [vmem:[#allocation2 + $0x111] sm:$0xff] }
 0x236   :  { %1368 = vrot.lane.b32.xlu1 %v5058_v13, %s4292_s12 }
 0x237   :  { %1372 = vrot.lane.b32.xlu0 %v5065_v23, %s4292_s12 }
 0x238   :  { %v1285_v60 = vpop.permute.xlu1 %1284  ;;  %1364 = vrot.lane.b32.xlu2 %v5013_v37, %s4292_s12 }
 0x239   :  { %1475 = vst.msk [vmem:[#allocation3 + $0x10] sm:$0xff] %vm1472_vm4, %v1285_v60  ;;  %v1289_v19 = vpop.permute.xlu0 %1288  ;;  %v1554_v60 = vld [vmem:[#allocation2 + $0xe1] sm:$0xff] }
 0x23a   :  { %1477 = vst.msk [vmem:[#allocation3 + $0x20] sm:$0xff] %vm1472_vm4, %v1289_v19  ;;  %v1299_v5 = vpop.permute.xlu2 %1298 }
 0x23b   :  { %1482 = vst.msk [vmem:[#allocation3 + $0x48] sm:$0xff] %vm1472_vm4, %v1299_v5 }
 0x23e   :  { %1374 = vrot.lane.b32.xlu1 %v5076_v30, %s4292_s12 }
 0x23f   :  { %1378 = vrot.lane.b32.xlu0 %v5083_v48, %s4292_s12 }
 0x240   :  { %v1291_v37 = vpop.permute.xlu1 %1290  ;;  %1370 = vrot.lane.b32.xlu2 %v5031_v52, %s4292_s12 }
 0x241   :  { %1478 = vst.msk [vmem:[#allocation3 + $0x28] sm:$0xff] %vm1472_vm4, %v1291_v37  ;;  %v1295_v13 = vpop.permute.xlu0 %1294  ;;  %v1559_v37 = vld [vmem:[#allocation2 + $0x121] sm:$0xff] }
 0x242   :  { %1480 = vst.msk [vmem:[#allocation3 + $0x38] sm:$0xff] %vm1472_vm4, %v1295_v13  ;;  %v1305_v23 = vpop.permute.xlu2 %1304  ;;  %v1561_v13 = vld [vmem:[#allocation2 + $0x139] sm:$0xff] }
 0x243   :  { %1485 = vst.msk [vmem:[#allocation3 + $0x60] sm:$0xff] %vm1472_vm4, %v1305_v23  ;;  %v1557_v23 = vld [vmem:[#allocation2 + $0x109] sm:$0xff] }
 0x246   :  { %1380 = vrot.lane.b32.xlu1 %v5094_v61, %s4292_s12 }
 0x247   :  { %1384 = vrot.lane.b32.xlu0 %v5101_v9, %s4292_s12 }
 0x248   :  { %v1297_v30 = vpop.permute.xlu1 %1296  ;;  %1376 = vrot.lane.b32.xlu2 %v5049_v6, %s4292_s12 }
 0x249   :  { %1481 = vst.msk [vmem:[#allocation3 + $0x40] sm:$0xff] %vm1472_vm4, %v1297_v30  ;;  %v1301_v52 = vpop.permute.xlu0 %1300 }
 0x24a   :  { %1483 = vst.msk [vmem:[#allocation3 + $0x50] sm:$0xff] %vm1472_vm4, %v1301_v52  ;;  %v1311_v48 = vpop.permute.xlu2 %1310 }
 0x24b   :  { %1488 = vst.msk [vmem:[#allocation3 + $0x78] sm:$0xff] %vm1472_vm4, %v1311_v48 }
 0x24e   :  { %1386 = vrot.lane.b32.xlu1 %v5112_v20, %s4292_s12 }
 0x24f   :  { %1390 = vrot.lane.b32.xlu0 %v5119_v42, %s4292_s12 }
 0x250   :  { %v1303_v6 = vpop.permute.xlu1 %1302  ;;  %1382 = vrot.lane.b32.xlu2 %v5067_v27, %s4292_s12 }
 0x251   :  { %1484 = vst.msk [vmem:[#allocation3 + $0x58] sm:$0xff] %vm1472_vm4, %v1303_v6  ;;  %v1307_v61 = vpop.permute.xlu0 %1306  ;;  %v1564_v6 = vld [vmem:[#allocation2 + $0x159] sm:$0xff] }
 0x252   :  { %1486 = vst.msk [vmem:[#allocation3 + $0x68] sm:$0xff] %vm1472_vm4, %v1307_v61  ;;  %v1317_v9 = vpop.permute.xlu2 %1316  ;;  %v1560_v61 = vld [vmem:[#allocation2 + $0x129] sm:$0xff] }
 0x253   :  { %1491 = vst.msk [vmem:[#allocation3 + $0x90] sm:$0xff] %vm1472_vm4, %v1317_v9 }
 0x256   :  { %1392 = vrot.lane.b32.xlu1 %v5130_v1, %s4292_s12 }
 0x257   :  { %1396 = vrot.lane.b32.xlu0 %v5137_v17, %s4292_s12 }
 0x258   :  { %v1309_v20 = vpop.permute.xlu1 %1308  ;;  %1388 = vrot.lane.b32.xlu2 %v5085_v49, %s4292_s12 }
 0x259   :  { %1487 = vst.msk [vmem:[#allocation3 + $0x70] sm:$0xff] %vm1472_vm4, %v1309_v20  ;;  %v1313_v27 = vpop.permute.xlu0 %1312 }
 0x25a   :  { %1489 = vst.msk [vmem:[#allocation3 + $0x80] sm:$0xff] %vm1472_vm4, %v1313_v27  ;;  %v1323_v42 = vpop.permute.xlu2 %1322 }
 0x25b   :  { %1494 = vst.msk [vmem:[#allocation3 + $0xa8] sm:$0xff] %vm1472_vm4, %v1323_v42  ;;  %v1565_v42 = vld [vmem:[#allocation2 + $0x169] sm:$0xff] }
 0x25e   :  { %1398 = vrot.lane.b32.xlu1 %v5139_v28, %s4292_s12 }
 0x25f   :  { %1402 = vrot.lane.b32.xlu0 %v5151_v4, %s4292_s12  ;;  %v6424_v4 = vld [vmem:[#allocation7_spill] sm:$0xff] }
 0x260   :  { %v1315_v1 = vpop.permute.xlu1 %1314  ;;  %1394 = vrot.lane.b32.xlu2 %v5103_v15, %s4292_s12 }
 0x261   :  { %1490 = vst.msk [vmem:[#allocation3 + $0x88] sm:$0xff] %vm1472_vm4, %v1315_v1  ;;  %v1319_v49 = vpop.permute.xlu0 %1318  ;;  %v1567_v1 = vld [vmem:[#allocation2 + $0x181] sm:$0xff] }
 0x262   :  { %1492 = vst.msk [vmem:[#allocation3 + $0x98] sm:$0xff] %vm1472_vm4, %v1319_v49  ;;  %v1329_v17 = vpop.permute.xlu2 %1328  ;;  %v1563_v49 = vld [vmem:[#allocation2 + $0x151] sm:$0xff] }
 0x263   :  { %1497 = vst.msk [vmem:[#allocation3 + $0xc0] sm:$0xff] %vm1472_vm4, %v1329_v17 }
 0x266   :  { %1404 = vrot.lane.b32.xlu1 %v1214_v39, %s4292_s12 }
 0x267   :  { %1665 = vrot.lane.b32.xlu0 %v1537_v35, %s4293_s0 }
 0x268   :  { %v1321_v28 = vpop.permute.xlu1 %1320  ;;  %1400 = vrot.lane.b32.xlu2 %v6424_v4, %s4292_s12  ;;  %v1570_v4 = vld [vmem:[#allocation2 + $0x1d1] sm:$0xff] }
 0x269   :  { %1493 = vst.msk [vmem:[#allocation3 + $0xa0] sm:$0xff] %vm1472_vm4, %v1321_v28  ;;  %v1325_v15 = vpop.permute.xlu0 %1324  ;;  %v1568_v28 = vld [vmem:[#allocation2 + $0x189] sm:$0xff] }
 0x26a   :  { %1495 = vst.msk [vmem:[#allocation3 + $0xb0] sm:$0xff] %vm1472_vm4, %v1325_v15  ;;  %v1335_v43 = vpop.permute.xlu2 %1334  ;;  %v1566_v15 = vld [vmem:[#allocation2 + $0x171] sm:$0xff] }
 0x26b   :  { %1500 = vst.msk [vmem:[#allocation3 + $0xd8] sm:$0xff] %vm1472_vm4, %v1335_v43 }
 0x26e   :  { %1667 = vrot.lane.b32.xlu1 %v1538_v40, %s4293_s0 }
 0x26f   :  { %1671 = vrot.lane.b32.xlu0 %v1540_v45, %s4293_s0 }
 0x270   :  { %v1327_v56 = vpop.permute.xlu1 %1326  ;;  %1406 = vrot.lane.b32.xlu2 %v1215_v53, %s4292_s12  ;;  %v1571_v53 = vld [vmem:[#allocation2 + $0x1e1] sm:$0xff] }
 0x271   :  { %1496 = vst.msk [vmem:[#allocation3 + $0xb8] sm:$0xff] %vm1472_vm4, %v1327_v56  ;;  %v1331_v55 = vpop.permute.xlu0 %1330  ;;  %v1573_v56 = vld [vmem:[#allocation2 + $0x1f9] sm:$0xff] }
 0x272   :  { %1498 = vst.msk [vmem:[#allocation3 + $0xc8] sm:$0xff] %vm1472_vm4, %v1331_v55  ;;  %v1341_v34 = vpop.permute.xlu2 %1340  ;;  %v1569_v55 = vld [vmem:[#allocation2 + $0x1c9] sm:$0xff] }
 0x273   :  { %1503 = vst.msk [vmem:[#allocation3 + $0xf0] sm:$0xff] %vm1472_vm4, %v1341_v34 }
 0x276   :  { %1673 = vrot.lane.b32.xlu1 %v1541_v63, %s4293_s0 }
 0x277   :  { %1677 = vrot.lane.b32.xlu0 %v1543_v57, %s4293_s0 }
 0x278   :  { %v1333_v44 = vpop.permute.xlu1 %1332  ;;  %1669 = vrot.lane.b32.xlu2 %v1539_v3, %s4293_s0  ;;  %v1574_v3 = vld [vmem:[#allocation2 + $0x201] sm:$0xff] }
 0x279   :  { %1499 = vst.msk [vmem:[#allocation3 + $0xd0] sm:$0xff] %vm1472_vm4, %v1333_v44  ;;  %v1337_v10 = vpop.permute.xlu0 %1336  ;;  %v1576_v44 = vld [vmem:[#allocation2 + $0x219] sm:$0xff] }
 0x27a   :  { %1501 = vst.msk [vmem:[#allocation3 + $0xe0] sm:$0xff] %vm1472_vm4, %v1337_v10  ;;  %v1347_v2 = vpop.permute.xlu2 %1346  ;;  %v1572_v10 = vld [vmem:[#allocation2 + $0x1e9] sm:$0xff] }
 0x27b   :  { %1506 = vst.msk [vmem:[#allocation3 + $0x108] sm:$0xff] %vm1472_vm4, %v1347_v2 }
 0x27e   :  { %1679 = vrot.lane.b32.xlu1 %v1544_v14, %s4293_s0 }
 0x27f   :  { %1683 = vrot.lane.b32.xlu0 %v1546_v54, %s4293_s0 }
 0x280   :  { %v1339_v25 = vpop.permute.xlu1 %1338  ;;  %1675 = vrot.lane.b32.xlu2 %v1542_v21, %s4293_s0  ;;  %v1577_v21 = vld [vmem:[#allocation2 + $0x229] sm:$0xff] }
 0x281   :  { %1502 = vst.msk [vmem:[#allocation3 + $0xe8] sm:$0xff] %vm1472_vm4, %v1339_v25  ;;  %v1343_v0 = vpop.permute.xlu0 %1342  ;;  %v1579_v25 = vld [vmem:[#allocation2 + $0x241] sm:$0xff] }
 0x282   :  { %1504 = vst.msk [vmem:[#allocation3 + $0xf8] sm:$0xff] %vm1472_vm4, %v1343_v0  ;;  %v1353_v31 = vpop.permute.xlu2 %1352  ;;  %v1575_v0 = vld [vmem:[#allocation2 + $0x211] sm:$0xff] }
 0x283   :  { %1509 = vst.msk [vmem:[#allocation3 + $0x120] sm:$0xff] %vm1472_vm4, %v1353_v31 }
 0x286   :  { %1685 = vrot.lane.b32.xlu1 %v1547_v38, %s4293_s0 }
 0x287   :  { %1689 = vrot.lane.b32.xlu0 %v1549_v11, %s4293_s0 }
 0x288   :  { %v1345_v26 = vpop.permute.xlu1 %1344  ;;  %1681 = vrot.lane.b32.xlu2 %v1545_v46, %s4293_s0  ;;  %v1580_v46 = vld [vmem:[#allocation2 + $0x249] sm:$0xff] }
 0x289   :  { %1505 = vst.msk [vmem:[#allocation3 + $0x100] sm:$0xff] %vm1472_vm4, %v1345_v26  ;;  %v1349_v50 = vpop.permute.xlu0 %1348  ;;  %v1582_v26 = vld [vmem:[#allocation2 + $0x261] sm:$0xff] }
 0x28a   :  { %1507 = vst.msk [vmem:[#allocation3 + $0x110] sm:$0xff] %vm1472_vm4, %v1349_v50  ;;  %v1359_v22 = vpop.permute.xlu2 %1358  ;;  %v1578_v50 = vld [vmem:[#allocation2 + $0x231] sm:$0xff] }
 0x28b   :  { %1512 = vst.msk [vmem:[#allocation3 + $0x138] sm:$0xff] %vm1472_vm4, %v1359_v22 }
 0x28e   :  { %1691 = vrot.lane.b32.xlu1 %v1550_v58, %s4293_s0 }
 0x28f   :  { %1695 = vrot.lane.b32.xlu0 %v1552_v8, %s4293_s0 }
 0x290   :  { %v1351_v32 = vpop.permute.xlu1 %1350  ;;  %1687 = vrot.lane.b32.xlu2 %v1548_v62, %s4293_s0  ;;  %v1583_v62 = vld [vmem:[#allocation2 + $0x271] sm:$0xff] }
 0x291   :  { %1508 = vst.msk [vmem:[#allocation3 + $0x118] sm:$0xff] %vm1472_vm4, %v1351_v32  ;;  %v1355_v47 = vpop.permute.xlu0 %1354  ;;  %v1585_v32 = vld [vmem:[#allocation2 + $0x289] sm:$0xff] }
 0x292   :  { %1510 = vst.msk [vmem:[#allocation3 + $0x128] sm:$0xff] %vm1472_vm4, %v1355_v47  ;;  %v1365_v12 = vpop.permute.xlu2 %1364  ;;  %v1581_v47 = vld [vmem:[#allocation2 + $0x259] sm:$0xff] }
 0x293   :  { %1515 = vst.msk [vmem:[#allocation3 + $0x150] sm:$0xff] %vm1472_vm4, %v1365_v12 }
 0x296   :  { %1697 = vrot.lane.b32.xlu1 %v1553_v18, %s4293_s0 }
 0x297   :  { %1701 = vrot.lane.b32.xlu0 %v1555_v16, %s4293_s0 }
 0x298   :  { %v1357_v59 = vpop.permute.xlu1 %1356  ;;  %1693 = vrot.lane.b32.xlu2 %v1551_v24, %s4293_s0  ;;  %v1586_v24 = vld [vmem:[#allocation2 + $0x291] sm:$0xff] }
 0x299   :  { %1511 = vst.msk [vmem:[#allocation3 + $0x130] sm:$0xff] %vm1472_vm4, %v1357_v59  ;;  %v1361_v36 = vpop.permute.xlu0 %1360  ;;  %v1588_v59 = vld [vmem:[#allocation2 + $0x2a9] sm:$0xff] }
 0x29a   :  { %1513 = vst.msk [vmem:[#allocation3 + $0x140] sm:$0xff] %vm1472_vm4, %v1361_v36  ;;  %v1371_v41 = vpop.permute.xlu2 %1370  ;;  %v1584_v36 = vld [vmem:[#allocation2 + $0x279] sm:$0xff] }
 0x29b   :  { %1518 = vst.msk [vmem:[#allocation3 + $0x168] sm:$0xff] %vm1472_vm4, %v1371_v41 }
 0x29e   :  { %1703 = vrot.lane.b32.xlu1 %v1556_v7, %s4293_s0 }
 0x29f   :  { %1707 = vrot.lane.b32.xlu0 %v1558_v51, %s4293_s0 }
 0x2a0   :  { %v1363_v19 = vpop.permute.xlu1 %1362  ;;  %1699 = vrot.lane.b32.xlu2 %v1554_v60, %s4293_s0  ;;  %v1589_v60 = vld [vmem:[#allocation2 + $0x2b9] sm:$0xff] }
 0x2a1   :  { %1514 = vst.msk [vmem:[#allocation3 + $0x148] sm:$0xff] %vm1472_vm4, %v1363_v19  ;;  %v1367_v5 = vpop.permute.xlu0 %1366  ;;  %v1591_v19 = vld [vmem:[#allocation2 + $0x2d1] sm:$0xff] }
 0x2a2   :  { %1516 = vst.msk [vmem:[#allocation3 + $0x158] sm:$0xff] %vm1472_vm4, %v1367_v5  ;;  %v1377_v33 = vpop.permute.xlu2 %1376  ;;  %v1587_v5 = vld [vmem:[#allocation2 + $0x2a1] sm:$0xff] }
 0x2a3   :  { %1521 = vst.msk [vmem:[#allocation3 + $0x180] sm:$0xff] %vm1472_vm4, %v1377_v33 }
 0x2a6   :  { %1709 = vrot.lane.b32.xlu1 %v1559_v37, %s4293_s0 }
 0x2a7   :  { %1713 = vrot.lane.b32.xlu0 %v1561_v13, %s4293_s0 }
 0x2a8   :  { %v1369_v30 = vpop.permute.xlu1 %1368  ;;  %1705 = vrot.lane.b32.xlu2 %v1557_v23, %s4293_s0  ;;  %v1592_v23 = vld [vmem:[#allocation2 + $0x2d9] sm:$0xff] }
 0x2a9   :  { %1517 = vst.msk [vmem:[#allocation3 + $0x160] sm:$0xff] %vm1472_vm4, %v1369_v30  ;;  %v1373_v52 = vpop.permute.xlu0 %1372  ;;  %v1594_v30 = vld [vmem:[#allocation2 + $0x2f1] sm:$0xff] }
 0x2aa   :  { %1519 = vst.msk [vmem:[#allocation3 + $0x170] sm:$0xff] %vm1472_vm4, %v1373_v52  ;;  %v1383_v48 = vpop.permute.xlu2 %1382  ;;  %v1590_v52 = vld [vmem:[#allocation2 + $0x2c1] sm:$0xff] }
 0x2ab   :  { %1524 = vst.msk [vmem:[#allocation3 + $0x198] sm:$0xff] %vm1472_vm4, %v1383_v48 }
 0x2ae   :  { %1715 = vrot.lane.b32.xlu1 %v1562_v29, %s4293_s0 }
 0x2af   :  { %1719 = vrot.lane.b32.xlu0 %v1564_v6, %s4293_s0 }
 0x2b0   :  { %v1375_v9 = vpop.permute.xlu1 %1374  ;;  %1711 = vrot.lane.b32.xlu2 %v1560_v61, %s4293_s0  ;;  %v1595_v61 = vld [vmem:[#allocation2 + $0x301] sm:$0xff] }
 0x2b1   :  { %1520 = vst.msk [vmem:[#allocation3 + $0x178] sm:$0xff] %vm1472_vm4, %v1375_v9  ;;  %v1379_v20 = vpop.permute.xlu0 %1378  ;;  %v1597_v9 = vld [vmem:[#allocation2 + $0x319] sm:$0xff] }
 0x2b2   :  { %1522 = vst.msk [vmem:[#allocation3 + $0x188] sm:$0xff] %vm1472_vm4, %v1379_v20  ;;  %v1389_v27 = vpop.permute.xlu2 %1388  ;;  %v1593_v20 = vld [vmem:[#allocation2 + $0x2e9] sm:$0xff] }
 0x2b3   :  { %1527 = vst.msk [vmem:[#allocation3 + $0x1b0] sm:$0xff] %vm1472_vm4, %v1389_v27 }
 0x2b6   :  { %1721 = vrot.lane.b32.xlu1 %v1565_v42, %s4293_s0 }
 0x2b7   :  { %1725 = vrot.lane.b32.xlu0 %v1567_v1, %s4293_s0 }
 0x2b8   :  { %v1381_v17 = vpop.permute.xlu1 %1380  ;;  %1717 = vrot.lane.b32.xlu2 %v1563_v49, %s4293_s0  ;;  %v1598_v49 = vld [vmem:[#allocation2 + $0x321] sm:$0xff] }
 0x2b9   :  { %1523 = vst.msk [vmem:[#allocation3 + $0x190] sm:$0xff] %vm1472_vm4, %v1381_v17  ;;  %v1385_v39 = vpop.permute.xlu0 %1384  ;;  %v1600_v17 = vld [vmem:[#allocation2 + $0x339] sm:$0xff] }
 0x2ba   :  { %1525 = vst.msk [vmem:[#allocation3 + $0x1a0] sm:$0xff] %vm1472_vm4, %v1385_v39  ;;  %v1395_v35 = vpop.permute.xlu2 %1394  ;;  %v1596_v39 = vld [vmem:[#allocation2 + $0x309] sm:$0xff] }
 0x2bb   :  { %1530 = vst.msk [vmem:[#allocation3 + $0x1c8] sm:$0xff] %vm1472_vm4, %v1395_v35 }
 0x2be   :  { %1727 = vrot.lane.b32.xlu1 %v1568_v28, %s4293_s0 }
 0x2bf   :  { %1731 = vrot.lane.b32.xlu0 %v1570_v4, %s4293_s0 }
 0x2c0   :  { %v1387_v43 = vpop.permute.xlu1 %1386  ;;  %1723 = vrot.lane.b32.xlu2 %v1566_v15, %s4293_s0  ;;  %v1922_v15 = vld [vmem:[#allocation2 + $0x1a] sm:$0xff] }
 0x2c1   :  { %1526 = vst.msk [vmem:[#allocation3 + $0x1a8] sm:$0xff] %vm1472_vm4, %v1387_v43  ;;  %v1391_v40 = vpop.permute.xlu0 %1390  ;;  %v1924_v43 = vld [vmem:[#allocation2 + $0x32] sm:$0xff] }
 0x2c2   :  { %1528 = vst.msk [vmem:[#allocation3 + $0x1b8] sm:$0xff] %vm1472_vm4, %v1391_v40  ;;  %v1401_v45 = vpop.permute.xlu2 %1400  ;;  %v1599_v40 = vld [vmem:[#allocation2 + $0x331] sm:$0xff] }
 0x2c3   :  { %1533 = vst.msk [vmem:[#allocation3 + $0x1e0] sm:$0xff] %vm1472_vm4, %v1401_v45 }
 0x2c6   :  { %1733 = vrot.lane.b32.xlu1 %v1571_v53, %s4293_s0 }
 0x2c7   :  { %1737 = vrot.lane.b32.xlu0 %v1573_v56, %s4293_s0 }
 0x2c8   :  { %v1393_v34 = vpop.permute.xlu1 %1392  ;;  %1729 = vrot.lane.b32.xlu2 %v1569_v55, %s4293_s0  ;;  %v1925_v55 = vld [vmem:[#allocation2 + $0x3a] sm:$0xff] }
 0x2c9   :  { %1529 = vst.msk [vmem:[#allocation3 + $0x1c0] sm:$0xff] %vm1472_vm4, %v1393_v34  ;;  %v1397_v63 = vpop.permute.xlu0 %1396  ;;  %v1927_v34 = vld [vmem:[#allocation2 + $0x52] sm:$0xff] }
 0x2ca   :  { %1531 = vst.msk [vmem:[#allocation3 + $0x1d0] sm:$0xff] %vm1472_vm4, %v1397_v63  ;;  %v1407_v57 = vpop.permute.xlu2 %1406  ;;  %v1923_v63 = vld [vmem:[#allocation2 + $0x22] sm:$0xff] }
 0x2cb   :  { %1536 = vst.msk [vmem:[#allocation3 + $0x1f8] sm:$0xff] %vm1472_vm4, %v1407_v57 }
 0x2ce   :  { %1739 = vrot.lane.b32.xlu1 %v1574_v3, %s4293_s0 }
 0x2cf   :  { %1743 = vrot.lane.b32.xlu0 %v1576_v44, %s4293_s0 }
 0x2d0   :  { %v1399_v2 = vpop.permute.xlu1 %1398  ;;  %1735 = vrot.lane.b32.xlu2 %v1572_v10, %s4293_s0  ;;  %v1928_v10 = vld [vmem:[#allocation2 + $0x62] sm:$0xff] }
 0x2d1   :  { %1532 = vst.msk [vmem:[#allocation3 + $0x1d8] sm:$0xff] %vm1472_vm4, %v1399_v2  ;;  %v1403_v14 = vpop.permute.xlu0 %1402  ;;  %v1930_v2 = vld [vmem:[#allocation2 + $0x7a] sm:$0xff] }
 0x2d2   :  { %1534 = vst.msk [vmem:[#allocation3 + $0x1e8] sm:$0xff] %vm1472_vm4, %v1403_v14  ;;  %v1670_v54 = vpop.permute.xlu2 %1669  ;;  %v1926_v14 = vld [vmem:[#allocation2 + $0x4a] sm:$0xff] }
 0x2d3   :  { %1860 = vst.msk [vmem:[#allocation3 + $0x10] sm:$0xff] %vm1857_vm5, %v1670_v54 }
 0x2d6   :  { %1745 = vrot.lane.b32.xlu1 %v1577_v21, %s4293_s0 }
 0x2d7   :  { %1749 = vrot.lane.b32.xlu0 %v1579_v25, %s4293_s0 }
 0x2d8   :  { %v1405_v31 = vpop.permute.xlu1 %1404  ;;  %1741 = vrot.lane.b32.xlu2 %v1575_v0, %s4293_s0  ;;  %v1931_v0 = vld [vmem:[#allocation2 + $0x82] sm:$0xff] }
 0x2d9   :  { %1535 = vst.msk [vmem:[#allocation3 + $0x1f0] sm:$0xff] %vm1472_vm4, %v1405_v31  ;;  %v1666_v38 = vpop.permute.xlu0 %1665  ;;  %v1933_v31 = vld [vmem:[#allocation2 + $0x9a] sm:$0xff] }
 0x2da   :  { %1858 = vst.msk [vmem:[#allocation3] sm:$0xff] %vm1857_vm5, %v1666_v38  ;;  %v1676_v11 = vpop.permute.xlu2 %1675  ;;  %v1929_v38 = vld [vmem:[#allocation2 + $0x6a] sm:$0xff] }
 0x2db   :  { %1863 = vst.msk [vmem:[#allocation3 + $0x28] sm:$0xff] %vm1857_vm5, %v1676_v11 }
 0x2de   :  { %1751 = vrot.lane.b32.xlu1 %v1580_v46, %s4293_s0 }
 0x2df   :  { %1755 = vrot.lane.b32.xlu0 %v1582_v26, %s4293_s0 }
 0x2e0   :  { %v1668_v22 = vpop.permute.xlu1 %1667  ;;  %1747 = vrot.lane.b32.xlu2 %v1578_v50, %s4293_s0  ;;  %v1934_v50 = vld [vmem:[#allocation2 + $0xaa] sm:$0xff] }
 0x2e1   :  { %1859 = vst.msk [vmem:[#allocation3 + $0x8] sm:$0xff] %vm1857_vm5, %v1668_v22  ;;  %v1672_v58 = vpop.permute.xlu0 %1671  ;;  %v1936_v22 = vld [vmem:[#allocation2 + $0xc2] sm:$0xff] }
 0x2e2   :  { %1861 = vst.msk [vmem:[#allocation3 + $0x18] sm:$0xff] %vm1857_vm5, %v1672_v58  ;;  %v1682_v8 = vpop.permute.xlu2 %1681  ;;  %v1932_v58 = vld [vmem:[#allocation2 + $0x92] sm:$0xff] }
 0x2e3   :  { %1866 = vst.msk [vmem:[#allocation3 + $0x40] sm:$0xff] %vm1857_vm5, %v1682_v8 }
 0x2e6   :  { %1757 = vrot.lane.b32.xlu1 %v1583_v62, %s4293_s0 }
 0x2e7   :  { %1761 = vrot.lane.b32.xlu0 %v1585_v32, %s4293_s0 }
 0x2e8   :  { %v1674_v12 = vpop.permute.xlu1 %1673  ;;  %1753 = vrot.lane.b32.xlu2 %v1581_v47, %s4293_s0  ;;  %v1937_v47 = vld [vmem:[#allocation2 + $0xca] sm:$0xff] }
 0x2e9   :  { %1862 = vst.msk [vmem:[#allocation3 + $0x20] sm:$0xff] %vm1857_vm5, %v1674_v12  ;;  %v1678_v18 = vpop.permute.xlu0 %1677  ;;  %v1939_v12 = vld [vmem:[#allocation2 + $0xe2] sm:$0xff] }
 0x2ea   :  { %1864 = vst.msk [vmem:[#allocation3 + $0x30] sm:$0xff] %vm1857_vm5, %v1678_v18  ;;  %v1688_v16 = vpop.permute.xlu2 %1687  ;;  %v1935_v18 = vld [vmem:[#allocation2 + $0xb2] sm:$0xff] }
 0x2eb   :  { %1869 = vst.msk [vmem:[#allocation3 + $0x58] sm:$0xff] %vm1857_vm5, %v1688_v16 }
 0x2ee   :  { %1763 = vrot.lane.b32.xlu1 %v1586_v24, %s4293_s0 }
 0x2ef   :  { %1767 = vrot.lane.b32.xlu0 %v1588_v59, %s4293_s0 }
 0x2f0   :  { %v1680_v41 = vpop.permute.xlu1 %1679  ;;  %1759 = vrot.lane.b32.xlu2 %v1584_v36, %s4293_s0  ;;  %v1940_v36 = vld [vmem:[#allocation2 + $0xf2] sm:$0xff] }
 0x2f1   :  { %1865 = vst.msk [vmem:[#allocation3 + $0x38] sm:$0xff] %vm1857_vm5, %v1680_v41  ;;  %v1684_v7 = vpop.permute.xlu0 %1683  ;;  %v1942_v41 = vld [vmem:[#allocation2 + $0x10a] sm:$0xff] }
 0x2f2   :  { %1867 = vst.msk [vmem:[#allocation3 + $0x48] sm:$0xff] %vm1857_vm5, %v1684_v7  ;;  %v1694_v51 = vpop.permute.xlu2 %1693  ;;  %v1938_v7 = vld [vmem:[#allocation2 + $0xda] sm:$0xff] }
 0x2f3   :  { %1872 = vst.msk [vmem:[#allocation3 + $0x70] sm:$0xff] %vm1857_vm5, %v1694_v51 }
 0x2f6   :  { %1769 = vrot.lane.b32.xlu1 %v1589_v60, %s4293_s0 }
 0x2f7   :  { %1773 = vrot.lane.b32.xlu0 %v1591_v19, %s4293_s0 }
 0x2f8   :  { %v1686_v33 = vpop.permute.xlu1 %1685  ;;  %1765 = vrot.lane.b32.xlu2 %v1587_v5, %s4293_s0  ;;  %v1943_v5 = vld [vmem:[#allocation2 + $0x112] sm:$0xff] }
 0x2f9   :  { %1868 = vst.msk [vmem:[#allocation3 + $0x50] sm:$0xff] %vm1857_vm5, %v1686_v33  ;;  %v1690_v37 = vpop.permute.xlu0 %1689  ;;  %v1945_v33 = vld [vmem:[#allocation2 + $0x12a] sm:$0xff] }
 0x2fa   :  { %1870 = vst.msk [vmem:[#allocation3 + $0x60] sm:$0xff] %vm1857_vm5, %v1690_v37  ;;  %v1700_v13 = vpop.permute.xlu2 %1699  ;;  %v1941_v37 = vld [vmem:[#allocation2 + $0xfa] sm:$0xff] }
 0x2fb   :  { %1875 = vst.msk [vmem:[#allocation3 + $0x88] sm:$0xff] %vm1857_vm5, %v1700_v13 }
 0x2fe   :  { %1775 = vrot.lane.b32.xlu1 %v1592_v23, %s4293_s0 }
 0x2ff   :  { %1779 = vrot.lane.b32.xlu0 %v1594_v30, %s4293_s0 }
 0x300   :  { %v1692_v48 = vpop.permute.xlu1 %1691  ;;  %1771 = vrot.lane.b32.xlu2 %v1590_v52, %s4293_s0  ;;  %v1946_v52 = vld [vmem:[#allocation2 + $0x13a] sm:$0xff] }
 0x301   :  { %1871 = vst.msk [vmem:[#allocation3 + $0x68] sm:$0xff] %vm1857_vm5, %v1692_v48  ;;  %v1696_v29 = vpop.permute.xlu0 %1695  ;;  %v1948_v48 = vld [vmem:[#allocation2 + $0x152] sm:$0xff] }
 0x302   :  { %1873 = vst.msk [vmem:[#allocation3 + $0x78] sm:$0xff] %vm1857_vm5, %v1696_v29  ;;  %v1706_v6 = vpop.permute.xlu2 %1705  ;;  %v1944_v29 = vld [vmem:[#allocation2 + $0x122] sm:$0xff] }
 0x303   :  { %1878 = vst.msk [vmem:[#allocation3 + $0xa0] sm:$0xff] %vm1857_vm5, %v1706_v6 }
 0x306   :  { %1781 = vrot.lane.b32.xlu1 %v1595_v61, %s4293_s0 }
 0x307   :  { %1785 = vrot.lane.b32.xlu0 %v1597_v9, %s4293_s0 }
 0x308   :  { %v1698_v27 = vpop.permute.xlu1 %1697  ;;  %1777 = vrot.lane.b32.xlu2 %v1593_v20, %s4293_s0  ;;  %v1949_v20 = vld [vmem:[#allocation2 + $0x15a] sm:$0xff] }
 0x309   :  { %1874 = vst.msk [vmem:[#allocation3 + $0x80] sm:$0xff] %vm1857_vm5, %v1698_v27  ;;  %v1702_v42 = vpop.permute.xlu0 %1701  ;;  %v1951_v27 = vld [vmem:[#allocation2 + $0x172] sm:$0xff] }
 0x30a   :  { %1876 = vst.msk [vmem:[#allocation3 + $0x90] sm:$0xff] %vm1857_vm5, %v1702_v42  ;;  %v1712_v1 = vpop.permute.xlu2 %1711  ;;  %v1947_v42 = vld [vmem:[#allocation2 + $0x142] sm:$0xff] }
 0x30b   :  { %1881 = vst.msk [vmem:[#allocation3 + $0xb8] sm:$0xff] %vm1857_vm5, %v1712_v1 }
 0x30e   :  { %1787 = vrot.lane.b32.xlu1 %v1598_v49, %s4293_s0 }
 0x30f   :  { %1791 = vrot.lane.b32.xlu0 %v1600_v17, %s4293_s0 }
 0x310   :  { %v1704_v35 = vpop.permute.xlu1 %1703  ;;  %1783 = vrot.lane.b32.xlu2 %v1596_v39, %s4293_s0  ;;  %v1952_v39 = vld [vmem:[#allocation2 + $0x182] sm:$0xff] }
 0x311   :  { %1877 = vst.msk [vmem:[#allocation3 + $0x98] sm:$0xff] %vm1857_vm5, %v1704_v35  ;;  %v1708_v28 = vpop.permute.xlu0 %1707  ;;  %v1954_v35 = vld [vmem:[#allocation2 + $0x1ca] sm:$0xff] }
 0x312   :  { %1879 = vst.msk [vmem:[#allocation3 + $0xa8] sm:$0xff] %vm1857_vm5, %v1708_v28  ;;  %v1718_v4 = vpop.permute.xlu2 %1717  ;;  %v1950_v28 = vld [vmem:[#allocation2 + $0x16a] sm:$0xff] }
 0x313   :  { %1884 = vst.msk [vmem:[#allocation3 + $0xd0] sm:$0xff] %vm1857_vm5, %v1718_v4 }
 0x316   :  { %2050 = vrot.lane.b32.xlu1 %v1922_v15, %s4294_s11 }
 0x317   :  { %2054 = vrot.lane.b32.xlu0 %v1924_v43, %s4294_s11 }
 0x318   :  { %v1710_v45 = vpop.permute.xlu1 %1709  ;;  %1789 = vrot.lane.b32.xlu2 %v1599_v40, %s4293_s0  ;;  %v1955_v40 = vld [vmem:[#allocation2 + $0x1d2] sm:$0xff] }
 0x319   :  { %1880 = vst.msk [vmem:[#allocation3 + $0xb0] sm:$0xff] %vm1857_vm5, %v1710_v45  ;;  %v1714_v53 = vpop.permute.xlu0 %1713  ;;  %v5616_v45 = vld [vmem:[#allocation2 + $0x1ea] sm:$0xff] }
 0x31a   :  { %1882 = vst.msk [vmem:[#allocation3 + $0xc0] sm:$0xff] %vm1857_vm5, %v1714_v53  ;;  %v1724_v56 = vpop.permute.xlu2 %1723  ;;  %v1953_v53 = vld [vmem:[#allocation2 + $0x18a] sm:$0xff] }
 0x31b   :  { %1887 = vst.msk [vmem:[#allocation3 + $0xe8] sm:$0xff] %vm1857_vm5, %v1724_v56 }
 0x31e   :  { %2056 = vrot.lane.b32.xlu1 %v1925_v55, %s4294_s11 }
 0x31f   :  { %2060 = vrot.lane.b32.xlu0 %v1927_v34, %s4294_s11 }
 0x320   :  { %v1716_v57 = vpop.permute.xlu1 %1715  ;;  %2052 = vrot.lane.b32.xlu2 %v1923_v63, %s4294_s11  ;;  %v5624_v63 = vld [vmem:[#allocation2 + $0x1fa] sm:$0xff] }
 0x321   :  { %1883 = vst.msk [vmem:[#allocation3 + $0xc8] sm:$0xff] %vm1857_vm5, %v1716_v57  ;;  %v1720_v3 = vpop.permute.xlu0 %1719  ;;  %v5627_v57 = vld [vmem:[#allocation2 + $0x212] sm:$0xff] }
 0x322   :  { %1885 = vst.msk [vmem:[#allocation3 + $0xd8] sm:$0xff] %vm1857_vm5, %v1720_v3  ;;  %v1730_v44 = vpop.permute.xlu2 %1729  ;;  %v5629_v3 = vld [vmem:[#allocation2 + $0x1e2] sm:$0xff] }
 0x323   :  { %1890 = vst.msk [vmem:[#allocation3 + $0x100] sm:$0xff] %vm1857_vm5, %v1730_v44 }
 0x326   :  { %2062 = vrot.lane.b32.xlu1 %v1928_v10, %s4294_s11 }
 0x327   :  { %2066 = vrot.lane.b32.xlu0 %v1930_v2, %s4294_s11 }
 0x328   :  { %v1722_v54 = vpop.permute.xlu1 %1721  ;;  %2058 = vrot.lane.b32.xlu2 %v1926_v14, %s4294_s11  ;;  %v5639_v14 = vld [vmem:[#allocation2 + $0x21a] sm:$0xff] }
 0x329   :  { %1886 = vst.msk [vmem:[#allocation3 + $0xe0] sm:$0xff] %vm1857_vm5, %v1722_v54  ;;  %v1726_v21 = vpop.permute.xlu0 %1725  ;;  %v1963_v54 = vld [vmem:[#allocation2 + $0x232] sm:$0xff] }
 0x32a   :  { %1888 = vst.msk [vmem:[#allocation3 + $0xf0] sm:$0xff] %vm1857_vm5, %v1726_v21  ;;  %v1736_v25 = vpop.permute.xlu2 %1735  ;;  %v5642_v21 = vld [vmem:[#allocation2 + $0x202] sm:$0xff] }
 0x32b   :  { %1893 = vst.msk [vmem:[#allocation3 + $0x118] sm:$0xff] %vm1857_vm5, %v1736_v25 }
 0x32e   :  { %2068 = vrot.lane.b32.xlu1 %v1931_v0, %s4294_s11 }
 0x32f   :  { %2072 = vrot.lane.b32.xlu0 %v1933_v31, %s4294_s11 }
 0x330   :  { %v1728_v11 = vpop.permute.xlu1 %1727  ;;  %2064 = vrot.lane.b32.xlu2 %v1929_v38, %s4294_s11  ;;  %v1964_v38 = vld [vmem:[#allocation2 + $0x242] sm:$0xff] }
 0x331   :  { %1889 = vst.msk [vmem:[#allocation3 + $0xf8] sm:$0xff] %vm1857_vm5, %v1728_v11  ;;  %v1732_v46 = vpop.permute.xlu0 %1731  ;;  %v1966_v11 = vld [vmem:[#allocation2 + $0x25a] sm:$0xff] }
 0x332   :  { %1891 = vst.msk [vmem:[#allocation3 + $0x108] sm:$0xff] %vm1857_vm5, %v1732_v46  ;;  %v1742_v26 = vpop.permute.xlu2 %1741  ;;  %v5652_v46 = vld [vmem:[#allocation2 + $0x22a] sm:$0xff] }
 0x333   :  { %1896 = vst.msk [vmem:[#allocation3 + $0x130] sm:$0xff] %vm1857_vm5, %v1742_v26 }
 0x336   :  { %2074 = vrot.lane.b32.xlu1 %v1934_v50, %s4294_s11 }
 0x337   :  { %2078 = vrot.lane.b32.xlu0 %v1936_v22, %s4294_s11 }
 0x338   :  { %v1734_v8 = vpop.permute.xlu1 %1733  ;;  %2070 = vrot.lane.b32.xlu2 %v1932_v58, %s4294_s11  ;;  %v1967_v58 = vld [vmem:[#allocation2 + $0x262] sm:$0xff] }
 0x339   :  { %1892 = vst.msk [vmem:[#allocation3 + $0x110] sm:$0xff] %vm1857_vm5, %v1734_v8  ;;  %v1738_v62 = vpop.permute.xlu0 %1737  ;;  %v1969_v8 = vld [vmem:[#allocation2 + $0x27a] sm:$0xff] }
 0x33a   :  { %1894 = vst.msk [vmem:[#allocation3 + $0x120] sm:$0xff] %vm1857_vm5, %v1738_v62  ;;  %v1748_v32 = vpop.permute.xlu2 %1747  ;;  %v1965_v62 = vld [vmem:[#allocation2 + $0x24a] sm:$0xff] }
 0x33b   :  { %1899 = vst.msk [vmem:[#allocation3 + $0x148] sm:$0xff] %vm1857_vm5, %v1748_v32 }
 0x33e   :  { %2080 = vrot.lane.b32.xlu1 %v1937_v47, %s4294_s11 }
 0x33f   :  { %2084 = vrot.lane.b32.xlu0 %v1939_v12, %s4294_s11 }
 0x340   :  { %v1740_v16 = vpop.permute.xlu1 %1739  ;;  %2076 = vrot.lane.b32.xlu2 %v1935_v18, %s4294_s11  ;;  %v1970_v18 = vld [vmem:[#allocation2 + $0x28a] sm:$0xff] }
 0x341   :  { %1895 = vst.msk [vmem:[#allocation3 + $0x128] sm:$0xff] %vm1857_vm5, %v1740_v16  ;;  %v1744_v24 = vpop.permute.xlu0 %1743  ;;  %v5667_v16 = vld [vmem:[#allocation2 + $0x2a2] sm:$0xff] }
 0x342   :  { %1897 = vst.msk [vmem:[#allocation3 + $0x138] sm:$0xff] %vm1857_vm5, %v1744_v24  ;;  %v1754_v59 = vpop.permute.xlu2 %1753  ;;  %v1968_v24 = vld [vmem:[#allocation2 + $0x272] sm:$0xff] }
 0x343   :  { %1902 = vst.msk [vmem:[#allocation3 + $0x160] sm:$0xff] %vm1857_vm5, %v1754_v59 }
 0x346   :  { %2086 = vrot.lane.b32.xlu1 %v1940_v36, %s4294_s11 }
 0x347   :  { %2090 = vrot.lane.b32.xlu0 %v1942_v41, %s4294_s11 }
 0x348   :  { %v1746_v51 = vpop.permute.xlu1 %1745  ;;  %2082 = vrot.lane.b32.xlu2 %v1938_v7, %s4294_s11  ;;  %v5675_v7 = vld [vmem:[#allocation2 + $0x2aa] sm:$0xff] }
 0x349   :  { %1898 = vst.msk [vmem:[#allocation3 + $0x140] sm:$0xff] %vm1857_vm5, %v1746_v51  ;;  %v1750_v60 = vpop.permute.xlu0 %1749  ;;  %v1975_v51 = vld [vmem:[#allocation2 + $0x2c2] sm:$0xff] }
 0x34a   :  { %1900 = vst.msk [vmem:[#allocation3 + $0x150] sm:$0xff] %vm1857_vm5, %v1750_v60  ;;  %v1760_v19 = vpop.permute.xlu2 %1759  ;;  %v1971_v60 = vld [vmem:[#allocation2 + $0x292] sm:$0xff] }
 0x34b   :  { %1905 = vst.msk [vmem:[#allocation3 + $0x178] sm:$0xff] %vm1857_vm5, %v1760_v19 }
 0x34e   :  { %2092 = vrot.lane.b32.xlu1 %v1943_v5, %s4294_s11 }
 0x34f   :  { %2096 = vrot.lane.b32.xlu0 %v1945_v33, %s4294_s11 }
 0x350   :  { %v1752_v13 = vpop.permute.xlu1 %1751  ;;  %2088 = vrot.lane.b32.xlu2 %v1941_v37, %s4294_s11  ;;  %v1976_v37 = vld [vmem:[#allocation2 + $0x2d2] sm:$0xff] }
 0x351   :  { %1901 = vst.msk [vmem:[#allocation3 + $0x158] sm:$0xff] %vm1857_vm5, %v1752_v13  ;;  %v1756_v23 = vpop.permute.xlu0 %1755  ;;  %v1978_v13 = vld [vmem:[#allocation2 + $0x2ea] sm:$0xff] }
 0x352   :  { %1903 = vst.msk [vmem:[#allocation3 + $0x168] sm:$0xff] %vm1857_vm5, %v1756_v23  ;;  %v1766_v30 = vpop.permute.xlu2 %1765  ;;  %v5685_v23 = vld [vmem:[#allocation2 + $0x2ba] sm:$0xff] }
 0x353   :  { %1908 = vst.msk [vmem:[#allocation3 + $0x190] sm:$0xff] %vm1857_vm5, %v1766_v30 }
 0x356   :  { %2098 = vrot.lane.b32.xlu1 %v1946_v52, %s4294_s11 }
 0x357   :  { %2102 = vrot.lane.b32.xlu0 %v1948_v48, %s4294_s11 }
 0x358   :  { %v1758_v6 = vpop.permute.xlu1 %1757  ;;  %2094 = vrot.lane.b32.xlu2 %v1944_v29, %s4294_s11  ;;  %v1979_v29 = vld [vmem:[#allocation2 + $0x2f2] sm:$0xff] }
 0x359   :  { %1904 = vst.msk [vmem:[#allocation3 + $0x170] sm:$0xff] %vm1857_vm5, %v1758_v6  ;;  %v1762_v61 = vpop.permute.xlu0 %1761  ;;  %v1981_v6 = vld [vmem:[#allocation2 + $0x30a] sm:$0xff] }
 0x35a   :  { %1906 = vst.msk [vmem:[#allocation3 + $0x180] sm:$0xff] %vm1857_vm5, %v1762_v61  ;;  %v1772_v9 = vpop.permute.xlu2 %1771  ;;  %v1977_v61 = vld [vmem:[#allocation2 + $0x2da] sm:$0xff] }
 0x35b   :  { %1911 = vst.msk [vmem:[#allocation3 + $0x1a8] sm:$0xff] %vm1857_vm5, %v1772_v9 }
 0x35e   :  { %2104 = vrot.lane.b32.xlu1 %v1949_v20, %s4294_s11 }
 0x35f   :  { %2108 = vrot.lane.b32.xlu0 %v1951_v27, %s4294_s11 }
 0x360   :  { %v1764_v1 = vpop.permute.xlu1 %1763  ;;  %2100 = vrot.lane.b32.xlu2 %v1947_v42, %s4294_s11  ;;  %v1982_v42 = vld [vmem:[#allocation2 + $0x31a] sm:$0xff] }
 0x361   :  { %1907 = vst.msk [vmem:[#allocation3 + $0x188] sm:$0xff] %vm1857_vm5, %v1764_v1  ;;  %v1768_v49 = vpop.permute.xlu0 %1767  ;;  %v1984_v1 = vld [vmem:[#allocation2 + $0x332] sm:$0xff] }
 0x362   :  { %1909 = vst.msk [vmem:[#allocation3 + $0x198] sm:$0xff] %vm1857_vm5, %v1768_v49  ;;  %v1778_v17 = vpop.permute.xlu2 %1777  ;;  %v1980_v49 = vld [vmem:[#allocation2 + $0x302] sm:$0xff] }
 0x363   :  { %1914 = vst.msk [vmem:[#allocation3 + $0x1c0] sm:$0xff] %vm1857_vm5, %v1778_v17 }
 0x366   :  { %2110 = vrot.lane.b32.xlu1 %v1952_v39, %s4294_s11 }
 0x367   :  { %2114 = vrot.lane.b32.xlu0 %v1954_v35, %s4294_s11 }
 0x368   :  { %v1770_v4 = vpop.permute.xlu1 %1769  ;;  %2106 = vrot.lane.b32.xlu2 %v1950_v28, %s4294_s11  ;;  %v1985_v28 = vld [vmem:[#allocation2 + $0x33a] sm:$0xff] }
 0x369   :  { %1910 = vst.msk [vmem:[#allocation3 + $0x1a0] sm:$0xff] %vm1857_vm5, %v1770_v4  ;;  %v1774_v15 = vpop.permute.xlu0 %1773  ;;  %v2309_v4 = vld [vmem:[#allocation2 + $0x38] sm:$0xff] }
 0x36a   :  { %1912 = vst.msk [vmem:[#allocation3 + $0x1b0] sm:$0xff] %vm1857_vm5, %v1774_v15  ;;  %v1784_v43 = vpop.permute.xlu2 %1783  ;;  %v1983_v15 = vld [vmem:[#allocation2 + $0x322] sm:$0xff] }
 0x36b   :  { %1917 = vst.msk [vmem:[#allocation3 + $0x1d8] sm:$0xff] %vm1857_vm5, %v1784_v43 }
 0x36e   :  { %2116 = vrot.lane.b32.xlu1 %v1955_v40, %s4294_s11 }
 0x36f   :  { %2120 = vrot.lane.b32.xlu0 %v5616_v45, %s4294_s11 }
 0x370   :  { %v1776_v56 = vpop.permute.xlu1 %1775  ;;  %2112 = vrot.lane.b32.xlu2 %v1953_v53, %s4294_s11 }
 0x371   :  { %1913 = vst.msk [vmem:[#allocation3 + $0x1b8] sm:$0xff] %vm1857_vm5, %v1776_v56  ;;  %v1780_v55 = vpop.permute.xlu0 %1779  ;;  %v2310_v56 = vld [vmem:[#allocation2 + $0x48] sm:$0xff] }
 0x372   :  { %1915 = vst.msk [vmem:[#allocation3 + $0x1c8] sm:$0xff] %vm1857_vm5, %v1780_v55  ;;  %v1790_v34 = vpop.permute.xlu2 %1789  ;;  %v2312_v55 = vld [vmem:[#allocation2 + $0x60] sm:$0xff] }
 0x373   :  { %1920 = vst.msk [vmem:[#allocation3 + $0x1f0] sm:$0xff] %vm1857_vm5, %v1790_v34  ;;  %v2308_v34 = vld [vmem:[#allocation2 + $0x30] sm:$0xff] }
 0x376   :  { %2122 = vrot.lane.b32.xlu1 %v5624_v63, %s4294_s11 }
 0x377   :  { %2126 = vrot.lane.b32.xlu0 %v5627_v57, %s4294_s11 }
 0x378   :  { %v1782_v44 = vpop.permute.xlu1 %1781  ;;  %2118 = vrot.lane.b32.xlu2 %v5629_v3, %s4294_s11 }
 0x379   :  { %1916 = vst.msk [vmem:[#allocation3 + $0x1d0] sm:$0xff] %vm1857_vm5, %v1782_v44  ;;  %v1786_v10 = vpop.permute.xlu0 %1785 }
 0x37a   :  { %1918 = vst.msk [vmem:[#allocation3 + $0x1e0] sm:$0xff] %vm1857_vm5, %v1786_v10  ;;  %v2053_v2 = vpop.permute.xlu2 %2052 }
 0x37b   :  { %2244 = vst.msk [vmem:[#allocation3 + $0x8] sm:$0xff] %vm2242_vm6, %v2053_v2 }
 0x37e   :  { %2128 = vrot.lane.b32.xlu1 %v5639_v14, %s4294_s11 }
 0x37f   :  { %2132 = vrot.lane.b32.xlu0 %v1963_v54, %s4294_s11  ;;  %v2313_v54 = vld [vmem:[#allocation2 + $0x68] sm:$0xff] }
 0x380   :  { %v1788_v25 = vpop.permute.xlu1 %1787  ;;  %2124 = vrot.lane.b32.xlu2 %v5642_v21, %s4294_s11 }
 0x381   :  { %1919 = vst.msk [vmem:[#allocation3 + $0x1e8] sm:$0xff] %vm1857_vm5, %v1788_v25  ;;  %v1792_v0 = vpop.permute.xlu0 %1791  ;;  %v2315_v25 = vld [vmem:[#allocation2 + $0x80] sm:$0xff] }
 0x382   :  { %1921 = vst.msk [vmem:[#allocation3 + $0x1f8] sm:$0xff] %vm1857_vm5, %v1792_v0  ;;  %v2059_v31 = vpop.permute.xlu2 %2058  ;;  %v2311_v0 = vld [vmem:[#allocation2 + $0x50] sm:$0xff] }
 0x383   :  { %2247 = vst.msk [vmem:[#allocation3 + $0x20] sm:$0xff] %vm2242_vm6, %v2059_v31 }
 0x386   :  { %2134 = vrot.lane.b32.xlu1 %v1964_v38, %s4294_s11 }
 0x387   :  { %2138 = vrot.lane.b32.xlu0 %v1966_v11, %s4294_s11 }
 0x388   :  { %v2051_v26 = vpop.permute.xlu1 %2050  ;;  %2130 = vrot.lane.b32.xlu2 %v5652_v46, %s4294_s11 }
 0x389   :  { %2243 = vst.msk [vmem:[#allocation3] sm:$0xff] %vm2242_vm6, %v2051_v26  ;;  %v2055_v50 = vpop.permute.xlu0 %2054  ;;  %v2316_v26 = vld [vmem:[#allocation2 + $0x90] sm:$0xff] }
 0x38a   :  { %2245 = vst.msk [vmem:[#allocation3 + $0x10] sm:$0xff] %vm2242_vm6, %v2055_v50  ;;  %v2065_v22 = vpop.permute.xlu2 %2064  ;;  %v2318_v50 = vld [vmem:[#allocation2 + $0xa8] sm:$0xff] }
 0x38b   :  { %2250 = vst.msk [vmem:[#allocation3 + $0x38] sm:$0xff] %vm2242_vm6, %v2065_v22  ;;  %v2314_v22 = vld [vmem:[#allocation2 + $0x78] sm:$0xff] }
 0x38e   :  { %2140 = vrot.lane.b32.xlu1 %v1967_v58, %s4294_s11 }
 0x38f   :  { %2144 = vrot.lane.b32.xlu0 %v1969_v8, %s4294_s11 }
 0x390   :  { %v2057_v32 = vpop.permute.xlu1 %2056  ;;  %2136 = vrot.lane.b32.xlu2 %v1965_v62, %s4294_s11 }
 0x391   :  { %2246 = vst.msk [vmem:[#allocation3 + $0x18] sm:$0xff] %vm2242_vm6, %v2057_v32  ;;  %v2061_v47 = vpop.permute.xlu0 %2060  ;;  %v2319_v32 = vld [vmem:[#allocation2 + $0xb0] sm:$0xff] }
 0x392   :  { %2248 = vst.msk [vmem:[#allocation3 + $0x28] sm:$0xff] %vm2242_vm6, %v2061_v47  ;;  %v2071_v12 = vpop.permute.xlu2 %2070  ;;  %v2321_v47 = vld [vmem:[#allocation2 + $0xc8] sm:$0xff] }
 0x393   :  { %2253 = vst.msk [vmem:[#allocation3 + $0x50] sm:$0xff] %vm2242_vm6, %v2071_v12  ;;  %v2317_v12 = vld [vmem:[#allocation2 + $0x98] sm:$0xff] }
 0x396   :  { %2146 = vrot.lane.b32.xlu1 %v1970_v18, %s4294_s11 }
 0x397   :  { %2150 = vrot.lane.b32.xlu0 %v5667_v16, %s4294_s11 }
 0x398   :  { %v2063_v59 = vpop.permute.xlu1 %2062  ;;  %2142 = vrot.lane.b32.xlu2 %v1968_v24, %s4294_s11 }
 0x399   :  { %2249 = vst.msk [vmem:[#allocation3 + $0x30] sm:$0xff] %vm2242_vm6, %v2063_v59  ;;  %v2067_v36 = vpop.permute.xlu0 %2066 }
 0x39a   :  { %2251 = vst.msk [vmem:[#allocation3 + $0x40] sm:$0xff] %vm2242_vm6, %v2067_v36  ;;  %v2077_v41 = vpop.permute.xlu2 %2076  ;;  %v2322_v36 = vld [vmem:[#allocation2 + $0xd8] sm:$0xff] }
 0x39b   :  { %2256 = vst.msk [vmem:[#allocation3 + $0x68] sm:$0xff] %vm2242_vm6, %v2077_v41  ;;  %v2324_v41 = vld [vmem:[#allocation2 + $0xf0] sm:$0xff] }
 0x39e   :  { %2152 = vrot.lane.b32.xlu1 %v5675_v7, %s4294_s11 }
 0x39f   :  { %2156 = vrot.lane.b32.xlu0 %v1975_v51, %s4294_s11  ;;  %v2320_v51 = vld [vmem:[#allocation2 + $0xc0] sm:$0xff] }
 0x3a0   :  { %v2069_v19 = vpop.permute.xlu1 %2068  ;;  %2148 = vrot.lane.b32.xlu2 %v1971_v60, %s4294_s11 }
 0x3a1   :  { %2252 = vst.msk [vmem:[#allocation3 + $0x48] sm:$0xff] %vm2242_vm6, %v2069_v19  ;;  %v2073_v5 = vpop.permute.xlu0 %2072 }
 0x3a2   :  { %2254 = vst.msk [vmem:[#allocation3 + $0x58] sm:$0xff] %vm2242_vm6, %v2073_v5  ;;  %v2083_v33 = vpop.permute.xlu2 %2082 }
 0x3a3   :  { %2259 = vst.msk [vmem:[#allocation3 + $0x80] sm:$0xff] %vm2242_vm6, %v2083_v33  ;;  %v2325_v33 = vld [vmem:[#allocation2 + $0xf8] sm:$0xff] }
 0x3a6   :  { %2158 = vrot.lane.b32.xlu1 %v1976_v37, %s4294_s11  ;;  %v2327_v37 = vld [vmem:[#allocation2 + $0x110] sm:$0xff] }
 0x3a7   :  { %2162 = vrot.lane.b32.xlu0 %v1978_v13, %s4294_s11  ;;  %v2323_v13 = vld [vmem:[#allocation2 + $0xe0] sm:$0xff] }
 0x3a8   :  { %v2075_v30 = vpop.permute.xlu1 %2074  ;;  %2154 = vrot.lane.b32.xlu2 %v5685_v23, %s4294_s11 }
 0x3a9   :  { %2255 = vst.msk [vmem:[#allocation3 + $0x60] sm:$0xff] %vm2242_vm6, %v2075_v30  ;;  %v2079_v52 = vpop.permute.xlu0 %2078 }
 0x3aa   :  { %2257 = vst.msk [vmem:[#allocation3 + $0x70] sm:$0xff] %vm2242_vm6, %v2079_v52  ;;  %v2089_v48 = vpop.permute.xlu2 %2088 }
 0x3ab   :  { %2262 = vst.msk [vmem:[#allocation3 + $0x98] sm:$0xff] %vm2242_vm6, %v2089_v48 }
 0x3ae   :  { %2164 = vrot.lane.b32.xlu1 %v1979_v29, %s4294_s11  ;;  %v2328_v29 = vld [vmem:[#allocation2 + $0x120] sm:$0xff] }
 0x3af   :  { %2168 = vrot.lane.b32.xlu0 %v1981_v6, %s4294_s11  ;;  %v2330_v6 = vld [vmem:[#allocation2 + $0x138] sm:$0xff] }
 0x3b0   :  { %v2081_v9 = vpop.permute.xlu1 %2080  ;;  %2160 = vrot.lane.b32.xlu2 %v1977_v61, %s4294_s11  ;;  %v2326_v61 = vld [vmem:[#allocation2 + $0x108] sm:$0xff] }
 0x3b1   :  { %2258 = vst.msk [vmem:[#allocation3 + $0x78] sm:$0xff] %vm2242_vm6, %v2081_v9  ;;  %v2085_v20 = vpop.permute.xlu0 %2084 }
 0x3b2   :  { %2260 = vst.msk [vmem:[#allocation3 + $0x88] sm:$0xff] %vm2242_vm6, %v2085_v20  ;;  %v2095_v27 = vpop.permute.xlu2 %2094 }
 0x3b3   :  { %2265 = vst.msk [vmem:[#allocation3 + $0xb0] sm:$0xff] %vm2242_vm6, %v2095_v27 }
 0x3b6   :  { %2170 = vrot.lane.b32.xlu1 %v1982_v42, %s4294_s11  ;;  %v2331_v42 = vld [vmem:[#allocation2 + $0x140] sm:$0xff] }
 0x3b7   :  { %2174 = vrot.lane.b32.xlu0 %v1984_v1, %s4294_s11  ;;  %v2333_v1 = vld [vmem:[#allocation2 + $0x158] sm:$0xff] }
 0x3b8   :  { %v2087_v17 = vpop.permute.xlu1 %2086  ;;  %2166 = vrot.lane.b32.xlu2 %v1980_v49, %s4294_s11  ;;  %v2329_v49 = vld [vmem:[#allocation2 + $0x128] sm:$0xff] }
 0x3b9   :  { %2261 = vst.msk [vmem:[#allocation3 + $0x90] sm:$0xff] %vm2242_vm6, %v2087_v17  ;;  %v2091_v39 = vpop.permute.xlu0 %2090 }
 0x3ba   :  { %2263 = vst.msk [vmem:[#allocation3 + $0xa0] sm:$0xff] %vm2242_vm6, %v2091_v39  ;;  %v2101_v35 = vpop.permute.xlu2 %2100 }
 0x3bb   :  { %2268 = vst.msk [vmem:[#allocation3 + $0xc8] sm:$0xff] %vm2242_vm6, %v2101_v35 }
 0x3be   :  { %2176 = vrot.lane.b32.xlu1 %v1985_v28, %s4294_s11  ;;  %v2334_v28 = vld [vmem:[#allocation2 + $0x168] sm:$0xff] }
 0x3bf   :  { %2438 = vrot.lane.b32.xlu0 %v2309_v4, %s4295_s13  ;;  %v2336_v4 = vld [vmem:[#allocation2 + $0x180] sm:$0xff] }
 0x3c0   :  { %v2093_v43 = vpop.permute.xlu1 %2092  ;;  %2172 = vrot.lane.b32.xlu2 %v1983_v15, %s4294_s11  ;;  %v2332_v15 = vld [vmem:[#allocation2 + $0x150] sm:$0xff] }
 0x3c1   :  { %2264 = vst.msk [vmem:[#allocation3 + $0xa8] sm:$0xff] %vm2242_vm6, %v2093_v43  ;;  %v2097_v40 = vpop.permute.xlu0 %2096 }
 0x3c2   :  { %2266 = vst.msk [vmem:[#allocation3 + $0xb8] sm:$0xff] %vm2242_vm6, %v2097_v40  ;;  %v2107_v53 = vpop.permute.xlu2 %2106 }
 0x3c3   :  { %2271 = vst.msk [vmem:[#allocation3 + $0xe0] sm:$0xff] %vm2242_vm6, %v2107_v53 }
 0x3c6   :  { %2440 = vrot.lane.b32.xlu1 %v2310_v56, %s4295_s13  ;;  %v2337_v56 = vld [vmem:[#allocation2 + $0x188] sm:$0xff] }
 0x3c7   :  { %2444 = vrot.lane.b32.xlu0 %v2312_v55, %s4295_s13  ;;  %v2339_v55 = vld [vmem:[#allocation2 + $0x1a0] sm:$0xff] }
 0x3c8   :  { %v2099_v44 = vpop.permute.xlu1 %2098  ;;  %2436 = vrot.lane.b32.xlu2 %v2308_v34, %s4295_s13  ;;  %v2335_v34 = vld [vmem:[#allocation2 + $0x170] sm:$0xff] }
 0x3c9   :  { %2267 = vst.msk [vmem:[#allocation3 + $0xc0] sm:$0xff] %vm2242_vm6, %v2099_v44  ;;  %v2103_v10 = vpop.permute.xlu0 %2102 }
 0x3ca   :  { %2269 = vst.msk [vmem:[#allocation3 + $0xd0] sm:$0xff] %vm2242_vm6, %v2103_v10  ;;  %v2113_v2 = vpop.permute.xlu2 %2112 }
 0x3cb   :  { %2274 = vst.msk [vmem:[#allocation3 + $0xf8] sm:$0xff] %vm2242_vm6, %v2113_v2 }
 0x3ce   :  { %2446 = vrot.lane.b32.xlu1 %v2313_v54, %s4295_s13  ;;  %v2340_v54 = vld [vmem:[#allocation2 + $0x1e0] sm:$0xff] }
 0x3cf   :  { %2450 = vrot.lane.b32.xlu0 %v2315_v25, %s4295_s13  ;;  %v2342_v25 = vld [vmem:[#allocation2 + $0x1f8] sm:$0xff] }
 0x3d0   :  { %v2105_v31 = vpop.permute.xlu1 %2104  ;;  %2442 = vrot.lane.b32.xlu2 %v2311_v0, %s4295_s13  ;;  %v2338_v0 = vld [vmem:[#allocation2 + $0x198] sm:$0xff] }
 0x3d1   :  { %2270 = vst.msk [vmem:[#allocation3 + $0xd8] sm:$0xff] %vm2242_vm6, %v2105_v31  ;;  %v2109_v38 = vpop.permute.xlu0 %2108 }
 0x3d2   :  { %2272 = vst.msk [vmem:[#allocation3 + $0xe8] sm:$0xff] %vm2242_vm6, %v2109_v38  ;;  %v2119_v11 = vpop.permute.xlu2 %2118 }
 0x3d3   :  { %2277 = vst.msk [vmem:[#allocation3 + $0x110] sm:$0xff] %vm2242_vm6, %v2119_v11 }
 0x3d6   :  { %2452 = vrot.lane.b32.xlu1 %v2316_v26, %s4295_s13  ;;  %v2343_v26 = vld [vmem:[#allocation2 + $0x200] sm:$0xff] }
 0x3d7   :  { %2456 = vrot.lane.b32.xlu0 %v2318_v50, %s4295_s13  ;;  %v2345_v50 = vld [vmem:[#allocation2 + $0x218] sm:$0xff] }
 0x3d8   :  { %v2111_v58 = vpop.permute.xlu1 %2110  ;;  %2448 = vrot.lane.b32.xlu2 %v2314_v22, %s4295_s13  ;;  %v2341_v22 = vld [vmem:[#allocation2 + $0x1e8] sm:$0xff] }
 0x3d9   :  { %2273 = vst.msk [vmem:[#allocation3 + $0xf0] sm:$0xff] %vm2242_vm6, %v2111_v58  ;;  %v2115_v8 = vpop.permute.xlu0 %2114 }
 0x3da   :  { %2275 = vst.msk [vmem:[#allocation3 + $0x100] sm:$0xff] %vm2242_vm6, %v2115_v8  ;;  %v2125_v62 = vpop.permute.xlu2 %2124 }
 0x3db   :  { %2280 = vst.msk [vmem:[#allocation3 + $0x128] sm:$0xff] %vm2242_vm6, %v2125_v62 }
 0x3de   :  { %2458 = vrot.lane.b32.xlu1 %v2319_v32, %s4295_s13  ;;  %v2346_v32 = vld [vmem:[#allocation2 + $0x228] sm:$0xff] }
 0x3df   :  { %2462 = vrot.lane.b32.xlu0 %v2321_v47, %s4295_s13  ;;  %v2348_v47 = vld [vmem:[#allocation2 + $0x240] sm:$0xff] }
 0x3e0   :  { %v2117_v18 = vpop.permute.xlu1 %2116  ;;  %2454 = vrot.lane.b32.xlu2 %v2317_v12, %s4295_s13  ;;  %v2344_v12 = vld [vmem:[#allocation2 + $0x210] sm:$0xff] }
 0x3e1   :  { %2276 = vst.msk [vmem:[#allocation3 + $0x108] sm:$0xff] %vm2242_vm6, %v2117_v18  ;;  %v2121_v24 = vpop.permute.xlu0 %2120 }
 0x3e2   :  { %2278 = vst.msk [vmem:[#allocation3 + $0x118] sm:$0xff] %vm2242_vm6, %v2121_v24  ;;  %v2131_v59 = vpop.permute.xlu2 %2130 }
 0x3e3   :  { %2283 = vst.msk [vmem:[#allocation3 + $0x140] sm:$0xff] %vm2242_vm6, %v2131_v59 }
 0x3e6   :  { %2464 = vrot.lane.b32.xlu1 %v2322_v36, %s4295_s13  ;;  %v2349_v36 = vld [vmem:[#allocation2 + $0x248] sm:$0xff] }
 0x3e7   :  { %2468 = vrot.lane.b32.xlu0 %v2324_v41, %s4295_s13  ;;  %v2351_v41 = vld [vmem:[#allocation2 + $0x260] sm:$0xff] }
 0x3e8   :  { %v2123_v60 = vpop.permute.xlu1 %2122  ;;  %2460 = vrot.lane.b32.xlu2 %v2320_v51, %s4295_s13  ;;  %v2347_v51 = vld [vmem:[#allocation2 + $0x230] sm:$0xff] }
 0x3e9   :  { %2279 = vst.msk [vmem:[#allocation3 + $0x120] sm:$0xff] %vm2242_vm6, %v2123_v60  ;;  %v2127_v19 = vpop.permute.xlu0 %2126 }
 0x3ea   :  { %2281 = vst.msk [vmem:[#allocation3 + $0x130] sm:$0xff] %vm2242_vm6, %v2127_v19  ;;  %v2137_v5 = vpop.permute.xlu2 %2136 }
 0x3eb   :  { %2286 = vst.msk [vmem:[#allocation3 + $0x158] sm:$0xff] %vm2242_vm6, %v2137_v5 }
 0x3ee   :  { %2470 = vrot.lane.b32.xlu1 %v2325_v33, %s4295_s13  ;;  %v2352_v33 = vld [vmem:[#allocation2 + $0x270] sm:$0xff] }
 0x3ef   :  { %2474 = vrot.lane.b32.xlu0 %v2327_v37, %s4295_s13  ;;  %v2354_v37 = vld [vmem:[#allocation2 + $0x288] sm:$0xff] }
 0x3f0   :  { %v2129_v30 = vpop.permute.xlu1 %2128  ;;  %2466 = vrot.lane.b32.xlu2 %v2323_v13, %s4295_s13  ;;  %v2350_v13 = vld [vmem:[#allocation2 + $0x258] sm:$0xff] }
 0x3f1   :  { %2282 = vst.msk [vmem:[#allocation3 + $0x138] sm:$0xff] %vm2242_vm6, %v2129_v30  ;;  %v2133_v52 = vpop.permute.xlu0 %2132 }
 0x3f2   :  { %2284 = vst.msk [vmem:[#allocation3 + $0x148] sm:$0xff] %vm2242_vm6, %v2133_v52  ;;  %v2143_v48 = vpop.permute.xlu2 %2142 }
 0x3f3   :  { %2289 = vst.msk [vmem:[#allocation3 + $0x170] sm:$0xff] %vm2242_vm6, %v2143_v48 }
 0x3f6   :  { %2476 = vrot.lane.b32.xlu1 %v2328_v29, %s4295_s13  ;;  %v2355_v29 = vld [vmem:[#allocation2 + $0x290] sm:$0xff] }
 0x3f7   :  { %2480 = vrot.lane.b32.xlu0 %v2330_v6, %s4295_s13  ;;  %v2357_v6 = vld [vmem:[#allocation2 + $0x2a8] sm:$0xff] }
 0x3f8   :  { %v2135_v9 = vpop.permute.xlu1 %2134  ;;  %2472 = vrot.lane.b32.xlu2 %v2326_v61, %s4295_s13  ;;  %v2353_v61 = vld [vmem:[#allocation2 + $0x278] sm:$0xff] }
 0x3f9   :  { %2285 = vst.msk [vmem:[#allocation3 + $0x150] sm:$0xff] %vm2242_vm6, %v2135_v9  ;;  %v2139_v20 = vpop.permute.xlu0 %2138 }
 0x3fa   :  { %2287 = vst.msk [vmem:[#allocation3 + $0x160] sm:$0xff] %vm2242_vm6, %v2139_v20  ;;  %v2149_v27 = vpop.permute.xlu2 %2148 }
 0x3fb   :  { %2292 = vst.msk [vmem:[#allocation3 + $0x188] sm:$0xff] %vm2242_vm6, %v2149_v27 }
 0x3fe   :  { %2482 = vrot.lane.b32.xlu1 %v2331_v42, %s4295_s13  ;;  %v2358_v42 = vld [vmem:[#allocation2 + $0x2b8] sm:$0xff] }
 0x3ff   :  { %2486 = vrot.lane.b32.xlu0 %v2333_v1, %s4295_s13  ;;  %v2360_v1 = vld [vmem:[#allocation2 + $0x2d0] sm:$0xff] }
 0x400   :  { %v2141_v17 = vpop.permute.xlu1 %2140  ;;  %2478 = vrot.lane.b32.xlu2 %v2329_v49, %s4295_s13  ;;  %v2356_v49 = vld [vmem:[#allocation2 + $0x2a0] sm:$0xff] }
 0x401   :  { %2288 = vst.msk [vmem:[#allocation3 + $0x168] sm:$0xff] %vm2242_vm6, %v2141_v17  ;;  %v2145_v39 = vpop.permute.xlu0 %2144 }
 0x402   :  { %2290 = vst.msk [vmem:[#allocation3 + $0x178] sm:$0xff] %vm2242_vm6, %v2145_v39  ;;  %v2155_v35 = vpop.permute.xlu2 %2154 }
 0x403   :  { %2295 = vst.msk [vmem:[#allocation3 + $0x1a0] sm:$0xff] %vm2242_vm6, %v2155_v35 }
 0x406   :  { %2488 = vrot.lane.b32.xlu1 %v2334_v28, %s4295_s13  ;;  %v2361_v28 = vld [vmem:[#allocation2 + $0x2d8] sm:$0xff] }
 0x407   :  { %2492 = vrot.lane.b32.xlu0 %v2336_v4, %s4295_s13  ;;  %v2363_v4 = vld [vmem:[#allocation2 + $0x2f0] sm:$0xff] }
 0x408   :  { %v2147_v43 = vpop.permute.xlu1 %2146  ;;  %2484 = vrot.lane.b32.xlu2 %v2332_v15, %s4295_s13  ;;  %v2359_v15 = vld [vmem:[#allocation2 + $0x2c0] sm:$0xff] }
 0x409   :  { %2291 = vst.msk [vmem:[#allocation3 + $0x180] sm:$0xff] %vm2242_vm6, %v2147_v43  ;;  %v2151_v40 = vpop.permute.xlu0 %2150 }
 0x40a   :  { %2293 = vst.msk [vmem:[#allocation3 + $0x190] sm:$0xff] %vm2242_vm6, %v2151_v40  ;;  %v2161_v53 = vpop.permute.xlu2 %2160 }
 0x40b   :  { %2298 = vst.msk [vmem:[#allocation3 + $0x1b8] sm:$0xff] %vm2242_vm6, %v2161_v53 }
 0x40e   :  { %2494 = vrot.lane.b32.xlu1 %v2337_v56, %s4295_s13  ;;  %v2364_v56 = vld [vmem:[#allocation2 + $0x300] sm:$0xff] }
 0x40f   :  { %2498 = vrot.lane.b32.xlu0 %v2339_v55, %s4295_s13  ;;  %v2366_v55 = vld [vmem:[#allocation2 + $0x318] sm:$0xff] }
 0x410   :  { %v2153_v44 = vpop.permute.xlu1 %2152  ;;  %2490 = vrot.lane.b32.xlu2 %v2335_v34, %s4295_s13  ;;  %v2362_v34 = vld [vmem:[#allocation2 + $0x2e8] sm:$0xff] }
 0x411   :  { %2294 = vst.msk [vmem:[#allocation3 + $0x198] sm:$0xff] %vm2242_vm6, %v2153_v44  ;;  %v2157_v10 = vpop.permute.xlu0 %2156 }
 0x412   :  { %2296 = vst.msk [vmem:[#allocation3 + $0x1a8] sm:$0xff] %vm2242_vm6, %v2157_v10  ;;  %v2167_v2 = vpop.permute.xlu2 %2166 }
 0x413   :  { %2301 = vst.msk [vmem:[#allocation3 + $0x1d0] sm:$0xff] %vm2242_vm6, %v2167_v2 }
 0x416   :  { %2500 = vrot.lane.b32.xlu1 %v2340_v54, %s4295_s13  ;;  %v2367_v54 = vld [vmem:[#allocation2 + $0x320] sm:$0xff] }
 0x417   :  { %2504 = vrot.lane.b32.xlu0 %v2342_v25, %s4295_s13  ;;  %v2369_v25 = vld [vmem:[#allocation2 + $0x338] sm:$0xff] }
 0x418   :  { %v2159_v31 = vpop.permute.xlu1 %2158  ;;  %2496 = vrot.lane.b32.xlu2 %v2338_v0, %s4295_s13  ;;  %v2365_v0 = vld [vmem:[#allocation2 + $0x308] sm:$0xff] }
 0x419   :  { %2297 = vst.msk [vmem:[#allocation3 + $0x1b0] sm:$0xff] %vm2242_vm6, %v2159_v31  ;;  %v2163_v38 = vpop.permute.xlu0 %2162 }
 0x41a   :  { %2299 = vst.msk [vmem:[#allocation3 + $0x1c0] sm:$0xff] %vm2242_vm6, %v2163_v38  ;;  %v2173_v11 = vpop.permute.xlu2 %2172 }
 0x41b   :  { %2304 = vst.msk [vmem:[#allocation3 + $0x1e8] sm:$0xff] %vm2242_vm6, %v2173_v11 }
 0x41e   :  { %2506 = vrot.lane.b32.xlu1 %v2343_v26, %s4295_s13  ;;  %v2370_v26 = vld [vmem:[#allocation2 + $0x348] sm:$0xff] }
 0x41f   :  { %2510 = vrot.lane.b32.xlu0 %v2345_v50, %s4295_s13  ;;  %v2693_v50 = vld [vmem:[#allocation2 + $0x31] sm:$0xff] }
 0x420   :  { %v2165_v58 = vpop.permute.xlu1 %2164  ;;  %2502 = vrot.lane.b32.xlu2 %v2341_v22, %s4295_s13  ;;  %v2368_v22 = vld [vmem:[#allocation2 + $0x330] sm:$0xff] }
 0x421   :  { %2300 = vst.msk [vmem:[#allocation3 + $0x1c8] sm:$0xff] %vm2242_vm6, %v2165_v58  ;;  %v2169_v8 = vpop.permute.xlu0 %2168 }
 0x422   :  { %2302 = vst.msk [vmem:[#allocation3 + $0x1d8] sm:$0xff] %vm2242_vm6, %v2169_v8  ;;  %v2437_v62 = vpop.permute.xlu2 %2436 }
 0x423   :  { %2629 = vst.msk [vmem:[#allocation3] sm:$0xff] %vm2628_vm7, %v2437_v62 }
 0x426   :  { %2512 = vrot.lane.b32.xlu1 %v2346_v32, %s4295_s13  ;;  %v2694_v32 = vld [vmem:[#allocation2 + $0x39] sm:$0xff] }
 0x427   :  { %2516 = vrot.lane.b32.xlu0 %v2348_v47, %s4295_s13  ;;  %v2696_v47 = vld [vmem:[#allocation2 + $0x51] sm:$0xff] }
 0x428   :  { %v2171_v18 = vpop.permute.xlu1 %2170  ;;  %2508 = vrot.lane.b32.xlu2 %v2344_v12, %s4295_s13  ;;  %v2371_v12 = vld [vmem:[#allocation2 + $0x350] sm:$0xff] }
 0x429   :  { %2303 = vst.msk [vmem:[#allocation3 + $0x1e0] sm:$0xff] %vm2242_vm6, %v2171_v18  ;;  %v2175_v24 = vpop.permute.xlu0 %2174 }
 0x42a   :  { %2305 = vst.msk [vmem:[#allocation3 + $0x1f0] sm:$0xff] %vm2242_vm6, %v2175_v24  ;;  %v2443_v59 = vpop.permute.xlu2 %2442 }
 0x42b   :  { %2632 = vst.msk [vmem:[#allocation3 + $0x18] sm:$0xff] %vm2628_vm7, %v2443_v59 }
 0x42e   :  { %2518 = vrot.lane.b32.xlu1 %v2349_v36, %s4295_s13  ;;  %v2697_v36 = vld [vmem:[#allocation2 + $0x61] sm:$0xff] }
 0x42f   :  { %2522 = vrot.lane.b32.xlu0 %v2351_v41, %s4295_s13  ;;  %v2699_v41 = vld [vmem:[#allocation2 + $0x79] sm:$0xff] }
 0x430   :  { %v2177_v60 = vpop.permute.xlu1 %2176  ;;  %2514 = vrot.lane.b32.xlu2 %v2347_v51, %s4295_s13  ;;  %v2695_v51 = vld [vmem:[#allocation2 + $0x49] sm:$0xff] }
 0x431   :  { %2306 = vst.msk [vmem:[#allocation3 + $0x1f8] sm:$0xff] %vm2242_vm6, %v2177_v60  ;;  %v2439_v19 = vpop.permute.xlu0 %2438 }
 0x432   :  { %2630 = vst.msk [vmem:[#allocation3 + $0x8] sm:$0xff] %vm2628_vm7, %v2439_v19  ;;  %v2449_v5 = vpop.permute.xlu2 %2448 }
 0x433   :  { %2635 = vst.msk [vmem:[#allocation3 + $0x30] sm:$0xff] %vm2628_vm7, %v2449_v5 }
 0x436   :  { %2524 = vrot.lane.b32.xlu1 %v2352_v33, %s4295_s13  ;;  %v2700_v33 = vld [vmem:[#allocation2 + $0x81] sm:$0xff] }
 0x437   :  { %2528 = vrot.lane.b32.xlu0 %v2354_v37, %s4295_s13  ;;  %v2702_v37 = vld [vmem:[#allocation2 + $0x99] sm:$0xff] }
 0x438   :  { %v2441_v30 = vpop.permute.xlu1 %2440  ;;  %2520 = vrot.lane.b32.xlu2 %v2350_v13, %s4295_s13  ;;  %v2698_v13 = vld [vmem:[#allocation2 + $0x69] sm:$0xff] }
 0x439   :  { %2631 = vst.msk [vmem:[#allocation3 + $0x10] sm:$0xff] %vm2628_vm7, %v2441_v30  ;;  %v2445_v52 = vpop.permute.xlu0 %2444 }
 0x43a   :  { %2633 = vst.msk [vmem:[#allocation3 + $0x20] sm:$0xff] %vm2628_vm7, %v2445_v52  ;;  %v2455_v48 = vpop.permute.xlu2 %2454 }
 0x43b   :  { %2638 = vst.msk [vmem:[#allocation3 + $0x48] sm:$0xff] %vm2628_vm7, %v2455_v48 }
 0x43e   :  { %2530 = vrot.lane.b32.xlu1 %v2355_v29, %s4295_s13  ;;  %v2725_v29 = vld [vmem:[#allocation2 + $0x1e1] sm:$0xff] }
 0x43f   :  { %2534 = vrot.lane.b32.xlu0 %v2357_v6, %s4295_s13  ;;  %v3078_v6 = vld [vmem:[#allocation2 + $0x32] sm:$0xff] }
 0x440   :  { %v2447_v9 = vpop.permute.xlu1 %2446  ;;  %2526 = vrot.lane.b32.xlu2 %v2353_v61, %s4295_s13  ;;  %v2701_v61 = vld [vmem:[#allocation2 + $0x91] sm:$0xff] }
 0x441   :  { %2634 = vst.msk [vmem:[#allocation3 + $0x28] sm:$0xff] %vm2628_vm7, %v2447_v9  ;;  %v2451_v20 = vpop.permute.xlu0 %2450 }
 0x442   :  { %2636 = vst.msk [vmem:[#allocation3 + $0x38] sm:$0xff] %vm2628_vm7, %v2451_v20  ;;  %v2461_v27 = vpop.permute.xlu2 %2460 }
 0x443   :  { %2641 = vst.msk [vmem:[#allocation3 + $0x60] sm:$0xff] %vm2628_vm7, %v2461_v27 }
 0x446   :  { %2536 = vrot.lane.b32.xlu1 %v2358_v42, %s4295_s13  ;;  %v2726_v42 = vld [vmem:[#allocation2 + $0x1e9] sm:$0xff] }
 0x447   :  { %2540 = vrot.lane.b32.xlu0 %v2360_v1, %s4295_s13  ;;  %v3079_v1 = vld [vmem:[#allocation2 + $0x3a] sm:$0xff] }
 0x448   :  { %v2453_v17 = vpop.permute.xlu1 %2452  ;;  %2532 = vrot.lane.b32.xlu2 %v2356_v49, %s4295_s13 }
 0x449   :  { %2637 = vst.msk [vmem:[#allocation3 + $0x40] sm:$0xff] %vm2628_vm7, %v2453_v17  ;;  %v2457_v39 = vpop.permute.xlu0 %2456 }
 0x44a   :  { %2639 = vst.msk [vmem:[#allocation3 + $0x50] sm:$0xff] %vm2628_vm7, %v2457_v39  ;;  %v2467_v35 = vpop.permute.xlu2 %2466 }
 0x44b   :  { %2644 = vst.msk [vmem:[#allocation3 + $0x78] sm:$0xff] %vm2628_vm7, %v2467_v35  ;;  %v2727_v35 = vld [vmem:[#allocation2 + $0x1f9] sm:$0xff] }
 0x44e   :  { %2542 = vrot.lane.b32.xlu1 %v2361_v28, %s4295_s13  ;;  %v3080_v28 = vld [vmem:[#allocation2 + $0x4a] sm:$0xff] }
 0x44f   :  { %2546 = vrot.lane.b32.xlu0 %v2363_v4, %s4295_s13 }
 0x450   :  { %v2459_v43 = vpop.permute.xlu1 %2458  ;;  %2538 = vrot.lane.b32.xlu2 %v2359_v15, %s4295_s13 }
 0x451   :  { %2640 = vst.msk [vmem:[#allocation3 + $0x58] sm:$0xff] %vm2628_vm7, %v2459_v43  ;;  %v2463_v40 = vpop.permute.xlu0 %2462  ;;  %v2728_v43 = vld [vmem:[#allocation2 + $0x201] sm:$0xff] }
 0x452   :  { %2642 = vst.msk [vmem:[#allocation3 + $0x68] sm:$0xff] %vm2628_vm7, %v2463_v40  ;;  %v2473_v53 = vpop.permute.xlu2 %2472  ;;  %v3081_v40 = vld [vmem:[#allocation2 + $0x52] sm:$0xff] }
 0x453   :  { %2647 = vst.msk [vmem:[#allocation3 + $0x90] sm:$0xff] %vm2628_vm7, %v2473_v53 }
 0x456   :  { %2548 = vrot.lane.b32.xlu1 %v2364_v56, %s4295_s13 }
 0x457   :  { %2552 = vrot.lane.b32.xlu0 %v2366_v55, %s4295_s13  ;;  %v2729_v55 = vld [vmem:[#allocation2 + $0x211] sm:$0xff] }
 0x458   :  { %v2465_v44 = vpop.permute.xlu1 %2464  ;;  %2544 = vrot.lane.b32.xlu2 %v2362_v34, %s4295_s13 }
 0x459   :  { %2643 = vst.msk [vmem:[#allocation3 + $0x70] sm:$0xff] %vm2628_vm7, %v2465_v44  ;;  %v2469_v10 = vpop.permute.xlu0 %2468 }
 0x45a   :  { %2645 = vst.msk [vmem:[#allocation3 + $0x80] sm:$0xff] %vm2628_vm7, %v2469_v10  ;;  %v2479_v2 = vpop.permute.xlu2 %2478  ;;  %v3082_v10 = vld [vmem:[#allocation2 + $0x62] sm:$0xff] }
 0x45b   :  { %2650 = vst.msk [vmem:[#allocation3 + $0xa8] sm:$0xff] %vm2628_vm7, %v2479_v2  ;;  %v2741_v2 = vld [vmem:[#allocation2 + $0x2a1] sm:$0xff] }
 0x45e   :  { %2554 = vrot.lane.b32.xlu1 %v2367_v54, %s4295_s13 }
 0x45f   :  { %2558 = vrot.lane.b32.xlu0 %v2369_v25, %s4295_s13  ;;  %v3094_v25 = vld [vmem:[#allocation2 + $0xf2] sm:$0xff] }
 0x460   :  { %v2471_v31 = vpop.permute.xlu1 %2470  ;;  %2550 = vrot.lane.b32.xlu2 %v2365_v0, %s4295_s13  ;;  %v2742_v0 = vld [vmem:[#allocation2 + $0x2a9] sm:$0xff] }
 0x461   :  { %2646 = vst.msk [vmem:[#allocation3 + $0x88] sm:$0xff] %vm2628_vm7, %v2471_v31  ;;  %v2475_v38 = vpop.permute.xlu0 %2474  ;;  %v2709_v31 = vld [vmem:[#allocation2 + $0xf1] sm:$0xff] }
 0x462   :  { %2648 = vst.msk [vmem:[#allocation3 + $0x98] sm:$0xff] %vm2628_vm7, %v2475_v38  ;;  %v2485_v11 = vpop.permute.xlu2 %2484 }
 0x463   :  { %2653 = vst.msk [vmem:[#allocation3 + $0xc0] sm:$0xff] %vm2628_vm7, %v2485_v11 }
 0x466   :  { %2560 = vrot.lane.b32.xlu1 %v2370_v26, %s4295_s13  ;;  %v2710_v26 = vld [vmem:[#allocation2 + $0xf9] sm:$0xff] }
 0x467   :  { %2821 = vrot.lane.b32.xlu0 %v2693_v50, %s4296_s14  ;;  %v2730_v50 = vld [vmem:[#allocation2 + $0x219] sm:$0xff] }
 0x468   :  { %v2477_v58 = vpop.permute.xlu1 %2476  ;;  %2556 = vrot.lane.b32.xlu2 %v2368_v22, %s4295_s13 }
 0x469   :  { %2649 = vst.msk [vmem:[#allocation3 + $0xa0] sm:$0xff] %vm2628_vm7, %v2477_v58  ;;  %v2481_v8 = vpop.permute.xlu0 %2480 }
 0x46a   :  { %2651 = vst.msk [vmem:[#allocation3 + $0xb0] sm:$0xff] %vm2628_vm7, %v2481_v8  ;;  %v2491_v62 = vpop.permute.xlu2 %2490 }
 0x46b   :  { %2656 = vst.msk [vmem:[#allocation3 + $0xd8] sm:$0xff] %vm2628_vm7, %v2491_v62  ;;  %v3083_v62 = vld [vmem:[#allocation2 + $0x6a] sm:$0xff] }
 0x46e   :  { %2823 = vrot.lane.b32.xlu1 %v2694_v32, %s4296_s14  ;;  %v2731_v32 = vld [vmem:[#allocation2 + $0x229] sm:$0xff] }
 0x46f   :  { %2827 = vrot.lane.b32.xlu0 %v2696_v47, %s4296_s14 }
 0x470   :  { %v2483_v18 = vpop.permute.xlu1 %2482  ;;  %2562 = vrot.lane.b32.xlu2 %v2371_v12, %s4295_s13 }
 0x471   :  { %2652 = vst.msk [vmem:[#allocation3 + $0xb8] sm:$0xff] %vm2628_vm7, %v2483_v18  ;;  %v2487_v24 = vpop.permute.xlu0 %2486  ;;  %v2743_v18 = vld [vmem:[#allocation2 + $0x2b9] sm:$0xff] }
 0x472   :  { %2654 = vst.msk [vmem:[#allocation3 + $0xc8] sm:$0xff] %vm2628_vm7, %v2487_v24  ;;  %v2497_v59 = vpop.permute.xlu2 %2496  ;;  %v3095_v24 = vld [vmem:[#allocation2 + $0xfa] sm:$0xff] }
 0x473   :  { %2659 = vst.msk [vmem:[#allocation3 + $0xf0] sm:$0xff] %vm2628_vm7, %v2497_v59 }
 0x476   :  { %2829 = vrot.lane.b32.xlu1 %v2697_v36, %s4296_s14 }
 0x477   :  { %2833 = vrot.lane.b32.xlu0 %v2699_v41, %s4296_s14  ;;  %v2711_v41 = vld [vmem:[#allocation2 + $0x109] sm:$0xff] }
 0x478   :  { %v2489_v60 = vpop.permute.xlu1 %2488  ;;  %2825 = vrot.lane.b32.xlu2 %v2695_v51, %s4296_s14  ;;  %v3096_v51 = vld [vmem:[#allocation2 + $0x10a] sm:$0xff] }
 0x479   :  { %2655 = vst.msk [vmem:[#allocation3 + $0xd0] sm:$0xff] %vm2628_vm7, %v2489_v60  ;;  %v2493_v19 = vpop.permute.xlu0 %2492 }
 0x47a   :  { %2657 = vst.msk [vmem:[#allocation3 + $0xe0] sm:$0xff] %vm2628_vm7, %v2493_v19  ;;  %v2503_v5 = vpop.permute.xlu2 %2502 }
 0x47b   :  { %2662 = vst.msk [vmem:[#allocation3 + $0x108] sm:$0xff] %vm2628_vm7, %v2503_v5 }
 0x47e   :  { %2835 = vrot.lane.b32.xlu1 %v2700_v33, %s4296_s14  ;;  %v3530_v33 = vld [vmem:[%s6419_s1 + $0x18] sm:$0xff] }
 0x47f   :  { %2839 = vrot.lane.b32.xlu0 %v2702_v37, %s4296_s14  ;;  %v2732_v37 = vld [vmem:[#allocation2 + $0x231] sm:$0xff] }
 0x480   :  { %v2495_v30 = vpop.permute.xlu1 %2494  ;;  %2831 = vrot.lane.b32.xlu2 %v2698_v13, %s4296_s14  ;;  %v3117_v13 = vld [vmem:[#allocation2 + $0x232] sm:$0xff] }
 0x481   :  { %2658 = vst.msk [vmem:[#allocation3 + $0xe8] sm:$0xff] %vm2628_vm7, %v2495_v30  ;;  %v2499_v52 = vpop.permute.xlu0 %2498  ;;  %v3084_v30 = vld [vmem:[#allocation2 + $0x7a] sm:$0xff] }
 0x482   :  { %2660 = vst.msk [vmem:[#allocation3 + $0xf8] sm:$0xff] %vm2628_vm7, %v2499_v52  ;;  %v2509_v48 = vpop.permute.xlu2 %2508  ;;  %v3528_v52 = vld [vmem:[%s6419_s1 + $0x8] sm:$0xff] }
 0x483   :  { %2665 = vst.msk [vmem:[#allocation3 + $0x120] sm:$0xff] %vm2628_vm7, %v2509_v48 }
 0x486   :  { %2885 = vrot.lane.b32.xlu1 %v2725_v29, %s4296_s14  ;;  %v3527_v29 = vld [vmem:[%s6419_s1] sm:$0xff] }
 0x487   :  { %3206 = vrot.lane.b32.xlu0 %v3078_v6, %s4297_s15 }
 0x488   :  { %v2501_v9 = vpop.permute.xlu1 %2500  ;;  %2837 = vrot.lane.b32.xlu2 %v2701_v61, %s4296_s14 }
 0x489   :  { %2661 = vst.msk [vmem:[#allocation3 + $0x100] sm:$0xff] %vm2628_vm7, %v2501_v9  ;;  %v2505_v20 = vpop.permute.xlu0 %2504  ;;  %v3085_v9 = vld [vmem:[#allocation2 + $0x82] sm:$0xff] }
 0x48a   :  { %2663 = vst.msk [vmem:[#allocation3 + $0x110] sm:$0xff] %vm2628_vm7, %v2505_v20  ;;  %v2515_v27 = vpop.permute.xlu2 %2514  ;;  %v2744_v20 = vld [vmem:[#allocation2 + $0x2c1] sm:$0xff] }
 0x48b   :  { %2668 = vst.msk [vmem:[#allocation3 + $0x138] sm:$0xff] %vm2628_vm7, %v2515_v27  ;;  %v4261_v27 = vld [vmem:[#allocation2 + $0x2c2] sm:$0xff] }
 0x48e   :  { %2887 = vrot.lane.b32.xlu1 %v2726_v42, %s4296_s14 }
 0x48f   :  { %3208 = vrot.lane.b32.xlu0 %v3079_v1, %s4297_s15 }
 0x490   :  { %v2507_v49 = vpop.permute.xlu1 %2506  ;;  %3270 = vrot.lane.b32.xlu2 %v5629_v3, %s4297_s15 }
 0x491   :  { %2664 = vst.msk [vmem:[#allocation3 + $0x118] sm:$0xff] %vm2628_vm7, %v2507_v49  ;;  %v2511_v17 = vpop.permute.xlu0 %2510 }
 0x492   :  { %2666 = vst.msk [vmem:[#allocation3 + $0x128] sm:$0xff] %vm2628_vm7, %v2511_v17  ;;  %v2521_v39 = vpop.permute.xlu2 %2520  ;;  %v3097_v17 = vld [vmem:[#allocation2 + $0x112] sm:$0xff] }
 0x493   :  { %2671 = vst.msk [vmem:[#allocation3 + $0x150] sm:$0xff] %vm2628_vm7, %v2521_v39  ;;  %v2745_v39 = vld [vmem:[#allocation2 + $0x2d1] sm:$0xff] }
 0x496   :  { %2889 = vrot.lane.b32.xlu1 %v2727_v35, %s4296_s14  ;;  %v2712_v35 = vld [vmem:[#allocation2 + $0x111] sm:$0xff] }
 0x497   :  { %3210 = vrot.lane.b32.xlu0 %v3080_v28, %s4297_s15 }
 0x498   :  { %v2513_v4 = vpop.permute.xlu1 %2512  ;;  %3272 = vrot.lane.b32.xlu2 %v5616_v45, %s4297_s15 }
 0x499   :  { %2667 = vst.msk [vmem:[#allocation3 + $0x130] sm:$0xff] %vm2628_vm7, %v2513_v4  ;;  %v2517_v3 = vpop.permute.xlu0 %2516 }
 0x49a   :  { %2669 = vst.msk [vmem:[#allocation3 + $0x140] sm:$0xff] %vm2628_vm7, %v2517_v3  ;;  %v2527_v15 = vpop.permute.xlu2 %2526 }
 0x49b   :  { %2674 = vst.msk [vmem:[#allocation3 + $0x168] sm:$0xff] %vm2628_vm7, %v2527_v15  ;;  %v3118_v15 = vld [vmem:[#allocation2 + $0x242] sm:$0xff] }
 0x49e   :  { %2891 = vrot.lane.b32.xlu1 %v2728_v43, %s4296_s14  ;;  %v2713_v43 = vld [vmem:[#allocation2 + $0x121] sm:$0xff] }
 0x49f   :  { %3212 = vrot.lane.b32.xlu0 %v3081_v40, %s4297_s15  ;;  %v2733_v40 = vld [vmem:[#allocation2 + $0x241] sm:$0xff] }
 0x4a0   :  { %v2519_v53 = vpop.permute.xlu1 %2518  ;;  %3274 = vrot.lane.b32.xlu2 %v5624_v63, %s4297_s15 }
 0x4a1   :  { %2670 = vst.msk [vmem:[#allocation3 + $0x148] sm:$0xff] %vm2628_vm7, %v2519_v53  ;;  %v2523_v45 = vpop.permute.xlu0 %2522 }
 0x4a2   :  { %2672 = vst.msk [vmem:[#allocation3 + $0x158] sm:$0xff] %vm2628_vm7, %v2523_v45  ;;  %v2533_v56 = vpop.permute.xlu2 %2532 }
 0x4a3   :  { %2677 = vst.msk [vmem:[#allocation3 + $0x180] sm:$0xff] %vm2628_vm7, %v2533_v56 }
 0x4a6   :  { %2893 = vrot.lane.b32.xlu1 %v2729_v55, %s4296_s14  ;;  %v3086_v55 = vld [vmem:[#allocation2 + $0x92] sm:$0xff] }
 0x4a7   :  { %3278 = vrot.lane.b32.xlu0 %v5627_v57, %s4297_s15 }
 0x4a8   :  { %v2525_v34 = vpop.permute.xlu1 %2524  ;;  %3276 = vrot.lane.b32.xlu2 %v5642_v21, %s4297_s15 }
 0x4a9   :  { %2673 = vst.msk [vmem:[#allocation3 + $0x160] sm:$0xff] %vm2628_vm7, %v2525_v34  ;;  %v2529_v63 = vpop.permute.xlu0 %2528  ;;  %v2734_v34 = vld [vmem:[#allocation2 + $0x249] sm:$0xff] }
 0x4aa   :  { %2675 = vst.msk [vmem:[#allocation3 + $0x170] sm:$0xff] %vm2628_vm7, %v2529_v63  ;;  %v2539_v44 = vpop.permute.xlu2 %2538  ;;  %v3130_v63 = vld [vmem:[#allocation2 + $0x2d2] sm:$0xff] }
 0x4ab   :  { %2680 = vst.msk [vmem:[#allocation3 + $0x198] sm:$0xff] %vm2628_vm7, %v2539_v44 }
 0x4ae   :  { %3302 = vrot.lane.b32.xlu1 %v5667_v16, %s4297_s15 }
 0x4af   :  { %3214 = vrot.lane.b32.xlu0 %v3082_v10, %s4297_s15 }
 0x4b0   :  { %v2531_v57 = vpop.permute.xlu1 %2530  ;;  %2917 = vrot.lane.b32.xlu2 %v2741_v2, %s4296_s14 }
 0x4b1   :  { %2676 = vst.msk [vmem:[#allocation3 + $0x178] sm:$0xff] %vm2628_vm7, %v2531_v57  ;;  %v2535_v21 = vpop.permute.xlu0 %2534 }
 0x4b2   :  { %2678 = vst.msk [vmem:[#allocation3 + $0x188] sm:$0xff] %vm2628_vm7, %v2535_v21  ;;  %v2545_v54 = vpop.permute.xlu2 %2544 }
 0x4b3   :  { %2683 = vst.msk [vmem:[#allocation3 + $0x1b0] sm:$0xff] %vm2628_vm7, %v2545_v54  ;;  %v2746_v54 = vld [vmem:[#allocation2 + $0x2d9] sm:$0xff] }
 0x4b6   :  { %3238 = vrot.lane.b32.xlu1 %v3094_v25, %s4297_s15  ;;  %v3131_v25 = vld [vmem:[#allocation2 + $0x2da] sm:$0xff] }
 0x4b7   :  { %2919 = vrot.lane.b32.xlu0 %v2742_v0, %s4296_s14  ;;  %v3098_v0 = vld [vmem:[#allocation2 + $0x122] sm:$0xff] }
 0x4b8   :  { %v2537_v16 = vpop.permute.xlu1 %2536  ;;  %2853 = vrot.lane.b32.xlu2 %v2709_v31, %s4296_s14 }
 0x4b9   :  { %2679 = vst.msk [vmem:[#allocation3 + $0x190] sm:$0xff] %vm2628_vm7, %v2537_v16  ;;  %v2541_v38 = vpop.permute.xlu0 %2540 }
 0x4ba   :  { %2681 = vst.msk [vmem:[#allocation3 + $0x1a0] sm:$0xff] %vm2628_vm7, %v2541_v38  ;;  %v2551_v11 = vpop.permute.xlu2 %2550 }
 0x4bb   :  { %2686 = vst.msk [vmem:[#allocation3 + $0x1c8] sm:$0xff] %vm2628_vm7, %v2551_v11 }
 0x4be   :  { %3280 = vrot.lane.b32.xlu1 %v5639_v14, %s4297_s15 }
 0x4bf   :  { %2855 = vrot.lane.b32.xlu0 %v2710_v26, %s4296_s14 }
 0x4c0   :  { %v2543_v22 = vpop.permute.xlu1 %2542  ;;  %2895 = vrot.lane.b32.xlu2 %v2730_v50, %s4296_s14  ;;  %v2714_v50 = vld [vmem:[#allocation2 + $0x129] sm:$0xff] }
 0x4c1   :  { %2682 = vst.msk [vmem:[#allocation3 + $0x1a8] sm:$0xff] %vm2628_vm7, %v2543_v22  ;;  %v2547_v58 = vpop.permute.xlu0 %2546  ;;  %v3099_v22 = vld [vmem:[#allocation2 + $0x12a] sm:$0xff] }
 0x4c2   :  { %2684 = vst.msk [vmem:[#allocation3 + $0x1b8] sm:$0xff] %vm2628_vm7, %v2547_v58  ;;  %v2557_v8 = vpop.permute.xlu2 %2556  ;;  %v3119_v58 = vld [vmem:[#allocation2 + $0x24a] sm:$0xff] }
 0x4c3   :  { %2689 = vst.msk [vmem:[#allocation3 + $0x1e0] sm:$0xff] %vm2628_vm7, %v2557_v8 }
 0x4c6   :  { %3216 = vrot.lane.b32.xlu1 %v3083_v62, %s4297_s15 }
 0x4c7   :  { %2897 = vrot.lane.b32.xlu0 %v2731_v32, %s4296_s14 }
 0x4c8   :  { %v2549_v14 = vpop.permute.xlu1 %2548  ;;  %3304 = vrot.lane.b32.xlu2 %v5675_v7, %s4297_s15 }
 0x4c9   :  { %2685 = vst.msk [vmem:[#allocation3 + $0x1c0] sm:$0xff] %vm2628_vm7, %v2549_v14  ;;  %v2553_v47 = vpop.permute.xlu0 %2552 }
 0x4ca   :  { %2687 = vst.msk [vmem:[#allocation3 + $0x1d0] sm:$0xff] %vm2628_vm7, %v2553_v47  ;;  %v2563_v12 = vpop.permute.xlu2 %2562 }
 0x4cb   :  { %2692 = vst.msk [vmem:[#allocation3 + $0x1f8] sm:$0xff] %vm2628_vm7, %v2563_v12  ;;  %v2735_v12 = vld [vmem:[#allocation2 + $0x259] sm:$0xff] }
 0x4ce   :  { %2921 = vrot.lane.b32.xlu1 %v2743_v18, %s4296_s14  ;;  %v3120_v18 = vld [vmem:[#allocation2 + $0x25a] sm:$0xff] }
 0x4cf   :  { %3306 = vrot.lane.b32.xlu0 %v5685_v23, %s4297_s15  ;;  %v3531_v23 = vld [vmem:[%s6419_s1 + $0x20] sm:$0xf] }
 0x4d0   :  { %v2555_v59 = vpop.permute.xlu1 %2554  ;;  %3240 = vrot.lane.b32.xlu2 %v3095_v24, %s4297_s15  ;;  %4236 = vmatpush.msk.msra.mxu2 %vm3729_vm9, %v3531_v23  ;;  %v3087_v24 = vld [vmem:[#allocation2 + $0x9a] sm:$0xff] }
 0x4d1   :  { %2688 = vst.msk [vmem:[#allocation3 + $0x1d8] sm:$0xff] %vm2628_vm7, %v2555_v59  ;;  %v2559_v7 = vpop.permute.xlu0 %2558  ;;  %4170 = vmatpush.msk.msra.mxu0 %vm3729_vm9, %v3531_v23  ;;  %4237 = vmatpush.msk.msra.mxu3 %vm3729_vm9, %v3531_v23 }
 0x4d2   :  { %2690 = vst.msk [vmem:[#allocation3 + $0x1e8] sm:$0xff] %vm2628_vm7, %v2559_v7  ;;  %v2826_v36 = vpop.permute.xlu2 %2825  ;;  %4235 = vmatpush.msk.msra.mxu1 %vm3729_vm9, %v3531_v23  ;;  %4239 = vmatpush.msra.mxu2 %v3530_v33  ;;  %v2715_v23 = vld [vmem:[#allocation2 + $0x139] sm:$0xff] }
 0x4d3   :  { %3016 = vst.msk [vmem:[#allocation3 + $0x10] sm:$0xff] %vm3013_vm8, %v2826_v36  ;;  %3745 = vmatpush.msra.mxu0 %v3530_v33  ;;  %4240 = vmatpush.msra.mxu3 %v3530_v33 }
 0x4d4   :  { %4238 = vmatpush.msra.mxu1 %v3530_v33 }
 0x4d6   :  { %2857 = vrot.lane.b32.xlu1 %v2711_v41, %s4296_s14 }
 0x4d7   :  { %3242 = vrot.lane.b32.xlu0 %v3096_v51, %s4297_s15 }
 0x4d8   :  { %v2561_v60 = vpop.permute.xlu1 %2560  ;;  %3282 = vrot.lane.b32.xlu2 %v5652_v46, %s4297_s15  ;;  %v3529_v46 = vld [vmem:[%s6419_s1 + $0x10] sm:$0xff] }
 0x4d9   :  { %2691 = vst.msk [vmem:[#allocation3 + $0x1f0] sm:$0xff] %vm2628_vm7, %v2561_v60  ;;  %v2822_v19 = vpop.permute.xlu0 %2821  ;;  %4242 = vmatpush.msra.mxu2 %v3529_v46  ;;  %3746 = vmatpush.msra.mxu0 %v3529_v46  ;;  %v3132_v60 = vld [vmem:[#allocation2 + $0x2ea] sm:$0xff] }
 0x4da   :  { %3014 = vst.msk [vmem:[#allocation3] sm:$0xff] %vm3013_vm8, %v2822_v19  ;;  %v2832_v5 = vpop.permute.xlu2 %2831  ;;  %4243 = vmatpush.msra.mxu3 %v3529_v46  ;;  %4241 = vmatpush.msra.mxu1 %v3529_v46  ;;  %v2747_v19 = vld [vmem:[#allocation2 + $0x2e9] sm:$0xff] }
 0x4db   :  { %3019 = vst.msk [vmem:[#allocation3 + $0x28] sm:$0xff] %vm3013_vm8, %v2832_v5  ;;  %4245 = vmatpush.msra.mxu2 %v3528_v52  ;;  %3747 = vmatpush.msra.mxu0 %v3528_v52 }
 0x4dc   :  { %4246 = vmatpush.msra.mxu3 %v3528_v52  ;;  %4244 = vmatpush.msra.mxu1 %v3528_v52  ;;  %v2703_v52 = vld [vmem:[#allocation2 + $0xa9] sm:$0xff] }
 0x4dd   :  { %4248 = vmatpush.msra.mxu2 %v3527_v29  ;;  %3748 = vmatpush.msra.mxu0 %v3527_v29 }
 0x4de   :  { %2899 = vrot.lane.b32.xlu1 %v2732_v37, %s4296_s14  ;;  %4249 = vmatpush.msra.mxu3 %v3527_v29 }
 0x4df   :  { %3284 = vrot.lane.b32.xlu0 %v3117_v13, %s4297_s15  ;;  %4247 = vmatpush.msra.mxu1 %v3527_v29  ;;  %v3088_v13 = vld [vmem:[#allocation2 + $0xaa] sm:$0xff] }
 0x4e0   :  { %v2824_v48 = vpop.permute.xlu1 %2823  ;;  %3218 = vrot.lane.b32.xlu2 %v3084_v30, %s4297_s15  ;;  %v2736_v30 = vld [vmem:[#allocation2 + $0x261] sm:$0xff] }
 0x4e1   :  { %3015 = vst.msk [vmem:[#allocation3 + $0x8] sm:$0xff] %vm3013_vm8, %v2824_v48  ;;  %v2828_v6 = vpop.permute.xlu0 %2827 }
 0x4e2   :  { %3017 = vst.msk [vmem:[#allocation3 + $0x18] sm:$0xff] %vm3013_vm8, %v2828_v6  ;;  %v2838_v61 = vpop.permute.xlu2 %2837 }
 0x4e3   :  { %3022 = vst.msk [vmem:[#allocation3 + $0x40] sm:$0xff] %vm3013_vm8, %v2838_v61 }
 0x4e6   :  { %3308 = vrot.lane.b32.xlu1 %v4261_v27, %s4297_s15  ;;  %v3133_v27 = vld [vmem:[#allocation2 + $0x2f2] sm:$0xff] }
 0x4e7   :  { %3220 = vrot.lane.b32.xlu0 %v3085_v9, %s4297_s15 }
 0x4e8   :  { %v2830_v42 = vpop.permute.xlu1 %2829  ;;  %2923 = vrot.lane.b32.xlu2 %v2744_v20, %s4296_s14  ;;  %v2748_v20 = vld [vmem:[#allocation2 + $0x2f1] sm:$0xff] }
 0x4e9   :  { %3018 = vst.msk [vmem:[#allocation3 + $0x20] sm:$0xff] %vm3013_vm8, %v2830_v42  ;;  %v2834_v1 = vpop.permute.xlu0 %2833  ;;  %v3100_v42 = vld [vmem:[#allocation2 + $0x13a] sm:$0xff] }
 0x4ea   :  { %3020 = vst.msk [vmem:[#allocation3 + $0x30] sm:$0xff] %vm3013_vm8, %v2834_v1  ;;  %v3271_v49 = vpop.permute.xlu2 %3270 }
 0x4ee   :  { %3244 = vrot.lane.b32.xlu1 %v3097_v17, %s4297_s15 }
 0x4ef   :  { %2925 = vrot.lane.b32.xlu0 %v2745_v39, %s4296_s14 }
 0x4f0   :  { %v2836_v28 = vpop.permute.xlu1 %2835  ;;  %2859 = vrot.lane.b32.xlu2 %v2712_v35, %s4296_s14 }
 0x4f1   :  { %3021 = vst.msk [vmem:[#allocation3 + $0x38] sm:$0xff] %vm3013_vm8, %v2836_v28  ;;  %v2840_v4 = vpop.permute.xlu0 %2839  ;;  %v2704_v28 = vld [vmem:[#allocation2 + $0xb1] sm:$0xff] }
 0x4f2   :  { %3023 = vst.msk [vmem:[#allocation3 + $0x48] sm:$0xff] %vm3013_vm8, %v2840_v4  ;;  %v3273_v3 = vpop.permute.xlu2 %3272  ;;  %v3089_v4 = vld [vmem:[#allocation2 + $0xb2] sm:$0xff] }
 0x4f6   :  { %3286 = vrot.lane.b32.xlu1 %v3118_v15, %s4297_s15 }
 0x4f7   :  { %2861 = vrot.lane.b32.xlu0 %v2713_v43, %s4296_s14 }
 0x4f8   :  { %v2886_v53 = vpop.permute.xlu1 %2885  ;;  %2901 = vrot.lane.b32.xlu2 %v2733_v40, %s4296_s14 }
 0x4f9   :  { %3046 = vst.msk [vmem:[#allocation3 + $0x100] sm:$0xff] %vm3013_vm8, %v2886_v53  ;;  %v3207_v45 = vpop.permute.xlu0 %3206 }
 0x4fa   :  { %3431 = vst.msk [vmem:[#allocation3 + $0x100] sm:$0xff] %vm3398_vm10, %v3271_v49  ;;  %v3275_v56 = vpop.permute.xlu2 %3274 }
 0x4fb   :  { %3399 = vst.msk [vmem:[#allocation3] sm:$0xff] %vm3398_vm10, %v3207_v45 }
 0x4fe   :  { %3222 = vrot.lane.b32.xlu1 %v3086_v55, %s4297_s15  ;;  %v2749_v55 = vld [vmem:[#allocation2 + $0x301] sm:$0xff] }
 0x4ff   :  { %2903 = vrot.lane.b32.xlu0 %v2734_v34, %s4296_s14  ;;  %v2716_v34 = vld [vmem:[#allocation2 + $0x141] sm:$0xff] }
 0x500   :  { %v2888_v44 = vpop.permute.xlu1 %2887  ;;  %3310 = vrot.lane.b32.xlu2 %v3130_v63, %s4297_s15 }
 0x501   :  { %3047 = vst.msk [vmem:[#allocation3 + $0x108] sm:$0xff] %vm3013_vm8, %v2888_v44  ;;  %v3495_v10 = vld [vmem:[#allocation3 + $0x100] sm:$0xff]  ;;  %v3209_v2 = vpop.permute.xlu0 %3208 }
 0x502   :  { %3432 = vst.msk [vmem:[#allocation3 + $0x108] sm:$0xff] %vm3398_vm10, %v3273_v3  ;;  %4203 = vmatmul.msk.f32.vlgmr.msra.gmra.mxu2 %vm3536_vm11, %v3495_v10  ;;  %v3277_v57 = vpop.permute.xlu2 %3276  ;;  %v3463_v21 = vld [vmem:[#allocation3] sm:$0xff] }
 0x503   :  { %3400 = vst.msk [vmem:[#allocation3 + $0x8] sm:$0xff] %vm3398_vm10, %v3209_v2  ;;  %4171 = vmatmul.msk.f32.vlgmr.msra.gmra.mxu0 %vm3536_vm11, %v3463_v21  ;;  %v3121_v3 = vld [vmem:[#allocation2 + $0x262] sm:$0xff]  ;;  %v3122_v21 = vld [vmem:[#allocation2 + $0x272] sm:$0xff] }
 0x506   :  { %2927 = vrot.lane.b32.xlu1 %v2746_v54, %s4296_s14  ;;  %v2705_v54 = vld [vmem:[#allocation2 + $0xc1] sm:$0xff] }
 0x507   :  { %3312 = vrot.lane.b32.xlu0 %v3131_v25, %s4297_s15  ;;  %v2737_v25 = vld [vmem:[#allocation2 + $0x271] sm:$0xff] }
 0x508   :  { %v2890_v31 = vpop.permute.xlu1 %2889  ;;  %3246 = vrot.lane.b32.xlu2 %v3098_v0, %s4297_s15 }
 0x509   :  { %3048 = vst.msk [vmem:[#allocation3 + $0x110] sm:$0xff] %vm3013_vm8, %v2890_v31  ;;  %v3496_v16 = vld [vmem:[#allocation3 + $0x108] sm:$0xff]  ;;  %v3211_v38 = vpop.permute.xlu0 %3210 }
 0x50a   :  { %3433 = vst.msk [vmem:[#allocation3 + $0x110] sm:$0xff] %vm3398_vm10, %v3275_v56  ;;  %4204 = vmatmul.msk.f32.gmra.mxu2 %vm3536_vm11, %v3496_v16  ;;  %v2918_v11 = vpop.permute.xlu2 %2917  ;;  %v3464_v26 = vld [vmem:[#allocation3 + $0x8] sm:$0xff] }
 0x50b   :  { %3401 = vst.msk [vmem:[#allocation3 + $0x10] sm:$0xff] %vm3398_vm10, %v3211_v38  ;;  %4172 = vmatmul.msk.f32.gmra.mxu0 %vm3536_vm11, %v3464_v26  ;;  %v3101_v56 = vld [vmem:[#allocation2 + $0x142] sm:$0xff]  ;;  %v2717_v26 = vld [vmem:[#allocation2 + $0x151] sm:$0xff] }
 0x50c   :  { %3062 = vst.msk [vmem:[#allocation3 + $0x180] sm:$0xff] %vm3013_vm8, %v2918_v11 }
 0x50e   :  { %2863 = vrot.lane.b32.xlu1 %v2714_v50, %s4296_s14  ;;  %v3102_v50 = vld [vmem:[#allocation2 + $0x152] sm:$0xff] }
 0x50f   :  { %3248 = vrot.lane.b32.xlu0 %v3099_v22, %s4297_s15  ;;  %v3134_v22 = vld [vmem:[#allocation2 + $0x302] sm:$0xff] }
 0x510   :  { %v2892_v8 = vpop.permute.xlu1 %2891  ;;  %3288 = vrot.lane.b32.xlu2 %v3119_v58, %s4297_s15 }
 0x511   :  { %3049 = vst.msk [vmem:[#allocation3 + $0x118] sm:$0xff] %vm3013_vm8, %v2892_v8  ;;  %v3497_v62 = vld [vmem:[#allocation3 + $0x110] sm:$0xff]  ;;  %v3213_v32 = vpop.permute.xlu0 %3212 }
 0x512   :  { %3434 = vst.msk [vmem:[#allocation3 + $0x118] sm:$0xff] %vm3398_vm10, %v3277_v57  ;;  %4205 = vmatmul.msk.f32.gmra.mxu2 %vm3536_vm11, %v3497_v62  ;;  %v2854_v14 = vpop.permute.xlu2 %2853  ;;  %v3465_v47 = vld [vmem:[#allocation3 + $0x10] sm:$0xff] }
 0x513   :  { %3402 = vst.msk [vmem:[#allocation3 + $0x18] sm:$0xff] %vm3398_vm10, %v3213_v32  ;;  %4173 = vmatmul.msk.f32.gmra.mxu0 %vm3536_vm11, %v3465_v47  ;;  %v3123_v47 = vld [vmem:[#allocation2 + $0x27a] sm:$0xff] }
 0x514   :  { %3030 = vst.msk [vmem:[#allocation3 + $0x80] sm:$0xff] %vm3013_vm8, %v2854_v14  ;;  %v2738_v14 = vld [vmem:[#allocation2 + $0x279] sm:$0xff] }
 0x516   :  { %2905 = vrot.lane.b32.xlu1 %v2735_v12, %s4296_s14  ;;  %v3090_v12 = vld [vmem:[#allocation2 + $0xc2] sm:$0xff] }
 0x517   :  { %3290 = vrot.lane.b32.xlu0 %v3120_v18, %s4297_s15 }
 0x518   :  { %v2894_v59 = vpop.permute.xlu1 %2893  ;;  %3224 = vrot.lane.b32.xlu2 %v3087_v24, %s4297_s15 }
 0x519   :  { %3050 = vst.msk [vmem:[#allocation3 + $0x120] sm:$0xff] %vm3013_vm8, %v2894_v59  ;;  %v3498_v7 = vld [vmem:[#allocation3 + $0x118] sm:$0xff]  ;;  %v3279_v36 = vpop.permute.xlu0 %3278 }
 0x51a   :  { %4206 = vmatmul.msk.f32.gmra.mxu2 %vm3536_vm11, %v3498_v7  ;;  %3435 = vst.msk [vmem:[#allocation3 + $0x120] sm:$0xff] %vm3398_vm10, %v3279_v36  ;;  %v2896_v41 = vpop.permute.xlu2 %2895  ;;  %v3466_v51 = vld [vmem:[#allocation3 + $0x18] sm:$0xff]  ;;  %v3135_v36 = vld [vmem:[#allocation2 + $0x30a] sm:$0xff] }
 0x51b   :  { %3051 = vst.msk [vmem:[#allocation3 + $0x128] sm:$0xff] %vm3013_vm8, %v2896_v41  ;;  %4174 = vmatmul.msk.f32.gmra.mxu0 %vm3536_vm11, %v3466_v51  ;;  %v2718_v41 = vld [vmem:[#allocation2 + $0x159] sm:$0xff]  ;;  %v2750_v51 = vld [vmem:[#allocation2 + $0x309] sm:$0xff] }
 0x51e   :  { %3314 = vrot.lane.b32.xlu1 %v3132_v60, %s4297_s15 }
 0x51f   :  { %2865 = vrot.lane.b32.xlu0 %v2715_v23, %s4296_s14 }
 0x520   :  { %v3303_v5 = vpop.permute.xlu1 %3302  ;;  %2929 = vrot.lane.b32.xlu2 %v2747_v19, %s4296_s14 }
 0x521   :  { %3447 = vst.msk [vmem:[#allocation3 + $0x180] sm:$0xff] %vm3398_vm10, %v3303_v5  ;;  %v3215_v33 = vpop.permute.xlu0 %3214  ;;  %v3499_v46 = vld [vmem:[#allocation3 + $0x120] sm:$0xff] }
 0x522   :  { %3403 = vst.msk [vmem:[#allocation3 + $0x20] sm:$0xff] %vm3398_vm10, %v3215_v33  ;;  %v3305_v37 = vpop.permute.xlu2 %3304  ;;  %4207 = vmatmul.msk.f32.gmra.mxu2 %vm3536_vm11, %v3499_v46  ;;  %v3091_v46 = vld [vmem:[#allocation2 + $0xca] sm:$0xff] }
 0x526   :  { %3226 = vrot.lane.b32.xlu1 %v3088_v13, %s4297_s15  ;;  %v2706_v13 = vld [vmem:[#allocation2 + $0xc9] sm:$0xff] }
 0x527   :  { %2907 = vrot.lane.b32.xlu0 %v2736_v30, %s4296_s14 }
 0x528   :  { %v3239_v48 = vpop.permute.xlu1 %3238  ;;  %v3511_v29 = vld [vmem:[#allocation3 + $0x180] sm:$0xff]  ;;  %2841 = vrot.lane.b32.xlu2 %v2703_v52, %s4296_s14 }
 0x529   :  { %3415 = vst.msk [vmem:[#allocation3 + $0x80] sm:$0xff] %vm3398_vm10, %v3239_v48  ;;  %4219 = vmatmul.msk.f32.vlgmr.msra.gmra.mxu3 %vm3536_vm11, %v3511_v29  ;;  %v2920_v6 = vpop.permute.xlu0 %2919  ;;  %v3467_v61 = vld [vmem:[#allocation3 + $0x20] sm:$0xff] }
 0x52a   :  { %3063 = vst.msk [vmem:[#allocation3 + $0x188] sm:$0xff] %vm3013_vm8, %v2920_v6  ;;  %v3241_v9 = vpop.permute.xlu2 %3240  ;;  %4175 = vmatmul.msk.f32.gmra.mxu0 %vm3536_vm11, %v3467_v61  ;;  %v2751_v61 = vld [vmem:[#allocation2 + $0x319] sm:$0xff] }
 0x52b   :  { %3448 = vst.msk [vmem:[#allocation3 + $0x188] sm:$0xff] %vm3398_vm10, %v3305_v37  ;;  %v2739_v37 = vld [vmem:[#allocation2 + $0x289] sm:$0xff] }
 0x52e   :  { %2931 = vrot.lane.b32.xlu1 %v2748_v20, %s4296_s14  ;;  %v3103_v20 = vld [vmem:[#allocation2 + $0x15a] sm:$0xff] }
 0x52f   :  { %3316 = vrot.lane.b32.xlu0 %v3133_v27, %s4297_s15 }
 0x530   :  { %v3281_v1 = vpop.permute.xlu1 %3280  ;;  %v3479_v49 = vld [vmem:[#allocation3 + $0x80] sm:$0xff]  ;;  %3250 = vrot.lane.b32.xlu2 %v3100_v42, %s4297_s15 }
 0x531   :  { %3436 = vst.msk [vmem:[#allocation3 + $0x128] sm:$0xff] %vm3398_vm10, %v3281_v1  ;;  %4187 = vmatmul.msk.f32.vlgmr.msra.gmra.mxu1 %vm3536_vm11, %v3479_v49  ;;  %v2856_v17 = vpop.permute.xlu0 %2855 }
 0x532   :  { %3031 = vst.msk [vmem:[#allocation3 + $0x88] sm:$0xff] %vm3013_vm8, %v2856_v17  ;;  %v3283_v39 = vpop.permute.xlu2 %3282  ;;  %v3512_v35 = vld [vmem:[#allocation3 + $0x188] sm:$0xff] }
 0x533   :  { %3416 = vst.msk [vmem:[#allocation3 + $0x88] sm:$0xff] %vm3398_vm10, %v3241_v9  ;;  %4220 = vmatmul.msk.f32.gmra.mxu3 %vm3536_vm11, %v3512_v35  ;;  %v3136_v9 = vld [vmem:[#allocation2 + $0x31a] sm:$0xff] }
 0x534   :  { %v3092_v35 = vld [vmem:[#allocation2 + $0xda] sm:$0xff] }
 0x536   :  { %2843 = vrot.lane.b32.xlu1 %v2704_v28, %s4296_s14  ;;  %v3124_v28 = vld [vmem:[#allocation2 + $0x28a] sm:$0xff] }
 0x537   :  { %3228 = vrot.lane.b32.xlu0 %v3089_v4, %s4297_s15 }
 0x538   :  { %v3217_v15 = vpop.permute.xlu1 %3216  ;;  %v3500_v43 = vld [vmem:[#allocation3 + $0x128] sm:$0xff]  ;;  %3292 = vrot.lane.b32.xlu2 %v3121_v3, %s4297_s15 }
 0x539   :  { %3404 = vst.msk [vmem:[#allocation3 + $0x28] sm:$0xff] %vm3398_vm10, %v3217_v15  ;;  %4208 = vmatmul.msk.f32.gmra.mxu2 %vm3536_vm11, %v3500_v43  ;;  %v2898_v40 = vpop.permute.xlu0 %2897 }
 0x53a   :  { %3052 = vst.msk [vmem:[#allocation3 + $0x130] sm:$0xff] %vm3013_vm8, %v2898_v40  ;;  %v3219_v53 = vpop.permute.xlu2 %3218  ;;  %v3480_v45 = vld [vmem:[#allocation3 + $0x88] sm:$0xff] }
 0x53b   :  { %3437 = vst.msk [vmem:[#allocation3 + $0x130] sm:$0xff] %vm3398_vm10, %v3283_v39  ;;  %4188 = vmatmul.msk.f32.gmra.mxu1 %vm3536_vm11, %v3480_v45  ;;  %v2707_v39 = vld [vmem:[#allocation2 + $0xd9] sm:$0xff]  ;;  %v2752_v45 = vld [vmem:[#allocation2 + $0x321] sm:$0xff] }
 0x53c   :  { %3405 = vst.msk [vmem:[#allocation3 + $0x30] sm:$0xff] %vm3398_vm10, %v3219_v53  ;;  %v3104_v53 = vld [vmem:[#allocation2 + $0x16a] sm:$0xff] }
 0x53e   :  { %3252 = vrot.lane.b32.xlu1 %v3101_v56, %s4297_s15  ;;  %v2719_v56 = vld [vmem:[#allocation2 + $0x169] sm:$0xff] }
 0x53f   :  { %2933 = vrot.lane.b32.xlu0 %v2749_v55, %s4296_s14 }
 0x540   :  { %v2922_v63 = vpop.permute.xlu1 %2921  ;;  %v3468_v44 = vld [vmem:[#allocation3 + $0x28] sm:$0xff]  ;;  %2867 = vrot.lane.b32.xlu2 %v2716_v34, %s4296_s14 }
 0x541   :  { %3064 = vst.msk [vmem:[#allocation3 + $0x190] sm:$0xff] %vm3013_vm8, %v2922_v63  ;;  %4176 = vmatmul.msk.f32.gmra.mxu0 %vm3536_vm11, %v3468_v44  ;;  %v3307_v10 = vpop.permute.xlu0 %3306  ;;  %v6104_v44 = vld [vmem:[%s6420_s2] ss:$0 sm:$0xff] }
 0x542   :  { %3449 = vst.msk [vmem:[#allocation3 + $0x190] sm:$0xff] %vm3398_vm10, %v3307_v10  ;;  %v2924_v2 = vpop.permute.xlu2 %2923  ;;  %v3501_v57 = vld [vmem:[#allocation3 + $0x130] sm:$0xff] }
 0x543   :  { %3065 = vst.msk [vmem:[#allocation3 + $0x198] sm:$0xff] %vm3013_vm8, %v2924_v2  ;;  %4209 = vmatmul.msk.f32.gmra.mxu2 %vm3536_vm11, %v3501_v57  ;;  %v3469_v0 = vld [vmem:[#allocation3 + $0x30] sm:$0xff] }
 0x546   :  { %3294 = vrot.lane.b32.xlu1 %v3122_v21, %s4297_s15  ;;  %v3125_v21 = vld [vmem:[#allocation2 + $0x292] sm:$0xff] }
 0x547   :  { %2845 = vrot.lane.b32.xlu0 %v2705_v54, %s4296_s14  ;;  %v2708_v54 = vld [vmem:[#allocation2 + $0xe1] sm:$0xff] }
 0x548   :  { %v2858_v31 = vpop.permute.xlu1 %2857  ;;  %2909 = vrot.lane.b32.xlu2 %v2737_v25, %s4296_s14 }
 0x549   :  { %3032 = vst.msk [vmem:[#allocation3 + $0x90] sm:$0xff] %vm3013_vm8, %v2858_v31  ;;  %4177 = vmatmul.msk.f32.gmra.mxu0 %vm3536_vm11, %v3469_v0  ;;  %v3243_v16 = vpop.permute.xlu0 %3242  ;;  %v3513_v38 = vld [vmem:[#allocation3 + $0x190] sm:$0xff] }
 0x54a   :  { %3417 = vst.msk [vmem:[#allocation3 + $0x90] sm:$0xff] %vm3398_vm10, %v3243_v16  ;;  %v2860_v11 = vpop.permute.xlu2 %2859  ;;  %4221 = vmatmul.msk.f32.gmra.mxu3 %vm3536_vm11, %v3513_v38  ;;  %v2740_v31 = vld [vmem:[#allocation2 + $0x291] sm:$0xff] }
 0x54b   :  { %3033 = vst.msk [vmem:[#allocation3 + $0x98] sm:$0xff] %vm3013_vm8, %v2860_v11 }
 0x54e   :  { %2869 = vrot.lane.b32.xlu1 %v2717_v26, %s4296_s14 }
 0x54f   :  { %3254 = vrot.lane.b32.xlu0 %v3102_v50, %s4297_s15 }
 0x550   :  { %v2900_v58 = vpop.permute.xlu1 %2899  ;;  %3318 = vrot.lane.b32.xlu2 %v3134_v22, %s4297_s15 }
 0x551   :  { %3053 = vst.msk [vmem:[#allocation3 + $0x138] sm:$0xff] %vm3013_vm8, %v2900_v58  ;;  %v3285_v8 = vpop.permute.xlu0 %3284  ;;  %v3481_v62 = vld [vmem:[#allocation3 + $0x90] sm:$0xff] }
 0x552   :  { %3438 = vst.msk [vmem:[#allocation3 + $0x138] sm:$0xff] %vm3398_vm10, %v3285_v8  ;;  %v2902_v32 = vpop.permute.xlu2 %2901  ;;  %4189 = vmatmul.msk.f32.gmra.mxu1 %vm3536_vm11, %v3481_v62 }
 0x553   :  { %3054 = vst.msk [vmem:[#allocation3 + $0x140] sm:$0xff] %vm3013_vm8, %v2902_v32  ;;  %v2720_v32 = vld [vmem:[#allocation2 + $0x171] sm:$0xff] }
 0x556   :  { %2911 = vrot.lane.b32.xlu1 %v2738_v14, %s4296_s14  ;;  %v3105_v14 = vld [vmem:[#allocation2 + $0x172] sm:$0xff] }
 0x557   :  { %3296 = vrot.lane.b32.xlu0 %v3123_v47, %s4297_s15 }
 0x558   :  { %v3309_v18 = vpop.permute.xlu1 %3308  ;;  %3230 = vrot.lane.b32.xlu2 %v3090_v12, %s4297_s15 }
 0x559   :  { %3450 = vst.msk [vmem:[#allocation3 + $0x198] sm:$0xff] %vm3398_vm10, %v3309_v18  ;;  %v3221_v24 = vpop.permute.xlu0 %3220  ;;  %v3502_v59 = vld [vmem:[#allocation3 + $0x138] sm:$0xff] }
 0x55a   :  { %3406 = vst.msk [vmem:[#allocation3 + $0x38] sm:$0xff] %vm3398_vm10, %v3221_v24  ;;  %v3311_v7 = vpop.permute.xlu2 %3310  ;;  %4210 = vmatmul.msk.f32.gmra.mxu2 %vm3536_vm11, %v3502_v59  ;;  %v3137_v24 = vld [vmem:[#allocation2 + $0x322] sm:$0xff] }
 0x55e   :  { %3320 = vrot.lane.b32.xlu1 %v3135_v36, %s4297_s15 }
 0x55f   :  { %2871 = vrot.lane.b32.xlu0 %v2718_v41, %s4296_s14 }
 0x560   :  { %v3245_v60 = vpop.permute.xlu1 %3244  ;;  %v3514_v23 = vld [vmem:[#allocation3 + $0x198] sm:$0xff]  ;;  %2935 = vrot.lane.b32.xlu2 %v2750_v51, %s4296_s14 }
 0x561   :  { %3418 = vst.msk [vmem:[#allocation3 + $0x98] sm:$0xff] %vm3398_vm10, %v3245_v60  ;;  %4222 = vmatmul.msk.f32.gmra.mxu3 %vm3536_vm11, %v3514_v23  ;;  %v2926_v19 = vpop.permute.xlu0 %2925  ;;  %v3470_v5 = vld [vmem:[#allocation3 + $0x38] sm:$0xff] }
 0x562   :  { %3066 = vst.msk [vmem:[#allocation3 + $0x1a0] sm:$0xff] %vm3013_vm8, %v2926_v19  ;;  %v3247_v33 = vpop.permute.xlu2 %3246  ;;  %4178 = vmatmul.msk.f32.gmra.mxu0 %vm3536_vm11, %v3470_v5 }
 0x563   :  { %3451 = vst.msk [vmem:[#allocation3 + $0x1a0] sm:$0xff] %vm3398_vm10, %v3311_v7 }
 0x566   :  { %3232 = vrot.lane.b32.xlu1 %v3091_v46, %s4297_s15 }
 0x567   :  { %2913 = vrot.lane.b32.xlu0 %v2739_v37, %s4296_s14 }
 0x568   :  { %v3287_v30 = vpop.permute.xlu1 %3286  ;;  %v3482_v52 = vld [vmem:[#allocation3 + $0x98] sm:$0xff]  ;;  %2847 = vrot.lane.b32.xlu2 %v2706_v13, %s4296_s14 }
 0x569   :  { %3439 = vst.msk [vmem:[#allocation3 + $0x140] sm:$0xff] %vm3398_vm10, %v3287_v30  ;;  %4190 = vmatmul.msk.f32.gmra.mxu1 %vm3536_vm11, %v3482_v52  ;;  %v2862_v48 = vpop.permute.xlu0 %2861  ;;  %v2753_v52 = vld [vmem:[#allocation2 + $0x331] sm:$0xff] }
 0x56a   :  { %3034 = vst.msk [vmem:[#allocation3 + $0xa0] sm:$0xff] %vm3013_vm8, %v2862_v48  ;;  %v3289_v29 = vpop.permute.xlu2 %3288  ;;  %v3515_v6 = vld [vmem:[#allocation3 + $0x1a0] sm:$0xff] }
 0x56b   :  { %3419 = vst.msk [vmem:[#allocation3 + $0xa0] sm:$0xff] %vm3398_vm10, %v3247_v33  ;;  %4223 = vmatmul.msk.f32.gmra.mxu3 %vm3536_vm11, %v3515_v6  ;;  %v2721_v48 = vld [vmem:[#allocation2 + $0x181] sm:$0xff] }
 0x56e   :  { %2937 = vrot.lane.b32.xlu1 %v2751_v61, %s4296_s14  ;;  %v3093_v61 = vld [vmem:[#allocation2 + $0xe2] sm:$0xff] }
 0x56f   :  { %3322 = vrot.lane.b32.xlu0 %v3136_v9, %s4297_s15 }
 0x570   :  { %v3223_v27 = vpop.permute.xlu1 %3222  ;;  %v3503_v42 = vld [vmem:[#allocation3 + $0x140] sm:$0xff]  ;;  %3256 = vrot.lane.b32.xlu2 %v3103_v20, %s4297_s15 }
 0x571   :  { %3407 = vst.msk [vmem:[#allocation3 + $0x40] sm:$0xff] %vm3398_vm10, %v3223_v27  ;;  %4211 = vmatmul.msk.f32.gmra.mxu2 %vm3536_vm11, %v3503_v42  ;;  %v2904_v1 = vpop.permute.xlu0 %2903 }
 0x572   :  { %3055 = vst.msk [vmem:[#allocation3 + $0x148] sm:$0xff] %vm3013_vm8, %v2904_v1  ;;  %v3225_v49 = vpop.permute.xlu2 %3224  ;;  %v3483_v17 = vld [vmem:[#allocation3 + $0xa0] sm:$0xff] }
 0x573   :  { %3440 = vst.msk [vmem:[#allocation3 + $0x148] sm:$0xff] %vm3398_vm10, %v3289_v29  ;;  %4191 = vmatmul.msk.f32.gmra.mxu1 %vm3536_vm11, %v3483_v17 }
 0x574   :  { %3408 = vst.msk [vmem:[#allocation3 + $0x48] sm:$0xff] %vm3398_vm10, %v3225_v49 }
 0x576   :  { %2849 = vrot.lane.b32.xlu1 %v2707_v39, %s4296_s14 }
 0x577   :  { %3234 = vrot.lane.b32.xlu0 %v3092_v35, %s4297_s15 }
 0x578   :  { %v2928_v4 = vpop.permute.xlu1 %2927  ;;  %v3471_v3 = vld [vmem:[#allocation3 + $0x40] sm:$0xff]  ;;  %3298 = vrot.lane.b32.xlu2 %v3124_v28, %s4297_s15 }
 0x579   :  { %3067 = vst.msk [vmem:[#allocation3 + $0x1a8] sm:$0xff] %vm3013_vm8, %v2928_v4  ;;  %4179 = vmatmul.msk.f32.gmra.mxu0 %vm3536_vm11, %v3471_v3  ;;  %v3313_v15 = vpop.permute.xlu0 %3312 }
 0x57a   :  { %3452 = vst.msk [vmem:[#allocation3 + $0x1a8] sm:$0xff] %vm3398_vm10, %v3313_v15  ;;  %v3504_v43 = vld [vmem:[#allocation3 + $0x148] sm:$0xff]  ;;  %v2930_v40 = vpop.permute.xlu2 %2929 }
 0x57b   :  { %4212 = vmatmul.msk.f32.gmra.mxu2 %vm3536_vm11, %v3504_v43  ;;  %3068 = vst.msk [vmem:[#allocation3 + $0x1b0] sm:$0xff] %vm3013_vm8, %v2930_v40  ;;  %v3472_v55 = vld [vmem:[#allocation3 + $0x48] sm:$0xff]  ;;  %v3139_v40 = vld [vmem:[#allocation2 + $0x33a] sm:$0xff] }
 0x57c   :  { %v3106_v43 = vld [vmem:[#allocation2 + $0x182] sm:$0xff] }
 0x57e   :  { %3258 = vrot.lane.b32.xlu1 %v3104_v53, %s4297_s15 }
 0x57f   :  { %2939 = vrot.lane.b32.xlu0 %v2752_v45, %s4296_s14 }
 0x580   :  { %v2864_v34 = vpop.permute.xlu1 %2863  ;;  %v3750_v63 = vpop.f32.mrf.mxu0  ;;  %2873 = vrot.lane.b32.xlu2 %v2719_v56, %s4296_s14  ;;  %v3138_v56 = vld [vmem:[#allocation2 + $0x332] sm:$0xff] }
 0x581   :  { %3035 = vst.msk [vmem:[#allocation3 + $0xa8] sm:$0xff] %vm3013_vm8, %v2864_v34  ;;  %4180 = vmatmul.msk.f32.gmra.mxu0 %vm3536_vm11, %v3472_v55  ;;  %v3249_v10 = vpop.permute.xlu0 %3248  ;;  %v3516_v2 = vld [vmem:[#allocation3 + $0x1a8] sm:$0xff]  ;;  %v3751_v0 = vadd.f32 %v6104_v44, %v3750_v63 }
 0x582   :  { %3420 = vst.msk [vmem:[#allocation3 + $0xa8] sm:$0xff] %vm3398_vm10, %v3249_v10  ;;  %4224 = vmatmul.msk.f32.gmra.mxu3 %vm3536_vm11, %v3516_v2  ;;  %v2842_v57 = vpop.permute.xlu2 %2841 }
 0x583   :  { %3024 = vst.msk [vmem:[#allocation3 + $0x50] sm:$0xff] %vm3013_vm8, %v2842_v57  ;;  %v3942_v11 = vmax.f32 %v3751_v0, 0.0 }
 0x585   :  { %v3846_v25 = vpop.f32.mrf.mxu2  ;;  %v4007_v47 = vsel %vm4006_vm12, %v3942_v11, 0.0  ;;  %v2754_v11 = vld [vmem:[#allocation2 + $0x339] sm:$0xff] }
 0x586   :  { %3300 = vrot.lane.b32.xlu1 %v3125_v21, %s4297_s15  ;;  %v3847_v58 = vadd.f32 %v6104_v44, %v3846_v25 }
 0x587   :  { %2851 = vrot.lane.b32.xlu0 %v2708_v54, %s4296_s14 }
 0x588   :  { %v2906_v16 = vpop.permute.xlu1 %2905  ;;  %v3753_v38 = vpop.f32.mrf.mxu0  ;;  %2915 = vrot.lane.b32.xlu2 %v2740_v31, %s4296_s14  ;;  %v3974_v59 = vmax.f32 %v3847_v58, 0.0  ;;  %v2722_v31 = vld [vmem:[#allocation2 + $0x189] sm:$0xff] }
 0x589   :  { %3056 = vst.msk [vmem:[#allocation3 + $0x150] sm:$0xff] %vm3013_vm8, %v2906_v16  ;;  %v3754_v26 = vadd.f32 %v6104_v44, %v3753_v38  ;;  %v3291_v50 = vpop.permute.xlu0 %3290  ;;  %v3484_v22 = vld [vmem:[#allocation3 + $0xa8] sm:$0xff] }
 0x58a   :  { %3441 = vst.msk [vmem:[#allocation3 + $0x150] sm:$0xff] %vm3398_vm10, %v3291_v50  ;;  %4192 = vmatmul.msk.f32.gmra.mxu1 %vm3536_vm11, %v3484_v22  ;;  %v3251_v8 = vpop.permute.xlu2 %3250  ;;  %v4076_v33 = vsel %vm4006_vm12, %v3974_v59, 0.0  ;;  %v2755_v16 = vld [vmem:[#allocation2 + $0x349] sm:$0xff] }
 0x58b   :  { %v3943_v62 = vmax.f32 %v3754_v26, 0.0 }
 0x58d   :  { %v3849_v12 = vpop.f32.mrf.mxu2  ;;  %v4008_v18 = vsel %vm4006_vm12, %v3943_v62, 0.0 }
 0x58e   :  { %v3850_v7 = vadd.f32 %v6104_v44, %v3849_v12  ;;  %v4009_v36 = vadd.f32 %v4008_v18, %v4007_v47  ;;  %2875 = vrot.lane.b32.xlu1 %v2720_v32, %s4296_s14 }
 0x58f   :  { %3260 = vrot.lane.b32.xlu0 %v3105_v14, %s4297_s15 }
 0x590   :  { %v3975_v41 = vmax.f32 %v3850_v7, 0.0  ;;  %v3315_v51 = vpop.permute.xlu1 %3314  ;;  %v3756_v60 = vpop.f32.mrf.mxu0  ;;  %3324 = vrot.lane.b32.xlu2 %v3137_v24, %s4297_s15  ;;  %v3140_v24 = vld [vmem:[#allocation2 + $0x34a] sm:$0xff]  ;;  %v3108_v7 = vld [vmem:[#allocation2 + $0x19a] sm:$0xff] }
 0x591   :  { %3453 = vst.msk [vmem:[#allocation3 + $0x1b0] sm:$0xff] %vm3398_vm10, %v3315_v51  ;;  %v3757_v23 = vadd.f32 %v6104_v44, %v3756_v60  ;;  %v2866_v19 = vpop.permute.xlu0 %2865  ;;  %v3505_v5 = vld [vmem:[#allocation3 + $0x150] sm:$0xff] }
 0x592   :  { %v4077_v46 = vsel %vm4006_vm12, %v3975_v41, 0.0  ;;  %3036 = vst.msk [vmem:[#allocation3 + $0xb0] sm:$0xff] %vm3013_vm8, %v2866_v19  ;;  %4213 = vmatmul.msk.f32.gmra.mxu2 %vm3536_vm11, %v3505_v5  ;;  %v3293_v37 = vpop.permute.xlu2 %3292  ;;  %v3107_v41 = vld [vmem:[#allocation2 + $0x18a] sm:$0xff] }
 0x593   :  { %v4078_v13 = vadd.f32 %v4077_v46, %v4076_v33  ;;  %v3944_v30 = vmax.f32 %v3757_v23, 0.0  ;;  %3421 = vst.msk [vmem:[#allocation3 + $0xb0] sm:$0xff] %vm3398_vm10, %v3251_v8  ;;  %v2756_v5 = vld [vmem:[#allocation2 + $0x351] sm:$0xff]  ;;  %v2724_v33 = vld [vmem:[#allocation2 + $0x1a1] sm:$0xff]  ;;  %v2723_v46 = vld [vmem:[#allocation2 + $0x199] sm:$0xff] }
 0x595   :  { %v4010_v29 = vsel %vm4006_vm12, %v3944_v30, 0.0  ;;  %v3852_v6 = vpop.f32.mrf.mxu2 }
 0x596   :  { %v4011_v9 = vadd.f32 %v4010_v29, %v4009_v36  ;;  %v3853_v20 = vadd.f32 %v6104_v44, %v3852_v6  ;;  %2941 = vrot.lane.b32.xlu1 %v2753_v52, %s4296_s14  ;;  %v3109_v29 = vld [vmem:[#allocation2 + $0x1a2] sm:$0xff]  ;;  %v3141_v6 = vld [vmem:[#allocation2 + $0x352] sm:$0xff] }
 0x597   :  { %2877 = vrot.lane.b32.xlu0 %v2721_v48, %s4296_s14 }
 0x598   :  { %v3976_v27 = vmax.f32 %v3853_v20, 0.0  ;;  %v3227_v42 = vpop.permute.xlu1 %3226  ;;  %v3517_v1 = vld [vmem:[#allocation3 + $0x1b0] sm:$0xff]  ;;  %v3759_v49 = vpop.f32.mrf.mxu0  ;;  %3236 = vrot.lane.b32.xlu2 %v3093_v61, %s4297_s15 }
 0x599   :  { %3409 = vst.msk [vmem:[#allocation3 + $0x50] sm:$0xff] %vm3398_vm10, %v3227_v42  ;;  %4225 = vmatmul.msk.f32.gmra.mxu3 %vm3536_vm11, %v3517_v1  ;;  %v3760_v17 = vadd.f32 %v6104_v44, %v3759_v49  ;;  %v2908_v39 = vpop.permute.xlu0 %2907 }
 0x59a   :  { %v4079_v35 = vsel %vm4006_vm12, %v3976_v27, 0.0  ;;  %3057 = vst.msk [vmem:[#allocation3 + $0x158] sm:$0xff] %vm3013_vm8, %v2908_v39  ;;  %v3485_v28 = vld [vmem:[#allocation3 + $0xb0] sm:$0xff]  ;;  %v2868_v4 = vpop.permute.xlu2 %2867 }
 0x59b   :  { %v4080_v3 = vadd.f32 %v4079_v35, %v4078_v13  ;;  %v3945_v15 = vmax.f32 %v3760_v17, 0.0  ;;  %3442 = vst.msk [vmem:[#allocation3 + $0x158] sm:$0xff] %vm3398_vm10, %v3293_v37  ;;  %4193 = vmatmul.msk.f32.gmra.mxu1 %vm3536_vm11, %v3485_v28 }
 0x59c   :  { %3037 = vst.msk [vmem:[#allocation3 + $0xb8] sm:$0xff] %vm3013_vm8, %v2868_v4 }
 0x59d   :  { %v4012_v53 = vsel %vm4006_vm12, %v3945_v15, 0.0  ;;  %v3855_v45 = vpop.f32.mrf.mxu2 }
 0x59e   :  { %v4013_v55 = vadd.f32 %v4012_v53, %v4011_v9  ;;  %v3856_v34 = vadd.f32 %v6104_v44, %v3855_v45  ;;  %3262 = vrot.lane.b32.xlu1 %v3106_v43, %s4297_s15 }
 0x59f   :  { %3328 = vrot.lane.b32.xlu0 %v3139_v40, %s4297_s15 }
 0x5a0   :  { %v3977_v63 = vmax.f32 %v3856_v34, 0.0  ;;  %v2932_v10 = vpop.permute.xlu1 %2931  ;;  %v3473_v2 = vld [vmem:[#allocation3 + $0x50] sm:$0xff]  ;;  %3326 = vrot.lane.b32.xlu2 %v3138_v56, %s4297_s15 }
 0x5a1   :  { %3069 = vst.msk [vmem:[#allocation3 + $0x1b8] sm:$0xff] %vm3013_vm8, %v2932_v10  ;;  %4181 = vmatmul.msk.f32.gmra.mxu0 %vm3536_vm11, %v3473_v2  ;;  %v3317_v57 = vpop.permute.xlu0 %3316 }
 0x5a2   :  { %v4081_v21 = vsel %vm4006_vm12, %v3977_v63, 0.0  ;;  %3454 = vst.msk [vmem:[#allocation3 + $0x1b8] sm:$0xff] %vm3398_vm10, %v3317_v57  ;;  %v3506_v54 = vld [vmem:[#allocation3 + $0x158] sm:$0xff]  ;;  %v2910_v25 = vpop.permute.xlu2 %2909 }
 0x5a3   :  { %v4082_v0 = vadd.f32 %v4081_v21, %v4080_v3  ;;  %4214 = vmatmul.msk.f32.gmra.mxu2 %vm3536_vm11, %v3506_v54  ;;  %3058 = vst.msk [vmem:[#allocation3 + $0x160] sm:$0xff] %vm3013_vm8, %v2910_v25 }
 0x5a5   :  { %v3858_v38 = vpop.f32.mrf.mxu2 }
 0x5a6   :  { %2879 = vrot.lane.b32.xlu1 %v2722_v31, %s4296_s14  ;;  %v3859_v26 = vadd.f32 %v6104_v44, %v3858_v38 }
 0x5a7   :  { %2945 = vrot.lane.b32.xlu0 %v2755_v16, %s4296_s14  ;;  %v3762_v50 = vpop.f32.mrf.mxu0 }
 0x5a8   :  { %v2844_v22 = vpop.permute.xlu1 %2843  ;;  %v3978_v58 = vmax.f32 %v3859_v26, 0.0  ;;  %v3763_v8 = vadd.f32 %v6104_v44, %v3762_v50  ;;  %2943 = vrot.lane.b32.xlu2 %v2754_v11, %s4296_s14 }
 0x5a9   :  { %3025 = vst.msk [vmem:[#allocation3 + $0x58] sm:$0xff] %vm3013_vm8, %v2844_v22  ;;  %v3229_v62 = vpop.permute.xlu0 %3228  ;;  %v3518_v32 = vld [vmem:[#allocation3 + $0x1b8] sm:$0xff] }
 0x5aa   :  { %v4083_v14 = vsel %vm4006_vm12, %v3978_v58, 0.0  ;;  %v3946_v47 = vmax.f32 %v3763_v8, 0.0  ;;  %3410 = vst.msk [vmem:[#allocation3 + $0x58] sm:$0xff] %vm3398_vm10, %v3229_v62  ;;  %4226 = vmatmul.msk.f32.gmra.mxu3 %vm3536_vm11, %v3518_v32  ;;  %v3319_v12 = vpop.permute.xlu2 %3318 }
 0x5ab   :  { %v6164_v18 = vadd.f32 %v4083_v14, %v4082_v0 }
 0x5ac   :  { %v4014_v59 = vsel %vm4006_vm12, %v3946_v47, 0.0 }
 0x5ad   :  { %v6167_v36 = vadd.f32 %v4014_v59, %v4013_v55 }
 0x5ae   :  { %3330 = vrot.lane.b32.xlu1 %v3140_v24, %s4297_s15 }
 0x5af   :  { %3266 = vrot.lane.b32.xlu0 %v3108_v7, %s4297_s15 }
 0x5b0   :  { %v3253_v51 = vpop.permute.xlu1 %3252  ;;  %3264 = vrot.lane.b32.xlu2 %v3107_v41, %s4297_s15 }
 0x5b1   :  { %3422 = vst.msk [vmem:[#allocation3 + $0xb8] sm:$0xff] %vm3398_vm10, %v3253_v51  ;;  %v2934_v60 = vpop.permute.xlu0 %2933  ;;  %v3474_v23 = vld [vmem:[#allocation3 + $0x58] sm:$0xff] }
 0x5b2   :  { %3070 = vst.msk [vmem:[#allocation3 + $0x1c0] sm:$0xff] %vm3013_vm8, %v2934_v60  ;;  %4182 = vmatmul.msk.f32.gmra.mxu0 %vm3536_vm11, %v3474_v23  ;;  %v3231_v19 = vpop.permute.xlu2 %3230 }
 0x5b3   :  { %3455 = vst.msk [vmem:[#allocation3 + $0x1c0] sm:$0xff] %vm3398_vm10, %v3319_v12 }
 0x5b6   :  { %2947 = vrot.lane.b32.xlu1 %v2756_v5, %s4296_s14 }
 0x5b7   :  { %2883 = vrot.lane.b32.xlu0 %v2724_v33, %s4296_s14 }
 0x5b8   :  { %v3295_v37 = vpop.permute.xlu1 %3294  ;;  %v3486_v13 = vld [vmem:[#allocation3 + $0xb8] sm:$0xff]  ;;  %2881 = vrot.lane.b32.xlu2 %v2723_v46, %s4296_s14 }
 0x5b9   :  { %3443 = vst.msk [vmem:[#allocation3 + $0x160] sm:$0xff] %vm3398_vm10, %v3295_v37  ;;  %4194 = vmatmul.msk.f32.gmra.mxu1 %vm3536_vm11, %v3486_v13  ;;  %v2846_v30 = vpop.permute.xlu0 %2845 }
 0x5ba   :  { %3026 = vst.msk [vmem:[#allocation3 + $0x60] sm:$0xff] %vm3013_vm8, %v2846_v30  ;;  %v3519_v52 = vld [vmem:[#allocation3 + $0x1c0] sm:$0xff]  ;;  %v2936_v48 = vpop.permute.xlu2 %2935 }
 0x5bb   :  { %3411 = vst.msk [vmem:[#allocation3 + $0x60] sm:$0xff] %vm3398_vm10, %v3231_v19  ;;  %4227 = vmatmul.msk.f32.gmra.mxu3 %vm3536_vm11, %v3519_v52 }
 0x5bc   :  { %3071 = vst.msk [vmem:[#allocation3 + $0x1c8] sm:$0xff] %vm3013_vm8, %v2936_v48 }
 0x5be   :  { %3268 = vrot.lane.b32.xlu1 %v3109_v29, %s4297_s15 }
 0x5c0   :  { %v2870_v61 = vpop.permute.xlu1 %2869  ;;  %v3507_v9 = vld [vmem:[#allocation3 + $0x160] sm:$0xff]  ;;  %3332 = vrot.lane.b32.xlu2 %v3141_v6, %s4297_s15 }
 0x5c1   :  { %3038 = vst.msk [vmem:[#allocation3 + $0xc0] sm:$0xff] %vm3013_vm8, %v2870_v61  ;;  %4215 = vmatmul.msk.f32.gmra.mxu2 %vm3536_vm11, %v3507_v9  ;;  %v3255_v20 = vpop.permute.xlu0 %3254  ;;  %v3765_v61 = vpop.f32.mrf.mxu0 }
 0x5c2   :  { %3423 = vst.msk [vmem:[#allocation3 + $0xc0] sm:$0xff] %vm3398_vm10, %v3255_v20  ;;  %v3475_v27 = vld [vmem:[#allocation3 + $0x60] sm:$0xff]  ;;  %v2848_v42 = vpop.permute.xlu2 %2847 }
 0x5c3   :  { %4183 = vmatmul.msk.f32.gmra.mxu0 %vm3536_vm11, %v3475_v27  ;;  %3027 = vst.msk [vmem:[#allocation3 + $0x68] sm:$0xff] %vm3013_vm8, %v2848_v42  ;;  %v3861_v27 = vpop.f32.mrf.mxu2 }
 0x5c8   :  { %v2912_v1 = vpop.permute.xlu1 %2911 }
 0x5c9   :  { %3059 = vst.msk [vmem:[#allocation3 + $0x168] sm:$0xff] %vm3013_vm8, %v2912_v1  ;;  %v3297_v49 = vpop.permute.xlu0 %3296  ;;  %v3487_v17 = vld [vmem:[#allocation3 + $0xc0] sm:$0xff]  ;;  %v3768_v42 = vpop.f32.mrf.mxu0 }
 0x5ca   :  { %3444 = vst.msk [vmem:[#allocation3 + $0x168] sm:$0xff] %vm3398_vm10, %v3297_v49  ;;  %4195 = vmatmul.msk.f32.gmra.mxu1 %vm3536_vm11, %v3487_v17  ;;  %v3257_v39 = vpop.permute.xlu2 %3256  ;;  %v6250_v49 = vpop.f32.mrf.mxu3 }
 0x5cb   :  { %v6253_v17 = vpop.f32.mrf.mxu1 }
 0x5d0   :  { %v3321_v35 = vpop.permute.xlu1 %3320 }
 0x5d1   :  { %3456 = vst.msk [vmem:[#allocation3 + $0x1c8] sm:$0xff] %vm3398_vm10, %v3321_v35  ;;  %v2872_v28 = vpop.permute.xlu0 %2871  ;;  %v3508_v4 = vld [vmem:[#allocation3 + $0x168] sm:$0xff] }
 0x5d2   :  { %3039 = vst.msk [vmem:[#allocation3 + $0xc8] sm:$0xff] %vm3013_vm8, %v2872_v28  ;;  %4216 = vmatmul.msk.f32.gmra.mxu2 %vm3536_vm11, %v3508_v4  ;;  %v3299_v3 = vpop.permute.xlu2 %3298  ;;  %v6255_v28 = vpop.f32.mrf.mxu3 }
 0x5d3   :  { %3424 = vst.msk [vmem:[#allocation3 + $0xc8] sm:$0xff] %vm3398_vm10, %v3257_v39  ;;  %v3864_v39 = vpop.f32.mrf.mxu2  ;;  %v6257_v4 = vpop.f32.mrf.mxu1 }
 0x5d8   :  { %v3233_v15 = vpop.permute.xlu1 %3232  ;;  %v3520_v43 = vld [vmem:[#allocation3 + $0x1c8] sm:$0xff] }
 0x5d9   :  { %3412 = vst.msk [vmem:[#allocation3 + $0x68] sm:$0xff] %vm3398_vm10, %v3233_v15  ;;  %4228 = vmatmul.msk.f32.gmra.mxu3 %vm3536_vm11, %v3520_v43  ;;  %v2914_v40 = vpop.permute.xlu0 %2913 }
 0x5da   :  { %3060 = vst.msk [vmem:[#allocation3 + $0x170] sm:$0xff] %vm3013_vm8, %v2914_v40  ;;  %v3488_v53 = vld [vmem:[#allocation3 + $0xc8] sm:$0xff]  ;;  %v2874_v45 = vpop.permute.xlu2 %2873  ;;  %v6259_v43 = vpop.f32.mrf.mxu3 }
 0x5db   :  { %3445 = vst.msk [vmem:[#allocation3 + $0x170] sm:$0xff] %vm3398_vm10, %v3299_v3  ;;  %4196 = vmatmul.msk.f32.gmra.mxu1 %vm3536_vm11, %v3488_v53  ;;  %v6261_v40 = vpop.f32.mrf.mxu1 }
 0x5dc   :  { %3040 = vst.msk [vmem:[#allocation3 + $0xd0] sm:$0xff] %vm3013_vm8, %v2874_v45 }
 0x5dd   :  { %v3867_v3 = vpop.f32.mrf.mxu2 }
 0x5df   :  { %v3771_v35 = vpop.f32.mrf.mxu0 }
 0x5e0   :  { %v2938_v56 = vpop.permute.xlu1 %2937  ;;  %v3476_v55 = vld [vmem:[#allocation3 + $0x68] sm:$0xff] }
 0x5e1   :  { %3072 = vst.msk [vmem:[#allocation3 + $0x1d0] sm:$0xff] %vm3013_vm8, %v2938_v56  ;;  %4184 = vmatmul.msk.f32.gmra.mxu0 %vm3536_vm11, %v3476_v55  ;;  %v3323_v34 = vpop.permute.xlu0 %3322 }
 0x5e2   :  { %3457 = vst.msk [vmem:[#allocation3 + $0x1d0] sm:$0xff] %vm3398_vm10, %v3323_v34  ;;  %v3509_v63 = vld [vmem:[#allocation3 + $0x170] sm:$0xff]  ;;  %v2916_v10 = vpop.permute.xlu2 %2915 }
 0x5e3   :  { %4217 = vmatmul.msk.f32.gmra.mxu2 %vm3536_vm11, %v3509_v63  ;;  %3061 = vst.msk [vmem:[#allocation3 + $0x178] sm:$0xff] %vm3013_vm8, %v2916_v10 }
 0x5e4   :  { %v6263_v56 = vpop.f32.mrf.mxu3 }
 0x5e6   :  { %v6265_v55 = vpop.f32.mrf.mxu1 }
 0x5e8   :  { %v2850_v2 = vpop.permute.xlu1 %2849 }
 0x5e9   :  { %3028 = vst.msk [vmem:[#allocation3 + $0x70] sm:$0xff] %vm3013_vm8, %v2850_v2  ;;  %v3235_v57 = vpop.permute.xlu0 %3234  ;;  %v3521_v21 = vld [vmem:[#allocation3 + $0x1d0] sm:$0xff] }
 0x5ea   :  { %3413 = vst.msk [vmem:[#allocation3 + $0x70] sm:$0xff] %vm3398_vm10, %v3235_v57  ;;  %4229 = vmatmul.msk.f32.gmra.mxu3 %vm3536_vm11, %v3521_v21  ;;  %v3325_v54 = vpop.permute.xlu2 %3324 }
 0x5ee   :  { %v6267_v10 = vpop.f32.mrf.mxu3 }
 0x5f0   :  { %v3259_v25 = vpop.permute.xlu1 %3258  ;;  %v6269_v2 = vpop.f32.mrf.mxu1 }
 0x5f1   :  { %3425 = vst.msk [vmem:[#allocation3 + $0xd0] sm:$0xff] %vm3398_vm10, %v3259_v25  ;;  %v2940_v0 = vpop.permute.xlu0 %2939  ;;  %v3477_v31 = vld [vmem:[#allocation3 + $0x70] sm:$0xff] }
 0x5f2   :  { %3073 = vst.msk [vmem:[#allocation3 + $0x1d8] sm:$0xff] %vm3013_vm8, %v2940_v0  ;;  %4185 = vmatmul.msk.f32.gmra.mxu0 %vm3536_vm11, %v3477_v31  ;;  %v3237_v16 = vpop.permute.xlu2 %3236 }
 0x5f3   :  { %3458 = vst.msk [vmem:[#allocation3 + $0x1d8] sm:$0xff] %vm3398_vm10, %v3325_v54 }
 0x5f4   :  { %v3870_v53 = vpop.f32.mrf.mxu2 }
 0x5f6   :  { %v3774_v15 = vpop.f32.mrf.mxu0 }
 0x5f8   :  { %v3301_v38 = vpop.permute.xlu1 %3300  ;;  %v3489_v11 = vld [vmem:[#allocation3 + $0xd0] sm:$0xff] }
 0x5f9   :  { %3446 = vst.msk [vmem:[#allocation3 + $0x178] sm:$0xff] %vm3398_vm10, %v3301_v38  ;;  %4197 = vmatmul.msk.f32.gmra.mxu1 %vm3536_vm11, %v3489_v11  ;;  %v2852_v26 = vpop.permute.xlu0 %2851  ;;  %v3769_v38 = vadd.f32 %v6104_v44, %v3768_v42 }
 0x5fa   :  { %3029 = vst.msk [vmem:[#allocation3 + $0x78] sm:$0xff] %vm3013_vm8, %v2852_v26  ;;  %v3522_v50 = vld [vmem:[#allocation3 + $0x1d8] sm:$0xff]  ;;  %v3327_v22 = vpop.permute.xlu2 %3326 }
 0x5fb   :  { %3414 = vst.msk [vmem:[#allocation3 + $0x78] sm:$0xff] %vm3398_vm10, %v3237_v16  ;;  %4230 = vmatmul.msk.f32.gmra.mxu3 %vm3536_vm11, %v3522_v50  ;;  %v3766_v16 = vadd.f32 %v6104_v44, %v3765_v61 }
 0x5fe   :  { %v3777_v45 = vpop.f32.mrf.mxu0  ;;  %v3873_v34 = vpop.f32.mrf.mxu2 }
 0x600   :  { %v2876_v58 = vpop.permute.xlu1 %2875  ;;  %v3510_v8 = vld [vmem:[#allocation3 + $0x178] sm:$0xff] }
 0x601   :  { %3041 = vst.msk [vmem:[#allocation3 + $0xd8] sm:$0xff] %vm3013_vm8, %v2876_v58  ;;  %4218 = vmatmul.msk.f32.gmra.mxu2 %vm3536_vm11, %v3510_v8  ;;  %v3261_v62 = vpop.permute.xlu0 %3260  ;;  %v3947_v58 = vmax.f32 %v3766_v16, 0.0  ;;  %v3772_v8 = vadd.f32 %v6104_v44, %v3771_v35 }
 0x602   :  { %3426 = vst.msk [vmem:[#allocation3 + $0xd8] sm:$0xff] %vm3398_vm10, %v3261_v62  ;;  %v3478_v32 = vld [vmem:[#allocation3 + $0x78] sm:$0xff]  ;;  %v2944_v14 = vpop.permute.xlu2 %2943  ;;  %v3948_v62 = vmax.f32 %v3769_v38, 0.0 }
 0x603   :  { %4186 = vmatmul.msk.f32.gmra.mxu0 %vm3536_vm11, %v3478_v32  ;;  %3075 = vst.msk [vmem:[#allocation3 + $0x1e8] sm:$0xff] %vm3013_vm8, %v2944_v14  ;;  %v3865_v32 = vadd.f32 %v6104_v44, %v3864_v39  ;;  %v3775_v14 = vadd.f32 %v6104_v44, %v3774_v15 }
 0x605   :  { %v6271_v54 = vpop.f32.mrf.mxu3 }
 0x607   :  { %v6273_v25 = vpop.f32.mrf.mxu1 }
 0x608   :  { %v2942_v47 = vpop.permute.xlu1 %2941 }
 0x609   :  { %3074 = vst.msk [vmem:[#allocation3 + $0x1e0] sm:$0xff] %vm3013_vm8, %v2942_v47  ;;  %v2878_v12 = vpop.permute.xlu0 %2877  ;;  %v3490_v24 = vld [vmem:[#allocation3 + $0xd8] sm:$0xff]  ;;  %v3868_v47 = vadd.f32 %v6104_v44, %v3867_v3 }
 0x60a   :  { %3459 = vst.msk [vmem:[#allocation3 + $0x1e0] sm:$0xff] %vm3398_vm10, %v3327_v22  ;;  %4198 = vmatmul.msk.f32.gmra.mxu1 %vm3536_vm11, %v3490_v24  ;;  %v3265_v59 = vpop.permute.xlu2 %3264  ;;  %v3862_v22 = vadd.f32 %v6104_v44, %v3861_v27 }
 0x60b   :  { %3042 = vst.msk [vmem:[#allocation3 + $0xe0] sm:$0xff] %vm3013_vm8, %v2878_v12 }
 0x60c   :  { %v3979_v24 = vmax.f32 %v3862_v22, 0.0 }
 0x610   :  { %v3263_v7 = vpop.permute.xlu1 %3262 }
 0x611   :  { %3427 = vst.msk [vmem:[#allocation3 + $0xe0] sm:$0xff] %vm3398_vm10, %v3263_v7  ;;  %v3523_v41 = vld [vmem:[#allocation3 + $0x1e0] sm:$0xff]  ;;  %v3329_v51 = vpop.permute.xlu0 %3328  ;;  %v3949_v7 = vmax.f32 %v3772_v8, 0.0 }
 0x612   :  { %4231 = vmatmul.msk.f32.gmra.mxu3 %vm3536_vm11, %v3523_v41  ;;  %3460 = vst.msk [vmem:[#allocation3 + $0x1e8] sm:$0xff] %vm3398_vm10, %v3329_v51  ;;  %v2882_v60 = vpop.permute.xlu2 %2881  ;;  %v3778_v41 = vadd.f32 %v6104_v44, %v3777_v45  ;;  %v3871_v51 = vadd.f32 %v6104_v44, %v3870_v53 }
 0x613   :  { %3044 = vst.msk [vmem:[#allocation3 + $0xf0] sm:$0xff] %vm3013_vm8, %v2882_v60  ;;  %v4018_v60 = vsel %vm4006_vm12, %v3948_v62, 0.0 }
 0x615   :  { %v3876_v57 = vpop.f32.mrf.mxu2 }
 0x616   :  { %v3877_v27 = vadd.f32 %v6104_v44, %v3876_v57 }
 0x618   :  { %v2880_v23 = vpop.permute.xlu1 %2879  ;;  %v3491_v19 = vld [vmem:[#allocation3 + $0xe0] sm:$0xff]  ;;  %v6279_v26 = vpop.f32.mrf.mxu1 }
 0x619   :  { %3043 = vst.msk [vmem:[#allocation3 + $0xe8] sm:$0xff] %vm3013_vm8, %v2880_v23  ;;  %4199 = vmatmul.msk.f32.gmra.mxu1 %vm3536_vm11, %v3491_v19  ;;  %v2946_v5 = vpop.permute.xlu0 %2945  ;;  %v3524_v33 = vld [vmem:[#allocation3 + $0x1e8] sm:$0xff]  ;;  %v3980_v23 = vmax.f32 %v3865_v32, 0.0  ;;  %v3950_v19 = vmax.f32 %v3775_v14, 0.0 }
 0x61a   :  { %3428 = vst.msk [vmem:[#allocation3 + $0xe8] sm:$0xff] %vm3398_vm10, %v3265_v59  ;;  %4232 = vmatmul.msk.f32.gmra.mxu3 %vm3536_vm11, %v3524_v33  ;;  %v3333_v30 = vpop.permute.xlu2 %3332  ;;  %v4016_v59 = vsel %vm4006_vm12, %v3947_v58, 0.0  ;;  %v3984_v58 = vmax.f32 %v3877_v27, 0.0 }
 0x61b   :  { %3076 = vst.msk [vmem:[#allocation3 + $0x1f0] sm:$0xff] %vm3013_vm8, %v2946_v5  ;;  %v4087_v42 = vsel %vm4006_vm12, %v3980_v23, 0.0 }
 0x61c   :  { %v6277_v11 = vpop.f32.mrf.mxu3 }
 0x61e   :  { %v3780_v63 = vpop.f32.mrf.mxu0 }
 0x61f   :  { %v3781_v5 = vadd.f32 %v6104_v44, %v3780_v63 }
 0x620   :  { %v3331_v46 = vpop.permute.xlu1 %3330 }
 0x621   :  { %3461 = vst.msk [vmem:[#allocation3 + $0x1f0] sm:$0xff] %vm3398_vm10, %v3331_v46  ;;  %v3492_v37 = vld [vmem:[#allocation3 + $0xe8] sm:$0xff]  ;;  %v3267_v13 = vpop.permute.xlu0 %3266  ;;  %v4017_v46 = vadd.f32 %v4016_v59, %v6167_v36  ;;  %v4022_v36 = vsel %vm4006_vm12, %v3950_v19, 0.0 }
 0x622   :  { %4200 = vmatmul.msk.f32.gmra.mxu1 %vm3536_vm11, %v3492_v37  ;;  %3429 = vst.msk [vmem:[#allocation3 + $0xf0] sm:$0xff] %vm3398_vm10, %v3267_v13  ;;  %v3981_v37 = vmax.f32 %v3868_v47, 0.0  ;;  %v3874_v13 = vadd.f32 %v6104_v44, %v3873_v34 }
 0x624   :  { %v4089_v3 = vsel %vm4006_vm12, %v3981_v37, 0.0  ;;  %v3983_v53 = vmax.f32 %v3874_v13, 0.0  ;;  %v3799_v13 = vadd.f32 %v6104_v44, %v6253_v17 }
 0x626   :  { %v3879_v0 = vpop.f32.mrf.mxu2 }
 0x627   :  { %v3880_v63 = vadd.f32 %v6104_v44, %v3879_v0  ;;  %v4093_v0 = vsel %vm4006_vm12, %v3983_v53, 0.0 }
 0x628   :  { %v2948_v52 = vpop.permute.xlu1 %2947  ;;  %v3525_v48 = vld [vmem:[#allocation3 + $0x1f0] sm:$0xff] }
 0x629   :  { %3077 = vst.msk [vmem:[#allocation3 + $0x1f8] sm:$0xff] %vm3013_vm8, %v2948_v52  ;;  %4233 = vmatmul.msk.f32.gmra.mxu3 %vm3536_vm11, %v3525_v48  ;;  %v2884_v29 = vpop.permute.xlu0 %2883  ;;  %v3493_v6 = vld [vmem:[#allocation3 + $0xf0] sm:$0xff]  ;;  %v4085_v48 = vsel %vm4006_vm12, %v3979_v24, 0.0  ;;  %v3985_v59 = vmax.f32 %v3880_v63, 0.0 }
 0x62a   :  { %3462 = vst.msk [vmem:[#allocation3 + $0x1f8] sm:$0xff] %vm3398_vm10, %v3333_v30  ;;  %4201 = vmatmul.msk.f32.gmra.mxu1 %vm3536_vm11, %v3493_v6  ;;  %v3951_v6 = vmax.f32 %v3778_v41, 0.0  ;;  %v4086_v35 = vadd.f32 %v4085_v48, %v6164_v18 }
 0x62b   :  { %3045 = vst.msk [vmem:[#allocation3 + $0xf8] sm:$0xff] %vm3013_vm8, %v2884_v29  ;;  %v4020_v29 = vsel %vm4006_vm12, %v3949_v7, 0.0 }
 0x62c   :  { %v4024_v34 = vsel %vm4006_vm12, %v3951_v6, 0.0  ;;  %v4088_v16 = vadd.f32 %v4087_v42, %v4086_v35  ;;  %v4097_v6 = vsel %vm4006_vm12, %v3985_v59, 0.0  ;;  %v3895_v35 = vadd.f32 %v6104_v44, %v6250_v49 }
 0x62d   :  { %v6291_v33 = vpop.f32.mrf.mxu3 }
 0x62e   :  { %v4090_v14 = vadd.f32 %v4089_v3, %v4088_v16  ;;  %v3958_v3 = vmax.f32 %v3799_v13, 0.0 }
 0x62f   :  { %v3783_v21 = vpop.f32.mrf.mxu0 }
 0x630   :  { %v3269_v9 = vpop.permute.xlu1 %3268  ;;  %v3784_v61 = vadd.f32 %v6104_v44, %v3783_v21 }
 0x631   :  { %3430 = vst.msk [vmem:[#allocation3 + $0xf8] sm:$0xff] %vm3398_vm10, %v3269_v9  ;;  %v3526_v20 = vld [vmem:[#allocation3 + $0x1f8] sm:$0xff]  ;;  %v4019_v9 = vadd.f32 %v4018_v60, %v4017_v46 }
 0x632   :  { %4234 = vmatmul.msk.f32.gmra.mxu3 %vm3536_vm11, %v3526_v20  ;;  %v3982_v20 = vmax.f32 %v3871_v51, 0.0  ;;  %v3953_v21 = vmax.f32 %v3784_v61, 0.0 }
 0x633   :  { %v4021_v15 = vadd.f32 %v4020_v29, %v4019_v9  ;;  %v3802_v9 = vadd.f32 %v6104_v44, %v6257_v4  ;;  %v3805_v4 = vadd.f32 %v6104_v44, %v6261_v40  ;;  %v3990_v40 = vmax.f32 %v3895_v35, 0.0 }
 0x634   :  { %v4091_v38 = vsel %vm4006_vm12, %v3982_v20, 0.0  ;;  %v4028_v7 = vsel %vm4006_vm12, %v3953_v21, 0.0 }
 0x635   :  { %v4023_v22 = vadd.f32 %v4022_v36, %v4021_v15  ;;  %v4092_v60 = vadd.f32 %v4091_v38, %v4090_v14  ;;  %v3959_v16 = vmax.f32 %v3802_v9, 0.0 }
 0x636   :  { %v6295_v30 = vpop.f32.mrf.mxu1 }
 0x637   :  { %v4025_v47 = vadd.f32 %v4024_v34, %v4023_v22  ;;  %v4094_v48 = vadd.f32 %v4093_v0, %v4092_v60  ;;  %v3960_v0 = vmax.f32 %v3805_v4, 0.0  ;;  %v3904_v60 = vadd.f32 %v6104_v44, %v6263_v56 }
 0x638   :  { %v3494_v1 = vld [vmem:[#allocation3 + $0xf8] sm:$0xff] }
 0x639   :  { %4202 = vmatmul.msk.f32.gmra.mxu1 %vm3536_vm11, %v3494_v1  ;;  %v3952_v1 = vmax.f32 %v3781_v5, 0.0 }
 0x63e   :  { %v6312_v62 = vpop.f32.mrf.mxu3 }
 0x640   :  { %v3786_v31 = vpop.f32.mrf.mxu0 }
 0x641   :  { %v3787_v39 = vadd.f32 %v6104_v44, %v3786_v31  ;;  %v4026_v31 = vsel %vm4006_vm12, %v3952_v1, 0.0 }
 0x642   :  { %v4027_v23 = vadd.f32 %v4026_v31, %v4025_v47 }
 0x643   :  { %v3954_v8 = vmax.f32 %v3787_v39, 0.0 }
 0x644   :  { %v3882_v50 = vpop.f32.mrf.mxu2  ;;  %v4029_v29 = vadd.f32 %v4028_v7, %v4027_v23 }
 0x645   :  { %v3883_v18 = vadd.f32 %v6104_v44, %v3882_v50  ;;  %v4095_v50 = vsel %vm4006_vm12, %v3984_v58, 0.0  ;;  %v4030_v5 = vsel %vm4006_vm12, %v3954_v8, 0.0  ;;  %v3808_v58 = vadd.f32 %v6104_v44, %v6265_v55 }
 0x646   :  { %v4096_v20 = vadd.f32 %v4095_v50, %v4094_v48  ;;  %v4031_v27 = vadd.f32 %v4030_v5, %v4029_v29  ;;  %v3907_v48 = vadd.f32 %v6104_v44, %v6267_v10  ;;  %v3910_v10 = vadd.f32 %v6104_v44, %v6271_v54 }
 0x647   :  { %v6316_v24 = vpop.f32.mrf.mxu1  ;;  %v3986_v19 = vmax.f32 %v3883_v18, 0.0  ;;  %v3961_v50 = vmax.f32 %v3808_v58, 0.0 }
 0x648   :  { %v4098_v15 = vadd.f32 %v4097_v6, %v4096_v20 }
 0x649   :  { %v4099_v36 = vsel %vm4006_vm12, %v3986_v19, 0.0  ;;  %v4107_v19 = vsel %vm4006_vm12, %v3990_v40, 0.0  ;;  %v4044_v9 = vsel %vm4006_vm12, %v3961_v50, 0.0 }
 0x64a   :  { %v4100_v38 = vadd.f32 %v4099_v36, %v4098_v15  ;;  %v3994_v36 = vmax.f32 %v3907_v48, 0.0 }
 0x655   :  { %v3885_v52 = vpop.f32.mrf.mxu2 }
 0x656   :  { %v3886_v41 = vadd.f32 %v6104_v44, %v3885_v52 }
 0x658   :  { %v3987_v61 = vmax.f32 %v3886_v41, 0.0  ;;  %v6336_v34 = vpop.f32.mrf.mxu1 }
 0x65a   :  { %v4101_v63 = vsel %vm4006_vm12, %v3987_v61, 0.0 }
 0x65b   :  { %v4102_v14 = vadd.f32 %v4101_v63, %v4100_v38  ;;  %v4115_v63 = vsel %vm4006_vm12, %v3994_v36, 0.0 }
 0x65c   :  { %v6334_v53 = vpop.f32.mrf.mxu3 }
 0x65e   :  { %v3789_v12 = vpop.f32.mrf.mxu0 }
 0x65f   :  { %v3790_v57 = vadd.f32 %v6104_v44, %v3789_v12 }
 0x661   :  { %v3955_v51 = vmax.f32 %v3790_v57, 0.0  ;;  %v3898_v57 = vadd.f32 %v6104_v44, %v6255_v28  ;;  %v3901_v28 = vadd.f32 %v6104_v44, %v6259_v43 }
 0x663   :  { %v4032_v52 = vsel %vm4006_vm12, %v3955_v51, 0.0  ;;  %v3991_v55 = vmax.f32 %v3898_v57, 0.0  ;;  %v4040_v51 = vsel %vm4006_vm12, %v3959_v16, 0.0  ;;  %v3992_v13 = vmax.f32 %v3901_v28, 0.0 }
 0x664   :  { %v3817_v57 = vadd.f32 %v6104_v44, %v6279_v26  ;;  %v3995_v16 = vmax.f32 %v3910_v10, 0.0 }
 0x665   :  { %v4109_v56 = vsel %vm4006_vm12, %v3991_v55, 0.0 }
 0x666   :  { %v3888_v12 = vpop.f32.mrf.mxu2  ;;  %v4117_v58 = vsel %vm4006_vm12, %v3995_v16, 0.0 }
 0x667   :  { %v3889_v46 = vadd.f32 %v6104_v44, %v3888_v12  ;;  %v3811_v12 = vadd.f32 %v6104_v44, %v6269_v2  ;;  %v4042_v2 = vsel %vm4006_vm12, %v3960_v0, 0.0 }
 0x669   :  { %v3988_v1 = vmax.f32 %v3889_v46, 0.0  ;;  %v3962_v29 = vmax.f32 %v3811_v12, 0.0 }
 0x66b   :  { %v4103_v31 = vsel %vm4006_vm12, %v3988_v1, 0.0  ;;  %v4046_v1 = vsel %vm4006_vm12, %v3962_v29, 0.0 }
 0x66c   :  { %v4104_v7 = vadd.f32 %v4103_v31, %v4102_v14 }
 0x66d   :  { %v3924_v5 = vpop.f32.mrf.mxu3 }
 0x66f   :  { %v3792_v45 = vpop.f32.mrf.mxu0 }
 0x670   :  { %v3793_v32 = vadd.f32 %v6104_v44, %v3792_v45  ;;  %v4033_v45 = vadd.f32 %v4032_v52, %v4031_v27  ;;  %v3993_v52 = vmax.f32 %v3904_v60, 0.0 }
 0x672   :  { %v3956_v37 = vmax.f32 %v3793_v32, 0.0  ;;  %v4038_v32 = vsel %vm4006_vm12, %v3958_v3, 0.0  ;;  %v4113_v3 = vsel %vm4006_vm12, %v3993_v52, 0.0 }
 0x674   :  { %v4034_v39 = vsel %vm4006_vm12, %v3956_v37, 0.0 }
 0x675   :  { %v4035_v22 = vadd.f32 %v4034_v39, %v4033_v45  ;;  %v3814_v39 = vadd.f32 %v6104_v44, %v6273_v25  ;;  %v3913_v25 = vadd.f32 %v6104_v44, %v6277_v11  ;;  %v3823_v11 = vadd.f32 %v6104_v44, %v6316_v24 }
 0x676   :  { %v3828_v43 = vpop.f32.mrf.mxu1  ;;  %v3922_v24 = vadd.f32 %v6104_v44, %v6334_v53 }
 0x677   :  { %v3996_v31 = vmax.f32 %v3913_v25, 0.0  ;;  %v3966_v55 = vmax.f32 %v3823_v11, 0.0 }
 0x67e   :  { %v3927_v45 = vpop.f32.mrf.mxu3 }
 0x680   :  { %v3795_v42 = vpop.f32.mrf.mxu0 }
 0x681   :  { %v3796_v17 = vadd.f32 %v6104_v44, %v3795_v42  ;;  %v4111_v42 = vsel %vm4006_vm12, %v3992_v13, 0.0 }
 0x683   :  { %v3957_v21 = vmax.f32 %v3796_v17, 0.0 }
 0x684   :  { %v3891_v49 = vpop.f32.mrf.mxu2 }
 0x685   :  { %v3892_v18 = vadd.f32 %v6104_v44, %v3891_v49  ;;  %v4036_v8 = vsel %vm4006_vm12, %v3957_v21, 0.0  ;;  %v3963_v21 = vmax.f32 %v3814_v39, 0.0  ;;  %v3820_v49 = vadd.f32 %v6104_v44, %v6295_v30 }
 0x686   :  { %v4037_v47 = vadd.f32 %v4036_v8, %v4035_v22  ;;  %v3964_v22 = vmax.f32 %v3817_v57, 0.0  ;;  %v3919_v30 = vadd.f32 %v6104_v44, %v6312_v62  ;;  %v4054_v62 = vsel %vm4006_vm12, %v3966_v55, 0.0 }
 0x687   :  { %v3989_v59 = vmax.f32 %v3892_v18, 0.0  ;;  %v3831_v4 = vpop.f32.mrf.mxu1  ;;  %v4048_v54 = vsel %vm4006_vm12, %v3963_v21, 0.0  ;;  %v3916_v18 = vadd.f32 %v6104_v44, %v6291_v33  ;;  %v3965_v14 = vmax.f32 %v3820_v49, 0.0 }
 0x688   :  { %v4039_v41 = vadd.f32 %v4038_v32, %v4037_v47  ;;  %v4050_v32 = vsel %vm4006_vm12, %v3964_v22, 0.0  ;;  %v4119_v47 = vsel %vm4006_vm12, %v3996_v31, 0.0 }
 0x689   :  { %v4105_v23 = vsel %vm4006_vm12, %v3989_v59, 0.0  ;;  %v3997_v28 = vmax.f32 %v3916_v18, 0.0  ;;  %v4052_v33 = vsel %vm4006_vm12, %v3965_v14, 0.0 }
 0x68a   :  { %v4106_v46 = vadd.f32 %v4105_v23, %v4104_v7  ;;  %v4041_v37 = vadd.f32 %v4040_v51, %v4039_v41  ;;  %v3826_v7 = vadd.f32 %v6104_v44, %v6336_v34  ;;  %v3998_v51 = vmax.f32 %v3919_v30, 0.0 }
 0x68b   :  { %v4121_v41 = vsel %vm4006_vm12, %v3997_v28, 0.0 }
 0x68c   :  { %v4108_v6 = vadd.f32 %v4107_v19, %v4106_v46  ;;  %v4043_v61 = vadd.f32 %v4042_v2, %v4041_v37  ;;  %v3967_v19 = vmax.f32 %v3826_v7, 0.0  ;;  %v3925_v46 = vadd.f32 %v6104_v44, %v3924_v5  ;;  %v4262_v5 = vld [vmem:[%s6420_s2] ss:$0 sm:$0xff]  ;;  %s4298_s2 = smov [#allocation4]  }
 0x68d   :  { %v3829_v37 = vadd.f32 %v6104_v44, %v3828_v43  ;;  %v4123_v13 = vsel %vm4006_vm12, %v3998_v51, 0.0  ;;  %v3999_v2 = vmax.f32 %v3922_v24, 0.0  ;;  %s4159_s29 = sshll.u32 %s4298_s2, 4  ;;  %s4160_s29 = int_to_ptr.vmem [resolvable:$true] %s4159_s29 }
 0x68e   :  { %v4110_v20 = vadd.f32 %v4109_v56, %v4108_v6  ;;  %v4045_v27 = vadd.f32 %v4044_v9, %v4043_v61  ;;  %v4056_v6 = vsel %vm4006_vm12, %v3967_v19, 0.0  ;;  %v4000_v61 = vmax.f32 %v3925_v46, 0.0 }
 0x68f   :  { %v3968_v53 = vmax.f32 %v3829_v37, 0.0  ;;  %v3832_v56 = vadd.f32 %v6104_v44, %v3831_v4  ;;  %v4125_v52 = vsel %vm4006_vm12, %v3999_v2, 0.0  ;;  %v3928_v9 = vadd.f32 %v4262_v5, %v3927_v45 }
 0x690   :  { %v4112_v17 = vadd.f32 %v4111_v42, %v4110_v20  ;;  %v4047_v35 = vadd.f32 %v4046_v1, %v4045_v27  ;;  %v4127_v27 = vsel %vm4006_vm12, %v4000_v61, 0.0 }
 0x691   :  { %v4058_v42 = vsel %vm4006_vm12, %v3968_v53, 0.0  ;;  %v3969_v36 = vmax.f32 %v3832_v56, 0.0  ;;  %v4001_v39 = vmax.f32 %v3928_v9, 0.0 }
 0x692   :  { %v4114_v15 = vadd.f32 %v4113_v3, %v4112_v17  ;;  %v4049_v8 = vadd.f32 %v4048_v54, %v4047_v35 }
 0x693   :  { %v4129_v16 = vsel %vm4006_vm12, %v4001_v39, 0.0 }
 0x694   :  { %v4116_v38 = vadd.f32 %v4115_v63, %v4114_v15  ;;  %v4051_v0 = vadd.f32 %v4050_v32, %v4049_v8  ;;  %v4060_v63 = vsel %vm4006_vm12, %v3969_v36, 0.0 }
 0x695   :  { %v3930_v26 = vpop.f32.mrf.mxu3 }
 0x696   :  { %v4118_v40 = vadd.f32 %v4117_v58, %v4116_v38  ;;  %v3834_v12 = vpop.f32.mrf.mxu1  ;;  %v4053_v60 = vadd.f32 %v4052_v33, %v4051_v0  ;;  %v3931_v17 = vadd.f32 %v4262_v5, %v3930_v26 }
 0x697   :  { %v3835_v1 = vadd.f32 %v4262_v5, %v3834_v12 }
 0x698   :  { %v4120_v59 = vadd.f32 %v4119_v47, %v4118_v40  ;;  %v4055_v34 = vadd.f32 %v4054_v62, %v4053_v60  ;;  %v4002_v38 = vmax.f32 %v3931_v17, 0.0 }
 0x699   :  { %v3970_v21 = vmax.f32 %v3835_v1, 0.0 }
 0x69a   :  { %v4122_v50 = vadd.f32 %v4121_v41, %v4120_v59  ;;  %v4057_v43 = vadd.f32 %v4056_v6, %v4055_v34  ;;  %v4131_v40 = vsel %vm4006_vm12, %v4002_v38, 0.0 }
 0x69b   :  { %v4062_v58 = vsel %vm4006_vm12, %v3970_v21, 0.0 }
 0x69c   :  { %v4124_v29 = vadd.f32 %v4123_v13, %v4122_v50  ;;  %v4059_v10 = vadd.f32 %v4058_v42, %v4057_v43 }
 0x69d   :  { %v3933_v23 = vpop.f32.mrf.mxu3 }
 0x69e   :  { %v4126_v20 = vadd.f32 %v4125_v52, %v4124_v29  ;;  %v3934_v35 = vadd.f32 %v4262_v5, %v3933_v23  ;;  %v4061_v25 = vadd.f32 %v4060_v63, %v4059_v10 }
 0x69f   :  { %v3837_v48 = vpop.f32.mrf.mxu1 }
 0x6a0   :  { %v4128_v15 = vadd.f32 %v4127_v27, %v4126_v20  ;;  %v3838_v45 = vadd.f32 %v4262_v5, %v3837_v48  ;;  %v4003_v54 = vmax.f32 %v3934_v35, 0.0  ;;  %v4063_v8 = vadd.f32 %v4062_v58, %v4061_v25 }
 0x6a2   :  { %v4130_v22 = vadd.f32 %v4129_v16, %v4128_v15  ;;  %v3971_v31 = vmax.f32 %v3838_v45, 0.0  ;;  %v4133_v26 = vsel %vm4006_vm12, %v4003_v54, 0.0 }
 0x6a4   :  { %v4132_v32 = vadd.f32 %v4131_v40, %v4130_v22  ;;  %v4064_v30 = vsel %vm4006_vm12, %v3971_v31, 0.0 }
 0x6a5   :  { %v4065_v33 = vadd.f32 %v4064_v30, %v4063_v8 }
 0x6a6   :  { %v4134_v0 = vadd.f32 %v4133_v26, %v4132_v32 }
 0x6a7   :  { %v3840_v3 = vpop.f32.mrf.mxu1 }
 0x6a8   :  { %v3841_v57 = vadd.f32 %v4262_v5, %v3840_v3 }
 0x6aa   :  { %v3972_v18 = vmax.f32 %v3841_v57, 0.0 }
 0x6ac   :  { %v3936_v44 = vpop.f32.mrf.mxu3  ;;  %v4066_v12 = vsel %vm4006_vm12, %v3972_v18, 0.0 }
 0x6ad   :  { %v3937_v4 = vadd.f32 %v4262_v5, %v3936_v44  ;;  %v4067_v51 = vadd.f32 %v4066_v12, %v4065_v33 }
 0x6af   :  { %v4004_v49 = vmax.f32 %v3937_v4, 0.0 }
 0x6b1   :  { %v4135_v11 = vsel %vm4006_vm12, %v4004_v49, 0.0 }
 0x6b2   :  { %v4136_v7 = vadd.f32 %v4135_v11, %v4134_v0 }
 0x6b5   :  { %v3939_v14 = vpop.f32.mrf.mxu3 }
 0x6b6   :  { %v3940_v47 = vadd.f32 %v4262_v5, %v3939_v14  ;;  %v3843_v28 = vpop.f32.mrf.mxu1 }
 0x6b7   :  { %v3844_v59 = vadd.f32 %v4262_v5, %v3843_v28 }
 0x6b8   :  { %v4005_v55 = vmax.f32 %v3940_v47, 0.0 }
 0x6b9   :  { %v3973_v41 = vmax.f32 %v3844_v59, 0.0 }
 0x6ba   :  { %v4137_v24 = vsel %vm4006_vm12, %v4005_v55, 0.0 }
 0x6bb   :  { %v4138_v60 = vadd.f32 %v4137_v24, %v4136_v7  ;;  %v4068_v50 = vsel %vm4006_vm12, %v3973_v41, 0.0 }
 0x6bc   :  { %v4069_v23 = vadd.f32 %v4068_v50, %v4067_v51 }
 0x6bd   :  { %v4139_v62 = vrot.slane %v4138_v60, 4 }
 0x6be   :  { %v4070_v19 = vrot.slane %v4069_v23, 4 }
 0x6bf   :  { %v4140_v46 = vadd.f32 %v4139_v62, %v4138_v60 }
 0x6c0   :  { %v4071_v37 = vadd.f32 %v4070_v19, %v4069_v23 }
 0x6c1   :  { %v4141_v13 = vrot.slane %v4140_v46, 2 }
 0x6c2   :  { %v4072_v2 = vrot.slane %v4071_v37, 2 }
 0x6c3   :  { %v4142_v34 = vadd.f32 %v4141_v13, %v4140_v46 }
 0x6c4   :  { %v4073_v48 = vadd.f32 %v4072_v2, %v4071_v37 }
 0x6c5   :  { %v4143_v29 = vrot.slane %v4142_v34, 1 }
 0x6c6   :  { %v4074_v6 = vrot.slane %v4073_v48, 1 }
 0x6c7   :  { %v4144_v61 = vadd.f32 %v4143_v29, %v4142_v34 }
 0x6c8   :  { %v4075_v53 = vadd.f32 %v4074_v6, %v4073_v48 }
 0x6c9   :  { %v4146_v56 = vmul.f32 0.00390625, %v4144_v61 }
 0x6ca   :  { %v4145_v52 = vmul.f32 0.00390625, %v4075_v53 }
 0x6cc   :  { %v4150_v5 = vsel %vm4149_vm13, %v4146_v56, %v4145_v52 }
 0x6cd   :  { %4153 = vst.msk [vmem:[#allocation4] sm:$0x3] %vm4152_vm14, %v4150_v5 }
 0x6ce   :  { %4164 = dma.vmem_to_hbm [thread:$0]  %s4160_s29, 32, %s4162_s4, [#allocation5]  }
 0x6cf   :  { %4287 = dma.done.wait [#allocation5], 32  }
 0x6d0   :  { %4288 = vsyncadd [#allocation5], 4294967264 }
 0x6d1   :  { %4169 = vsyncpa [#allocation5], 1 }

</bundles_post_ra>
